<compile_context>
chip_gen: v7x
topology: tpu7x:2x2x1
jax: 0.10.0
libtpu: 0.0.40
codegen_flags: <defaults>
</compile_context>

<pallas_src>
import functools

import numpy as np
import jax
import jax.numpy as jnp
from jax import lax
from jax.experimental import pallas as pl
from jax.experimental.pallas import tpu as pltpu

EPS = 1e-5


# ----------------------------- Pallas kernels ------------------------------ #

def stem_kernel(p_ref, w_ref, g_ref, b_ref, o_ref):
    """conv0 + BN0 (batch stats) + ReLU + 2x2 MaxPool, fully fused.

    p_ref: (4Q, 9) conv0 im2col patches, rows ordered (pool_a, pool_b, n, h1, w1)
    w_ref: (9, C)  conv0 weight taps (k = dy*3 + dx)
    g_ref, b_ref: (1, C) BN affine params
    o_ref: (Q, C)  max-pooled output, rows ordered (n, h1, w1)
    """
    q = o_ref.shape[0]
    c = o_ref.shape[1]
    p = p_ref[...]                     # (4Q, 9) f32
    wm = w_ref[...]                    # (9, C)  f32

    # Cin=1, K=9, tiny C: conv0 as 9 VPU fused multiply-adds (skip the MXU,
    # which would be >95% padding at these shapes).
    y = jnp.zeros((4 * q, c), jnp.float32)
    for k in range(9):
        y = y + p[:, k:k + 1] * wm[k:k + 1, :]

    # Single-pass training-mode BN statistics over all N*H0*W0 positions.
    m = jnp.mean(y, axis=0, keepdims=True)
    v = jnp.maximum(jnp.mean(y * y, axis=0, keepdims=True) - m * m, 0.0)
    a = jnp.maximum(g_ref[...] * (y - m) * lax.rsqrt(v + EPS) + b_ref[...], 0.0)

    # 2x2 max pool: the four window taps are the four contiguous Q-row quarters
    # (sublane-aligned static slices).
    o_ref[...] = jnp.maximum(jnp.maximum(a[0 * q:1 * q, :], a[1 * q:2 * q, :]),
                             jnp.maximum(a[2 * q:3 * q, :], a[3 * q:4 * q, :]))


def block_head_kernel(r_ref, mask_ref, w1_ref, g1_ref, b1_ref,
                      w2_ref, g2_ref, b2_ref, fcw_ref, fcb_ref,
                      o_ref, buf_ref, *, n, w, pad):
    """Residual Block + global average pool + fc, fully fused.

    r_ref:    (Q, C)  max-pooled stem output, rows ordered (n, h1, w1)
    mask_ref: (Q, 9)  per-tap boundary validity masks (1.0 valid, 0.0 at border)
    w1_ref, w2_ref: (9, C, C) bf16 conv taps, layout (cin, cout), k = dy*3 + dx
    g*/b*:    (1, C)  BN affine params
    fcw_ref:  (C, 10), fcb_ref: (1, 10)
    o_ref:    (N, 10)
    buf_ref:  (Q + 2*pad, C) f32 VMEM scratch holding the padded conv input slab
    """
    q, c = r_ref.shape
    hw = q // n

    def conv3x3(wt_ref):
        # 3x3 conv (pad 1) as 9 row-shifted, boundary-masked reads of buf_ref
        # plus 9 small matmuls (bf16 operands, f32 accumulate).  No im2col
        # materialization in HBM or VMEM.
        acc = jnp.zeros((q, c), jnp.float32)
        k = 0
        for dy in range(3):
            for dx in range(3):
                delta = (dy - 1) * w + (dx - 1)
                xs = buf_ref[pl.ds(pad + delta, q), :] * mask_ref[:, k:k + 1]
                acc = acc + jnp.dot(xs.astype(jnp.bfloat16), wt_ref[k],
                                    preferred_element_type=jnp.float32)
                k += 1
        return acc

    def bn(y, g_ref, b_ref):
        # Single-pass batch statistics (training mode, biased variance).
        m = jnp.mean(y, axis=0, keepdims=True)
        v = jnp.maximum(jnp.mean(y * y, axis=0, keepdims=True) - m * m, 0.0)
        return g_ref[...] * (y - m) * lax.rsqrt(v + EPS) + b_ref[...]

    buf_ref[...] = jnp.zeros_like(buf_ref)          # zero the halo rows once
    r = r_ref[...]                                  # (Q, C)

    buf_ref[pl.ds(pad, q), :] = r
    a1 = jnp.maximum(bn(conv3x3(w1_ref), g1_ref, b1_ref), 0.0)

    buf_ref[pl.ds(pad, q), :] = a1
    y2 = bn(conv3x3(w2_ref), g2_ref, b2_ref)
    a2 = jnp.maximum(r + y2, 0.0)                   # residual + ReLU

    # AdaptiveAvgPool2d(1) + Linear: per-sample aligned-slice reduction
    # (replaces the dense kron averaging matrix + matmul of the old version).
    fcw = fcw_ref[...]
    fcb = fcb_ref[...]
    for i in range(n):
        pooled = jnp.mean(a2[i * hw:(i + 1) * hw, :], axis=0, keepdims=True)
        o_ref[pl.ds(i, 1), :] = jnp.dot(pooled, fcw,
                                        preferred_element_type=jnp.float32) + fcb


# ------------------------------- JAX glue ---------------------------------- #

def _vmem_specs(k):
    return [pl.BlockSpec(memory_space=pltpu.MemorySpace.VMEM) for _ in range(k)]


def _conv0_patches(x_nhwc, h_mp, w_mp):
    """im2col for conv0 (3x3, stride 2, pad 1, Cin=1) with rows ordered
    (pool_a, pool_b, n, h1, w1) so conv0+BN+ReLU+maxpool fuse in one kernel."""
    n = x_nhwc.shape[0]
    xp = jnp.pad(x_nhwc, ((0, 0), (1, 1), (1, 1), (0, 0)))[..., 0]  # (N, H+2, W+2)
    h_c0, w_c0 = 2 * h_mp, 2 * w_mp
    cols = [xp[:, dy:dy + 2 * h_c0 - 1:2, dx:dx + 2 * w_c0 - 1:2]
            for dy in range(3) for dx in range(3)]
    p = jnp.stack(cols, axis=-1)                       # (N, H0, W0, 9)
    p = p.reshape(n, h_mp, 2, w_mp, 2, 9)
    p = jnp.transpose(p, (2, 4, 0, 1, 3, 5))           # (a, b, n, h1, w1, 9)
    return p.reshape(4 * n * h_mp * w_mp, 9)


def _boundary_masks(n, h, w):
    """(Q, 9) float mask per 3x3 tap: 1.0 where the shifted neighbour is a real
    spatial neighbour, 0.0 where it would cross the zero-padding border
    (also prevents cross-row / cross-sample wrap of the row-shifted reads)."""
    r = np.arange(n * h * w)
    hi = (r // w) % h
    wi = r % w
    cols = []
    for dy in range(3):
        for dx in range(3):
            ok = ((hi + dy - 1 >= 0) & (hi + dy - 1 < h) &
                  (wi + dx - 1 >= 0) & (wi + dx - 1 < w))
            cols.append(ok.astype(np.float32))
    return jnp.asarray(np.stack(cols, axis=1))


def resnet_forward(x_nchw, params):
    (w0, g0, b0, w1, g1, b1, w2, g2, b2, fcw, fcb) = params
    n = x_nchw.shape[0]
    c = w0.shape[0]
    h_in, w_in = x_nchw.shape[2], x_nchw.shape[3]
    x = jnp.transpose(x_nchw, (0, 2, 3, 1)).astype(jnp.float32)   # NCHW -> NHWC

    h_c0 = (h_in - 1) // 2 + 1          # conv0: 3x3, stride 2, pad 1
    w_c0 = (w_in - 1) // 2 + 1
    assert h_c0 % 2 == 0 and w_c0 % 2 == 0, (
        "fused stem assumes an even conv0 output so MaxPool2d(2) drops nothing")
    h_mp, w_mp = h_c0 // 2, w_c0 // 2
    q = n * h_mp * w_mp

    # ---- kernel 1: conv0 + BN0 + ReLU + MaxPool (conv0 output never hits HBM)
    p0 = _conv0_patches(x, h_mp, w_mp)                           # (4Q, 9)
    w0m = jnp.transpose(w0[:, 0], (1, 2, 0)).reshape(9, c)       # (9, C)
    mp = pl.pallas_call(
        stem_kernel,
        out_shape=jax.ShapeDtypeStruct((q, c), jnp.float32),
        in_specs=_vmem_specs(4),
        out_specs=pl.BlockSpec(memory_space=pltpu.MemorySpace.VMEM),
    )(p0, w0m, g0.reshape(1, c), b0.reshape(1, c))

    # ---- kernel 2: Block (conv1+BN1+ReLU, conv2+BN2, residual ReLU) + AAP + fc
    pad = ((w_mp + 1 + 7) // 8) * 8                  # sublane-aligned halo rows
    masks = _boundary_masks(n, h_mp, w_mp)           # (Q, 9) constants
    # bf16 MXU operands (f32 accumulate) for the two block convs, per review.
    w1t = jnp.transpose(w1, (2, 3, 1, 0)).reshape(9, c, c).astype(jnp.bfloat16)
    w2t = jnp.transpose(w2, (2, 3, 1, 0)).reshape(9, c, c).astype(jnp.bfloat16)
    out = pl.pallas_call(
        functools.partial(block_head_kernel, n=n, w=w_mp, pad=pad),
        out_shape=jax.ShapeDtypeStruct((n, 10), jnp.float32),
        in_specs=_vmem_specs(10),
        out_specs=pl.BlockSpec(memory_space=pltpu.MemorySpace.VMEM),
        scratch_shapes=[pltpu.VMEM((q + 2 * pad, c), jnp.float32)],
    )(mp, masks, w1t, g1.reshape(1, c), b1.reshape(1, c),
      w2t, g2.reshape(1, c), b2.reshape(1, c),
      fcw.T.astype(jnp.float32), fcb.reshape(1, 10))
    return out


# --------------------------- reference (pure JAX) --------------------------- #

def reference_forward(x_nchw, params):
    (w0, g0, b0, w1, g1, b1, w2, g2, b2, fcw, fcb) = params
    x = jnp.transpose(x_nchw, (0, 2, 3, 1)).astype(jnp.float32)

    def conv(x, w_oihw, stride):
        w = jnp.transpose(w_oihw, (2, 3, 1, 0))
        return lax.conv_general_dilated(
            x, w, (stride, stride), ((1, 1), (1, 1)),
            dimension_numbers=("NHWC", "HWIO", "NHWC"))

    def bn(x, g, b):
        m = jnp.mean(x, axis=(0, 1, 2), keepdims=True)
        v = jnp.mean((x - m) ** 2, axis=(0, 1, 2), keepdims=True)
        return g * (x - m) * lax.rsqrt(v + EPS) + b

    y = jax.nn.relu(bn(conv(x, w0, 2), g0, b0))
    y = lax.reduce_window(y, -jnp.inf, lax.max, (1, 2, 2, 1), (1, 2, 2, 1), "VALID")
    r = y
    y1 = jax.nn.relu(bn(conv(r, w1, 1), g1, b1))
    y2 = bn(conv(y1, w2, 1), g2, b2)
    y = jax.nn.relu(r + y2)
    pooled = jnp.mean(y, axis=(1, 2))
    return pooled @ fcw.T + fcb


# --------------------------------- main ------------------------------------ #

def init_params(key, C, num_classes=10):
    ks = jax.random.split(key, 11)
    w0 = 0.3 * jax.random.normal(ks[0], (C, 1, 3, 3), jnp.float32)
    g0 = 1.0 + 0.1 * jax.random.normal(ks[1], (C,), jnp.float32)
    b0 = 0.1 * jax.random.normal(ks[2], (C,), jnp.float32)
    w1 = 0.3 * jax.random.normal(ks[3], (C, C, 3, 3), jnp.float32)
    g1 = 1.0 + 0.1 * jax.random.normal(ks[4], (C,), jnp.float32)
    b1 = 0.1 * jax.random.normal(ks[5], (C,), jnp.float32)
    w2 = 0.3 * jax.random.normal(ks[6], (C, C, 3, 3), jnp.float32)
    g2 = 1.0 + 0.1 * jax.random.normal(ks[7], (C,), jnp.float32)
    b2 = 0.1 * jax.random.normal(ks[8], (C,), jnp.float32)
    fcw = 0.3 * jax.random.normal(ks[9], (num_classes, C), jnp.float32)
    fcb = 0.1 * jax.random.normal(ks[10], (num_classes,), jnp.float32)
    return (w0, g0, b0, w1, g1, b1, w2, g2, b2, fcw, fcb)


if __name__ == "__main__":
    key = jax.random.PRNGKey(0)
    kx, kp = jax.random.split(key)
    C = 4
    x = jax.random.normal(kx, (2, 1, 16, 16), jnp.float32)   # (N, 1, H, W), NCHW
    params = init_params(kp, C)

    out = jax.jit(resnet_forward)(x, params)
    out = jax.block_until_ready(out)

    ref = reference_forward(x, params)
    # Block convs use bf16 MXU operands (per perf review for v6e/v7x), so the
    # comparison against the pure-f32 reference uses a correspondingly looser
    # tolerance; everything else (BN/ReLU/pool/fc) is f32.
    np.testing.assert_allclose(np.asarray(out), np.asarray(ref), rtol=5e-2, atol=5e-2)
    print("KERNEL_OK")
</pallas_src>

<mosaic_0001>
module attributes {stable_mosaic.version = 11 : i64} {
  func.func @stem_kernel(%arg0: memref<128x9xf32, #tpu.memory_space<vmem>>, %arg1: memref<9x4xf32, #tpu.memory_space<vmem>>, %arg2: memref<1x4xf32, #tpu.memory_space<vmem>>, %arg3: memref<1x4xf32, #tpu.memory_space<vmem>>, %arg4: memref<32x4xf32, #tpu.memory_space<vmem>>) attributes {dimension_semantics = [], scalar_prefetch = 0 : i64, scratch_operands = 0 : i64, tpu.core_type = #tpu.core_type<tc>} {
    %c0 = arith.constant 0 : index
    %c0_0 = arith.constant 0 : index
    %0 = vector.load %arg0[%c0, %c0_0] : memref<128x9xf32, #tpu.memory_space<vmem>>, vector<128x9xf32>
    %c0_1 = arith.constant 0 : index
    %c0_2 = arith.constant 0 : index
    %1 = vector.load %arg1[%c0_1, %c0_2] : memref<9x4xf32, #tpu.memory_space<vmem>>, vector<9x4xf32>
    %cst = arith.constant 0.000000e+00 : f32
    %2 = vector.broadcast %cst : f32 to vector<128x4xf32>
    %3 = vector.extract_strided_slice %0 {offsets = [0, 0], sizes = [128, 1], strides = [1, 1]} : vector<128x9xf32> to vector<128x1xf32>
    %4 = vector.extract_strided_slice %1 {offsets = [0, 0], sizes = [1, 4], strides = [1, 1]} : vector<9x4xf32> to vector<1x4xf32>
    %5 = vector.broadcast %3 : vector<128x1xf32> to vector<128x4xf32>
    %6 = vector.broadcast %4 : vector<1x4xf32> to vector<128x4xf32>
    %7 = arith.mulf %5, %6 : vector<128x4xf32>
    %8 = arith.addf %2, %7 : vector<128x4xf32>
    %9 = vector.extract_strided_slice %0 {offsets = [0, 1], sizes = [128, 1], strides = [1, 1]} : vector<128x9xf32> to vector<128x1xf32>
    %10 = vector.extract_strided_slice %1 {offsets = [1, 0], sizes = [1, 4], strides = [1, 1]} : vector<9x4xf32> to vector<1x4xf32>
    %11 = vector.broadcast %9 : vector<128x1xf32> to vector<128x4xf32>
    %12 = vector.broadcast %10 : vector<1x4xf32> to vector<128x4xf32>
    %13 = arith.mulf %11, %12 : vector<128x4xf32>
    %14 = arith.addf %8, %13 : vector<128x4xf32>
    %15 = vector.extract_strided_slice %0 {offsets = [0, 2], sizes = [128, 1], strides = [1, 1]} : vector<128x9xf32> to vector<128x1xf32>
    %16 = vector.extract_strided_slice %1 {offsets = [2, 0], sizes = [1, 4], strides = [1, 1]} : vector<9x4xf32> to vector<1x4xf32>
    %17 = vector.broadcast %15 : vector<128x1xf32> to vector<128x4xf32>
    %18 = vector.broadcast %16 : vector<1x4xf32> to vector<128x4xf32>
    %19 = arith.mulf %17, %18 : vector<128x4xf32>
    %20 = arith.addf %14, %19 : vector<128x4xf32>
    %21 = vector.extract_strided_slice %0 {offsets = [0, 3], sizes = [128, 1], strides = [1, 1]} : vector<128x9xf32> to vector<128x1xf32>
    %22 = vector.extract_strided_slice %1 {offsets = [3, 0], sizes = [1, 4], strides = [1, 1]} : vector<9x4xf32> to vector<1x4xf32>
    %23 = vector.broadcast %21 : vector<128x1xf32> to vector<128x4xf32>
    %24 = vector.broadcast %22 : vector<1x4xf32> to vector<128x4xf32>
    %25 = arith.mulf %23, %24 : vector<128x4xf32>
    %26 = arith.addf %20, %25 : vector<128x4xf32>
    %27 = vector.extract_strided_slice %0 {offsets = [0, 4], sizes = [128, 1], strides = [1, 1]} : vector<128x9xf32> to vector<128x1xf32>
    %28 = vector.extract_strided_slice %1 {offsets = [4, 0], sizes = [1, 4], strides = [1, 1]} : vector<9x4xf32> to vector<1x4xf32>
    %29 = vector.broadcast %27 : vector<128x1xf32> to vector<128x4xf32>
    %30 = vector.broadcast %28 : vector<1x4xf32> to vector<128x4xf32>
    %31 = arith.mulf %29, %30 : vector<128x4xf32>
    %32 = arith.addf %26, %31 : vector<128x4xf32>
    %33 = vector.extract_strided_slice %0 {offsets = [0, 5], sizes = [128, 1], strides = [1, 1]} : vector<128x9xf32> to vector<128x1xf32>
    %34 = vector.extract_strided_slice %1 {offsets = [5, 0], sizes = [1, 4], strides = [1, 1]} : vector<9x4xf32> to vector<1x4xf32>
    %35 = vector.broadcast %33 : vector<128x1xf32> to vector<128x4xf32>
    %36 = vector.broadcast %34 : vector<1x4xf32> to vector<128x4xf32>
    %37 = arith.mulf %35, %36 : vector<128x4xf32>
    %38 = arith.addf %32, %37 : vector<128x4xf32>
    %39 = vector.extract_strided_slice %0 {offsets = [0, 6], sizes = [128, 1], strides = [1, 1]} : vector<128x9xf32> to vector<128x1xf32>
    %40 = vector.extract_strided_slice %1 {offsets = [6, 0], sizes = [1, 4], strides = [1, 1]} : vector<9x4xf32> to vector<1x4xf32>
    %41 = vector.broadcast %39 : vector<128x1xf32> to vector<128x4xf32>
    %42 = vector.broadcast %40 : vector<1x4xf32> to vector<128x4xf32>
    %43 = arith.mulf %41, %42 : vector<128x4xf32>
    %44 = arith.addf %38, %43 : vector<128x4xf32>
    %45 = vector.extract_strided_slice %0 {offsets = [0, 7], sizes = [128, 1], strides = [1, 1]} : vector<128x9xf32> to vector<128x1xf32>
    %46 = vector.extract_strided_slice %1 {offsets = [7, 0], sizes = [1, 4], strides = [1, 1]} : vector<9x4xf32> to vector<1x4xf32>
    %47 = vector.broadcast %45 : vector<128x1xf32> to vector<128x4xf32>
    %48 = vector.broadcast %46 : vector<1x4xf32> to vector<128x4xf32>
    %49 = arith.mulf %47, %48 : vector<128x4xf32>
    %50 = arith.addf %44, %49 : vector<128x4xf32>
    %51 = vector.extract_strided_slice %0 {offsets = [0, 8], sizes = [128, 1], strides = [1, 1]} : vector<128x9xf32> to vector<128x1xf32>
    %52 = vector.extract_strided_slice %1 {offsets = [8, 0], sizes = [1, 4], strides = [1, 1]} : vector<9x4xf32> to vector<1x4xf32>
    %53 = vector.broadcast %51 : vector<128x1xf32> to vector<128x4xf32>
    %54 = vector.broadcast %52 : vector<1x4xf32> to vector<128x4xf32>
    %55 = arith.mulf %53, %54 : vector<128x4xf32>
    %56 = arith.addf %50, %55 : vector<128x4xf32>
    %cst_3 = arith.constant dense<0.000000e+00> : vector<4xf32>
    %57 = vector.multi_reduction <add>, %56, %cst_3 [0] : vector<128x4xf32> to vector<4xf32>
    %58 = vector.shape_cast %57 : vector<4xf32> to vector<1x4xf32>
    %cst_4 = arith.constant 1.280000e+02 : f32
    %59 = vector.broadcast %cst_4 : f32 to vector<1x4xf32>
    %60 = arith.divf %58, %59 : vector<1x4xf32>
    %61 = arith.mulf %56, %56 : vector<128x4xf32>
    %cst_5 = arith.constant dense<0.000000e+00> : vector<4xf32>
    %62 = vector.multi_reduction <add>, %61, %cst_5 [0] : vector<128x4xf32> to vector<4xf32>
    %63 = vector.shape_cast %62 : vector<4xf32> to vector<1x4xf32>
    %cst_6 = arith.constant 1.280000e+02 : f32
    %64 = vector.broadcast %cst_6 : f32 to vector<1x4xf32>
    %65 = arith.divf %63, %64 : vector<1x4xf32>
    %66 = arith.mulf %60, %60 : vector<1x4xf32>
    %67 = arith.subf %65, %66 : vector<1x4xf32>
    %cst_7 = arith.constant 0.000000e+00 : f32
    %68 = vector.broadcast %cst_7 : f32 to vector<1x4xf32>
    %69 = arith.maximumf %67, %68 : vector<1x4xf32>
    %c0_8 = arith.constant 0 : index
    %c0_9 = arith.constant 0 : index
    %70 = vector.load %arg2[%c0_8, %c0_9] : memref<1x4xf32, #tpu.memory_space<vmem>>, vector<1x4xf32>
    %71 = vector.broadcast %60 : vector<1x4xf32> to vector<128x4xf32>
    %72 = arith.subf %56, %71 : vector<128x4xf32>
    %73 = vector.broadcast %70 : vector<1x4xf32> to vector<128x4xf32>
    %74 = arith.mulf %73, %72 : vector<128x4xf32>
    %cst_10 = arith.constant 9.99999974E-6 : f32
    %75 = vector.broadcast %cst_10 : f32 to vector<1x4xf32>
    %76 = arith.addf %69, %75 : vector<1x4xf32>
    %77 = math.rsqrt %76 : vector<1x4xf32>
    %78 = vector.broadcast %77 : vector<1x4xf32> to vector<128x4xf32>
    %79 = arith.mulf %74, %78 : vector<128x4xf32>
    %c0_11 = arith.constant 0 : index
    %c0_12 = arith.constant 0 : index
    %80 = vector.load %arg3[%c0_11, %c0_12] : memref<1x4xf32, #tpu.memory_space<vmem>>, vector<1x4xf32>
    %81 = vector.broadcast %80 : vector<1x4xf32> to vector<128x4xf32>
    %82 = arith.addf %79, %81 : vector<128x4xf32>
    %cst_13 = arith.constant 0.000000e+00 : f32
    %83 = vector.broadcast %cst_13 : f32 to vector<128x4xf32>
    %84 = arith.maximumf %82, %83 : vector<128x4xf32>
    %85 = vector.extract_strided_slice %84 {offsets = [0, 0], sizes = [32, 4], strides = [1, 1]} : vector<128x4xf32> to vector<32x4xf32>
    %86 = vector.extract_strided_slice %84 {offsets = [32, 0], sizes = [32, 4], strides = [1, 1]} : vector<128x4xf32> to vector<32x4xf32>
    %87 = arith.maximumf %85, %86 : vector<32x4xf32>
    %88 = vector.extract_strided_slice %84 {offsets = [64, 0], sizes = [32, 4], strides = [1, 1]} : vector<128x4xf32> to vector<32x4xf32>
    %89 = vector.extract_strided_slice %84 {offsets = [96, 0], sizes = [32, 4], strides = [1, 1]} : vector<128x4xf32> to vector<32x4xf32>
    %90 = arith.maximumf %88, %89 : vector<32x4xf32>
    %91 = arith.maximumf %87, %90 : vector<32x4xf32>
    %c0_14 = arith.constant 0 : index
    %c0_15 = arith.constant 0 : index
    %92 = vector.load %arg4[%c0_14, %c0_15] : memref<32x4xf32, #tpu.memory_space<vmem>>, vector<32x4xf32>
    tpu.vector_store %arg4[%c0_14, %c0_15], %91 {strides = array<i32>} : memref<32x4xf32, #tpu.memory_space<vmem>>, vector<32x4xf32>,
    return
  }
}

module attributes {stable_mosaic.version = 11 : i64} {
  func.func @block_head_kernel(%arg0: memref<32x4xf32, #tpu.memory_space<vmem>>, %arg1: memref<32x9xf32, #tpu.memory_space<vmem>>, %arg2: memref<9x4x4xbf16, #tpu.memory_space<vmem>>, %arg3: memref<1x4xf32, #tpu.memory_space<vmem>>, %arg4: memref<1x4xf32, #tpu.memory_space<vmem>>, %arg5: memref<9x4x4xbf16, #tpu.memory_space<vmem>>, %arg6: memref<1x4xf32, #tpu.memory_space<vmem>>, %arg7: memref<1x4xf32, #tpu.memory_space<vmem>>, %arg8: memref<4x10xf32, #tpu.memory_space<vmem>>, %arg9: memref<1x10xf32, #tpu.memory_space<vmem>>, %arg10: memref<2x10xf32, #tpu.memory_space<vmem>>, %arg11: memref<48x4xf32, #tpu.memory_space<vmem>>) attributes {dimension_semantics = [], scalar_prefetch = 0 : i64, scratch_operands = 1 : i64, tpu.core_type = #tpu.core_type<tc>} {
    %cst = arith.constant 0.000000e+00 : f32
    %0 = vector.broadcast %cst : f32 to vector<48x4xf32>
    %c0 = arith.constant 0 : index
    %c0_0 = arith.constant 0 : index
    %1 = vector.load %arg11[%c0, %c0_0] : memref<48x4xf32, #tpu.memory_space<vmem>>, vector<48x4xf32>
    tpu.vector_store %arg11[%c0, %c0_0], %0 {strides = array<i32>} : memref<48x4xf32, #tpu.memory_space<vmem>>, vector<48x4xf32>,
    %c0_1 = arith.constant 0 : index
    %c0_2 = arith.constant 0 : index
    %2 = vector.load %arg0[%c0_1, %c0_2] : memref<32x4xf32, #tpu.memory_space<vmem>>, vector<32x4xf32>
    %c8 = arith.constant 8 : index
    %c0_3 = arith.constant 0 : index
    %3 = vector.load %arg11[%c8, %c0_3] : memref<48x4xf32, #tpu.memory_space<vmem>>, vector<32x4xf32>
    tpu.vector_store %arg11[%c8, %c0_3], %2 {strides = array<i32>} : memref<48x4xf32, #tpu.memory_space<vmem>>, vector<32x4xf32>,
    %cst_4 = arith.constant 0.000000e+00 : f32
    %4 = vector.broadcast %cst_4 : f32 to vector<32x4xf32>
    %c3 = arith.constant 3 : index
    %c0_5 = arith.constant 0 : index
    %5 = vector.load %arg11[%c3, %c0_5] : memref<48x4xf32, #tpu.memory_space<vmem>>, vector<32x4xf32>
    %c0_6 = arith.constant 0 : index
    %c0_7 = arith.constant 0 : index
    %6 = vector.load %arg1[%c0_6, %c0_7] : memref<32x9xf32, #tpu.memory_space<vmem>>, vector<32x1xf32>
    %7 = vector.broadcast %6 : vector<32x1xf32> to vector<32x4xf32>
    %8 = arith.mulf %5, %7 : vector<32x4xf32>
    %9 = arith.truncf %8 : vector<32x4xf32> to vector<32x4xbf16>
    %c0_8 = arith.constant 0 : index
    %c0_9 = arith.constant 0 : index
    %c0_10 = arith.constant 0 : index
    %10 = vector.load %arg2[%c0_8, %c0_9, %c0_10] : memref<9x4x4xbf16, #tpu.memory_space<vmem>>, vector<1x4x4xbf16>
    %11 = vector.shape_cast %10 : vector<1x4x4xbf16> to vector<4x4xbf16>
    %cst_11 = arith.constant dense<0.000000e+00> : vector<32x4xf32>
    %12 = tpu.matmul %9, %11, %cst_11 {dimension_numbers = #tpu.dot_dimension_numbers<[1], [0], [0], [1], [0, 0, 1, 1], [], []>} : vector<32x4xbf16>, vector<4x4xbf16>, vector<32x4xf32> -> vector<32x4xf32>
    %13 = arith.addf %4, %12 : vector<32x4xf32>
    %c4 = arith.constant 4 : index
    %c0_12 = arith.constant 0 : index
    %14 = vector.load %arg11[%c4, %c0_12] : memref<48x4xf32, #tpu.memory_space<vmem>>, vector<32x4xf32>
    %c0_13 = arith.constant 0 : index
    %c1 = arith.constant 1 : index
    %15 = vector.load %arg1[%c0_13, %c1] : memref<32x9xf32, #tpu.memory_space<vmem>>, vector<32x1xf32>
    %16 = vector.broadcast %15 : vector<32x1xf32> to vector<32x4xf32>
    %17 = arith.mulf %14, %16 : vector<32x4xf32>
    %18 = arith.truncf %17 : vector<32x4xf32> to vector<32x4xbf16>
    %c1_14 = arith.constant 1 : index
    %c0_15 = arith.constant 0 : index
    %c0_16 = arith.constant 0 : index
    %19 = vector.load %arg2[%c1_14, %c0_15, %c0_16] : memref<9x4x4xbf16, #tpu.memory_space<vmem>>, vector<1x4x4xbf16>
    %20 = vector.shape_cast %19 : vector<1x4x4xbf16> to vector<4x4xbf16>
    %cst_17 = arith.constant dense<0.000000e+00> : vector<32x4xf32>
    %21 = tpu.matmul %18, %20, %cst_17 {dimension_numbers = #tpu.dot_dimension_numbers<[1], [0], [0], [1], [0, 0, 1, 1], [], []>} : vector<32x4xbf16>, vector<4x4xbf16>, vector<32x4xf32> -> vector<32x4xf32>
    %22 = arith.addf %13, %21 : vector<32x4xf32>
    %c5 = arith.constant 5 : index
    %c0_18 = arith.constant 0 : index
    %23 = vector.load %arg11[%c5, %c0_18] : memref<48x4xf32, #tpu.memory_space<vmem>>, vector<32x4xf32>
    %c0_19 = arith.constant 0 : index
    %c2 = arith.constant 2 : index
    %24 = vector.load %arg1[%c0_19, %c2] : memref<32x9xf32, #tpu.memory_space<vmem>>, vector<32x1xf32>
    %25 = vector.broadcast %24 : vector<32x1xf32> to vector<32x4xf32>
    %26 = arith.mulf %23, %25 : vector<32x4xf32>
    %27 = arith.truncf %26 : vector<32x4xf32> to vector<32x4xbf16>
    %c2_20 = arith.constant 2 : index
    %c0_21 = arith.constant 0 : index
    %c0_22 = arith.constant 0 : index
    %28 = vector.load %arg2[%c2_20, %c0_21, %c0_22] : memref<9x4x4xbf16, #tpu.memory_space<vmem>>, vector<1x4x4xbf16>
    %29 = vector.shape_cast %28 : vector<1x4x4xbf16> to vector<4x4xbf16>
    %cst_23 = arith.constant dense<0.000000e+00> : vector<32x4xf32>
    %30 = tpu.matmul %27, %29, %cst_23 {dimension_numbers = #tpu.dot_dimension_numbers<[1], [0], [0], [1], [0, 0, 1, 1], [], []>} : vector<32x4xbf16>, vector<4x4xbf16>, vector<32x4xf32> -> vector<32x4xf32>
    %31 = arith.addf %22, %30 : vector<32x4xf32>
    %c7 = arith.constant 7 : index
    %c0_24 = arith.constant 0 : index
    %32 = vector.load %arg11[%c7, %c0_24] : memref<48x4xf32, #tpu.memory_space<vmem>>, vector<32x4xf32>
    %c0_25 = arith.constant 0 : index
    %c3_26 = arith.constant 3 : index
    %33 = vector.load %arg1[%c0_25, %c3_26] : memref<32x9xf32, #tpu.memory_space<vmem>>, vector<32x1xf32>
    %34 = vector.broadcast %33 : vector<32x1xf32> to vector<32x4xf32>
    %35 = arith.mulf %32, %34 : vector<32x4xf32>
    %36 = arith.truncf %35 : vector<32x4xf32> to vector<32x4xbf16>
    %c3_27 = arith.constant 3 : index
    %c0_28 = arith.constant 0 : index
    %c0_29 = arith.constant 0 : index
    %37 = vector.load %arg2[%c3_27, %c0_28, %c0_29] : memref<9x4x4xbf16, #tpu.memory_space<vmem>>, vector<1x4x4xbf16>
    %38 = vector.shape_cast %37 : vector<1x4x4xbf16> to vector<4x4xbf16>
    %cst_30 = arith.constant dense<0.000000e+00> : vector<32x4xf32>
    %39 = tpu.matmul %36, %38, %cst_30 {dimension_numbers = #tpu.dot_dimension_numbers<[1], [0], [0], [1], [0, 0, 1, 1], [], []>} : vector<32x4xbf16>, vector<4x4xbf16>, vector<32x4xf32> -> vector<32x4xf32>
    %40 = arith.addf %31, %39 : vector<32x4xf32>
    %c8_31 = arith.constant 8 : index
    %c0_32 = arith.constant 0 : index
    %41 = vector.load %arg11[%c8_31, %c0_32] : memref<48x4xf32, #tpu.memory_space<vmem>>, vector<32x4xf32>
    %c0_33 = arith.constant 0 : index
    %c4_34 = arith.constant 4 : index
    %42 = vector.load %arg1[%c0_33, %c4_34] : memref<32x9xf32, #tpu.memory_space<vmem>>, vector<32x1xf32>
    %43 = vector.broadcast %42 : vector<32x1xf32> to vector<32x4xf32>
    %44 = arith.mulf %41, %43 : vector<32x4xf32>
    %45 = arith.truncf %44 : vector<32x4xf32> to vector<32x4xbf16>
    %c4_35 = arith.constant 4 : index
    %c0_36 = arith.constant 0 : index
    %c0_37 = arith.constant 0 : index
    %46 = vector.load %arg2[%c4_35, %c0_36, %c0_37] : memref<9x4x4xbf16, #tpu.memory_space<vmem>>, vector<1x4x4xbf16>
    %47 = vector.shape_cast %46 : vector<1x4x4xbf16> to vector<4x4xbf16>
    %cst_38 = arith.constant dense<0.000000e+00> : vector<32x4xf32>
    %48 = tpu.matmul %45, %47, %cst_38 {dimension_numbers = #tpu.dot_dimension_numbers<[1], [0], [0], [1], [0, 0, 1, 1], [], []>} : vector<32x4xbf16>, vector<4x4xbf16>, vector<32x4xf32> -> vector<32x4xf32>
    %49 = arith.addf %40, %48 : vector<32x4xf32>
    %c9 = arith.constant 9 : index
    %c0_39 = arith.constant 0 : index
    %50 = vector.load %arg11[%c9, %c0_39] : memref<48x4xf32, #tpu.memory_space<vmem>>, vector<32x4xf32>
    %c0_40 = arith.constant 0 : index
    %c5_41 = arith.constant 5 : index
    %51 = vector.load %arg1[%c0_40, %c5_41] : memref<32x9xf32, #tpu.memory_space<vmem>>, vector<32x1xf32>
    %52 = vector.broadcast %51 : vector<32x1xf32> to vector<32x4xf32>
    %53 = arith.mulf %50, %52 : vector<32x4xf32>
    %54 = arith.truncf %53 : vector<32x4xf32> to vector<32x4xbf16>
    %c5_42 = arith.constant 5 : index
    %c0_43 = arith.constant 0 : index
    %c0_44 = arith.constant 0 : index
    %55 = vector.load %arg2[%c5_42, %c0_43, %c0_44] : memref<9x4x4xbf16, #tpu.memory_space<vmem>>, vector<1x4x4xbf16>
    %56 = vector.shape_cast %55 : vector<1x4x4xbf16> to vector<4x4xbf16>
    %cst_45 = arith.constant dense<0.000000e+00> : vector<32x4xf32>
    %57 = tpu.matmul %54, %56, %cst_45 {dimension_numbers = #tpu.dot_dimension_numbers<[1], [0], [0], [1], [0, 0, 1, 1], [], []>} : vector<32x4xbf16>, vector<4x4xbf16>, vector<32x4xf32> -> vector<32x4xf32>
    %58 = arith.addf %49, %57 : vector<32x4xf32>
    %c11 = arith.constant 11 : index
    %c0_46 = arith.constant 0 : index
    %59 = vector.load %arg11[%c11, %c0_46] : memref<48x4xf32, #tpu.memory_space<vmem>>, vector<32x4xf32>
    %c0_47 = arith.constant 0 : index
    %c6 = arith.constant 6 : index
    %60 = vector.load %arg1[%c0_47, %c6] : memref<32x9xf32, #tpu.memory_space<vmem>>, vector<32x1xf32>
    %61 = vector.broadcast %60 : vector<32x1xf32> to vector<32x4xf32>
    %62 = arith.mulf %59, %61 : vector<32x4xf32>
    %63 = arith.truncf %62 : vector<32x4xf32> to vector<32x4xbf16>
    %c6_48 = arith.constant 6 : index
    %c0_49 = arith.constant 0 : index
    %c0_50 = arith.constant 0 : index
    %64 = vector.load %arg2[%c6_48, %c0_49, %c0_50] : memref<9x4x4xbf16, #tpu.memory_space<vmem>>, vector<1x4x4xbf16>
    %65 = vector.shape_cast %64 : vector<1x4x4xbf16> to vector<4x4xbf16>
    %cst_51 = arith.constant dense<0.000000e+00> : vector<32x4xf32>
    %66 = tpu.matmul %63, %65, %cst_51 {dimension_numbers = #tpu.dot_dimension_numbers<[1], [0], [0], [1], [0, 0, 1, 1], [], []>} : vector<32x4xbf16>, vector<4x4xbf16>, vector<32x4xf32> -> vector<32x4xf32>
    %67 = arith.addf %58, %66 : vector<32x4xf32>
    %c12 = arith.constant 12 : index
    %c0_52 = arith.constant 0 : index
    %68 = vector.load %arg11[%c12, %c0_52] : memref<48x4xf32, #tpu.memory_space<vmem>>, vector<32x4xf32>
    %c0_53 = arith.constant 0 : index
    %c7_54 = arith.constant 7 : index
    %69 = vector.load %arg1[%c0_53, %c7_54] : memref<32x9xf32, #tpu.memory_space<vmem>>, vector<32x1xf32>
    %70 = vector.broadcast %69 : vector<32x1xf32> to vector<32x4xf32>
    %71 = arith.mulf %68, %70 : vector<32x4xf32>
    %72 = arith.truncf %71 : vector<32x4xf32> to vector<32x4xbf16>
    %c7_55 = arith.constant 7 : index
    %c0_56 = arith.constant 0 : index
    %c0_57 = arith.constant 0 : index
    %73 = vector.load %arg2[%c7_55, %c0_56, %c0_57] : memref<9x4x4xbf16, #tpu.memory_space<vmem>>, vector<1x4x4xbf16>
    %74 = vector.shape_cast %73 : vector<1x4x4xbf16> to vector<4x4xbf16>
    %cst_58 = arith.constant dense<0.000000e+00> : vector<32x4xf32>
    %75 = tpu.matmul %72, %74, %cst_58 {dimension_numbers = #tpu.dot_dimension_numbers<[1], [0], [0], [1], [0, 0, 1, 1], [], []>} : vector<32x4xbf16>, vector<4x4xbf16>, vector<32x4xf32> -> vector<32x4xf32>
    %76 = arith.addf %67, %75 : vector<32x4xf32>
    %c13 = arith.constant 13 : index
    %c0_59 = arith.constant 0 : index
    %77 = vector.load %arg11[%c13, %c0_59] : memref<48x4xf32, #tpu.memory_space<vmem>>, vector<32x4xf32>
    %c0_60 = arith.constant 0 : index
    %c8_61 = arith.constant 8 : index
    %78 = vector.load %arg1[%c0_60, %c8_61] : memref<32x9xf32, #tpu.memory_space<vmem>>, vector<32x1xf32>
    %79 = vector.broadcast %78 : vector<32x1xf32> to vector<32x4xf32>
    %80 = arith.mulf %77, %79 : vector<32x4xf32>
    %81 = arith.truncf %80 : vector<32x4xf32> to vector<32x4xbf16>
    %c8_62 = arith.constant 8 : index
    %c0_63 = arith.constant 0 : index
    %c0_64 = arith.constant 0 : index
    %82 = vector.load %arg2[%c8_62, %c0_63, %c0_64] : memref<9x4x4xbf16, #tpu.memory_space<vmem>>, vector<1x4x4xbf16>
    %83 = vector.shape_cast %82 : vector<1x4x4xbf16> to vector<4x4xbf16>
    %cst_65 = arith.constant dense<0.000000e+00> : vector<32x4xf32>
    %84 = tpu.matmul %81, %83, %cst_65 {dimension_numbers = #tpu.dot_dimension_numbers<[1], [0], [0], [1], [0, 0, 1, 1], [], []>} : vector<32x4xbf16>, vector<4x4xbf16>, vector<32x4xf32> -> vector<32x4xf32>
    %85 = arith.addf %76, %84 : vector<32x4xf32>
    %cst_66 = arith.constant dense<0.000000e+00> : vector<4xf32>
    %86 = vector.multi_reduction <add>, %85, %cst_66 [0] : vector<32x4xf32> to vector<4xf32>
    %87 = vector.shape_cast %86 : vector<4xf32> to vector<1x4xf32>
    %cst_67 = arith.constant 3.200000e+01 : f32
    %88 = vector.broadcast %cst_67 : f32 to vector<1x4xf32>
    %89 = arith.divf %87, %88 : vector<1x4xf32>
    %90 = arith.mulf %85, %85 : vector<32x4xf32>
    %cst_68 = arith.constant dense<0.000000e+00> : vector<4xf32>
    %91 = vector.multi_reduction <add>, %90, %cst_68 [0] : vector<32x4xf32> to vector<4xf32>
    %92 = vector.shape_cast %91 : vector<4xf32> to vector<1x4xf32>
    %cst_69 = arith.constant 3.200000e+01 : f32
    %93 = vector.broadcast %cst_69 : f32 to vector<1x4xf32>
    %94 = arith.divf %92, %93 : vector<1x4xf32>
    %95 = arith.mulf %89, %89 : vector<1x4xf32>
    %96 = arith.subf %94, %95 : vector<1x4xf32>
    %cst_70 = arith.constant 0.000000e+00 : f32
    %97 = vector.broadcast %cst_70 : f32 to vector<1x4xf32>
    %98 = arith.maximumf %96, %97 : vector<1x4xf32>
    %c0_71 = arith.constant 0 : index
    %c0_72 = arith.constant 0 : index
    %99 = vector.load %arg3[%c0_71, %c0_72] : memref<1x4xf32, #tpu.memory_space<vmem>>, vector<1x4xf32>
    %100 = vector.broadcast %89 : vector<1x4xf32> to vector<32x4xf32>
    %101 = arith.subf %85, %100 : vector<32x4xf32>
    %102 = vector.broadcast %99 : vector<1x4xf32> to vector<32x4xf32>
    %103 = arith.mulf %102, %101 : vector<32x4xf32>
    %cst_73 = arith.constant 9.99999974E-6 : f32
    %104 = vector.broadcast %cst_73 : f32 to vector<1x4xf32>
    %105 = arith.addf %98, %104 : vector<1x4xf32>
    %106 = math.rsqrt %105 : vector<1x4xf32>
    %107 = vector.broadcast %106 : vector<1x4xf32> to vector<32x4xf32>
    %108 = arith.mulf %103, %107 : vector<32x4xf32>
    %c0_74 = arith.constant 0 : index
    %c0_75 = arith.constant 0 : index
    %109 = vector.load %arg4[%c0_74, %c0_75] : memref<1x4xf32, #tpu.memory_space<vmem>>, vector<1x4xf32>
    %110 = vector.broadcast %109 : vector<1x4xf32> to vector<32x4xf32>
    %111 = arith.addf %108, %110 : vector<32x4xf32>
    %cst_76 = arith.constant 0.000000e+00 : f32
    %112 = vector.broadcast %cst_76 : f32 to vector<32x4xf32>
    %113 = arith.maximumf %111, %112 : vector<32x4xf32>
    %c8_77 = arith.constant 8 : index
    %c0_78 = arith.constant 0 : index
    %114 = vector.load %arg11[%c8_77, %c0_78] : memref<48x4xf32, #tpu.memory_space<vmem>>, vector<32x4xf32>
    tpu.vector_store %arg11[%c8_77, %c0_78], %113 {strides = array<i32>} : memref<48x4xf32, #tpu.memory_space<vmem>>, vector<32x4xf32>,
    %cst_79 = arith.constant 0.000000e+00 : f32
    %115 = vector.broadcast %cst_79 : f32 to vector<32x4xf32>
    %c3_80 = arith.constant 3 : index
    %c0_81 = arith.constant 0 : index
    %116 = vector.load %arg11[%c3_80, %c0_81] : memref<48x4xf32, #tpu.memory_space<vmem>>, vector<32x4xf32>
    %c0_82 = arith.constant 0 : index
    %c0_83 = arith.constant 0 : index
    %117 = vector.load %arg1[%c0_82, %c0_83] : memref<32x9xf32, #tpu.memory_space<vmem>>, vector<32x1xf32>
    %118 = vector.broadcast %117 : vector<32x1xf32> to vector<32x4xf32>
    %119 = arith.mulf %116, %118 : vector<32x4xf32>
    %120 = arith.truncf %119 : vector<32x4xf32> to vector<32x4xbf16>
    %c0_84 = arith.constant 0 : index
    %c0_85 = arith.constant 0 : index
    %c0_86 = arith.constant 0 : index
    %121 = vector.load %arg5[%c0_84, %c0_85, %c0_86] : memref<9x4x4xbf16, #tpu.memory_space<vmem>>, vector<1x4x4xbf16>
    %122 = vector.shape_cast %121 : vector<1x4x4xbf16> to vector<4x4xbf16>
    %cst_87 = arith.constant dense<0.000000e+00> : vector<32x4xf32>
    %123 = tpu.matmul %120, %122, %cst_87 {dimension_numbers = #tpu.dot_dimension_numbers<[1], [0], [0], [1], [0, 0, 1, 1], [], []>} : vector<32x4xbf16>, vector<4x4xbf16>, vector<32x4xf32> -> vector<32x4xf32>
    %124 = arith.addf %115, %123 : vector<32x4xf32>
    %c4_88 = arith.constant 4 : index
    %c0_89 = arith.constant 0 : index
    %125 = vector.load %arg11[%c4_88, %c0_89] : memref<48x4xf32, #tpu.memory_space<vmem>>, vector<32x4xf32>
    %c0_90 = arith.constant 0 : index
    %c1_91 = arith.constant 1 : index
    %126 = vector.load %arg1[%c0_90, %c1_91] : memref<32x9xf32, #tpu.memory_space<vmem>>, vector<32x1xf32>
    %127 = vector.broadcast %126 : vector<32x1xf32> to vector<32x4xf32>
    %128 = arith.mulf %125, %127 : vector<32x4xf32>
    %129 = arith.truncf %128 : vector<32x4xf32> to vector<32x4xbf16>
    %c1_92 = arith.constant 1 : index
    %c0_93 = arith.constant 0 : index
    %c0_94 = arith.constant 0 : index
    %130 = vector.load %arg5[%c1_92, %c0_93, %c0_94] : memref<9x4x4xbf16, #tpu.memory_space<vmem>>, vector<1x4x4xbf16>
    %131 = vector.shape_cast %130 : vector<1x4x4xbf16> to vector<4x4xbf16>
    %cst_95 = arith.constant dense<0.000000e+00> : vector<32x4xf32>
    %132 = tpu.matmul %129, %131, %cst_95 {dimension_numbers = #tpu.dot_dimension_numbers<[1], [0], [0], [1], [0, 0, 1, 1], [], []>} : vector<32x4xbf16>, vector<4x4xbf16>, vector<32x4xf32> -> vector<32x4xf32>
    %133 = arith.addf %124, %132 : vector<32x4xf32>
    %c5_96 = arith.constant 5 : index
    %c0_97 = arith.constant 0 : index
    %134 = vector.load %arg11[%c5_96, %c0_97] : memref<48x4xf32, #tpu.memory_space<vmem>>, vector<32x4xf32>
    %c0_98 = arith.constant 0 : index
    %c2_99 = arith.constant 2 : index
    %135 = vector.load %arg1[%c0_98, %c2_99] : memref<32x9xf32, #tpu.memory_space<vmem>>, vector<32x1xf32>
    %136 = vector.broadcast %135 : vector<32x1xf32> to vector<32x4xf32>
    %137 = arith.mulf %134, %136 : vector<32x4xf32>
    %138 = arith.truncf %137 : vector<32x4xf32> to vector<32x4xbf16>
    %c2_100 = arith.constant 2 : index
    %c0_101 = arith.constant 0 : index
    %c0_102 = arith.constant 0 : index
    %139 = vector.load %arg5[%c2_100, %c0_101, %c0_102] : memref<9x4x4xbf16, #tpu.memory_space<vmem>>, vector<1x4x4xbf16>
    %140 = vector.shape_cast %139 : vector<1x4x4xbf16> to vector<4x4xbf16>
    %cst_103 = arith.constant dense<0.000000e+00> : vector<32x4xf32>
    %141 = tpu.matmul %138, %140, %cst_103 {dimension_numbers = #tpu.dot_dimension_numbers<[1], [0], [0], [1], [0, 0, 1, 1], [], []>} : vector<32x4xbf16>, vector<4x4xbf16>, vector<32x4xf32> -> vector<32x4xf32>
    %142 = arith.addf %133, %141 : vector<32x4xf32>
    %c7_104 = arith.constant 7 : index
    %c0_105 = arith.constant 0 : index
    %143 = vector.load %arg11[%c7_104, %c0_105] : memref<48x4xf32, #tpu.memory_space<vmem>>, vector<32x4xf32>
    %c0_106 = arith.constant 0 : index
    %c3_107 = arith.constant 3 : index
    %144 = vector.load %arg1[%c0_106, %c3_107] : memref<32x9xf32, #tpu.memory_space<vmem>>, vector<32x1xf32>
    %145 = vector.broadcast %144 : vector<32x1xf32> to vector<32x4xf32>
    %146 = arith.mulf %143, %145 : vector<32x4xf32>
    %147 = arith.truncf %146 : vector<32x4xf32> to vector<32x4xbf16>
    %c3_108 = arith.constant 3 : index
    %c0_109 = arith.constant 0 : index
    %c0_110 = arith.constant 0 : index
    %148 = vector.load %arg5[%c3_108, %c0_109, %c0_110] : memref<9x4x4xbf16, #tpu.memory_space<vmem>>, vector<1x4x4xbf16>
    %149 = vector.shape_cast %148 : vector<1x4x4xbf16> to vector<4x4xbf16>
    %cst_111 = arith.constant dense<0.000000e+00> : vector<32x4xf32>
    %150 = tpu.matmul %147, %149, %cst_111 {dimension_numbers = #tpu.dot_dimension_numbers<[1], [0], [0], [1], [0, 0, 1, 1], [], []>} : vector<32x4xbf16>, vector<4x4xbf16>, vector<32x4xf32> -> vector<32x4xf32>
    %151 = arith.addf %142, %150 : vector<32x4xf32>
    %c8_112 = arith.constant 8 : index
    %c0_113 = arith.constant 0 : index
    %152 = vector.load %arg11[%c8_112, %c0_113] : memref<48x4xf32, #tpu.memory_space<vmem>>, vector<32x4xf32>
    %c0_114 = arith.constant 0 : index
    %c4_115 = arith.constant 4 : index
    %153 = vector.load %arg1[%c0_114, %c4_115] : memref<32x9xf32, #tpu.memory_space<vmem>>, vector<32x1xf32>
    %154 = vector.broadcast %153 : vector<32x1xf32> to vector<32x4xf32>
    %155 = arith.mulf %152, %154 : vector<32x4xf32>
    %156 = arith.truncf %155 : vector<32x4xf32> to vector<32x4xbf16>
    %c4_116 = arith.constant 4 : index
    %c0_117 = arith.constant 0 : index
    %c0_118 = arith.constant 0 : index
    %157 = vector.load %arg5[%c4_116, %c0_117, %c0_118] : memref<9x4x4xbf16, #tpu.memory_space<vmem>>, vector<1x4x4xbf16>
    %158 = vector.shape_cast %157 : vector<1x4x4xbf16> to vector<4x4xbf16>
    %cst_119 = arith.constant dense<0.000000e+00> : vector<32x4xf32>
    %159 = tpu.matmul %156, %158, %cst_119 {dimension_numbers = #tpu.dot_dimension_numbers<[1], [0], [0], [1], [0, 0, 1, 1], [], []>} : vector<32x4xbf16>, vector<4x4xbf16>, vector<32x4xf32> -> vector<32x4xf32>
    %160 = arith.addf %151, %159 : vector<32x4xf32>
    %c9_120 = arith.constant 9 : index
    %c0_121 = arith.constant 0 : index
    %161 = vector.load %arg11[%c9_120, %c0_121] : memref<48x4xf32, #tpu.memory_space<vmem>>, vector<32x4xf32>
    %c0_122 = arith.constant 0 : index
    %c5_123 = arith.constant 5 : index
    %162 = vector.load %arg1[%c0_122, %c5_123] : memref<32x9xf32, #tpu.memory_space<vmem>>, vector<32x1xf32>
    %163 = vector.broadcast %162 : vector<32x1xf32> to vector<32x4xf32>
    %164 = arith.mulf %161, %163 : vector<32x4xf32>
    %165 = arith.truncf %164 : vector<32x4xf32> to vector<32x4xbf16>
    %c5_124 = arith.constant 5 : index
    %c0_125 = arith.constant 0 : index
    %c0_126 = arith.constant 0 : index
    %166 = vector.load %arg5[%c5_124, %c0_125, %c0_126] : memref<9x4x4xbf16, #tpu.memory_space<vmem>>, vector<1x4x4xbf16>
    %167 = vector.shape_cast %166 : vector<1x4x4xbf16> to vector<4x4xbf16>
    %cst_127 = arith.constant dense<0.000000e+00> : vector<32x4xf32>
    %168 = tpu.matmul %165, %167, %cst_127 {dimension_numbers = #tpu.dot_dimension_numbers<[1], [0], [0], [1], [0, 0, 1, 1], [], []>} : vector<32x4xbf16>, vector<4x4xbf16>, vector<32x4xf32> -> vector<32x4xf32>
    %169 = arith.addf %160, %168 : vector<32x4xf32>
    %c11_128 = arith.constant 11 : index
    %c0_129 = arith.constant 0 : index
    %170 = vector.load %arg11[%c11_128, %c0_129] : memref<48x4xf32, #tpu.memory_space<vmem>>, vector<32x4xf32>
    %c0_130 = arith.constant 0 : index
    %c6_131 = arith.constant 6 : index
    %171 = vector.load %arg1[%c0_130, %c6_131] : memref<32x9xf32, #tpu.memory_space<vmem>>, vector<32x1xf32>
    %172 = vector.broadcast %171 : vector<32x1xf32> to vector<32x4xf32>
    %173 = arith.mulf %170, %172 : vector<32x4xf32>
    %174 = arith.truncf %173 : vector<32x4xf32> to vector<32x4xbf16>
    %c6_132 = arith.constant 6 : index
    %c0_133 = arith.constant 0 : index
    %c0_134 = arith.constant 0 : index
    %175 = vector.load %arg5[%c6_132, %c0_133, %c0_134] : memref<9x4x4xbf16, #tpu.memory_space<vmem>>, vector<1x4x4xbf16>
    %176 = vector.shape_cast %175 : vector<1x4x4xbf16> to vector<4x4xbf16>
    %cst_135 = arith.constant dense<0.000000e+00> : vector<32x4xf32>
    %177 = tpu.matmul %174, %176, %cst_135 {dimension_numbers = #tpu.dot_dimension_numbers<[1], [0], [0], [1], [0, 0, 1, 1], [], []>} : vector<32x4xbf16>, vector<4x4xbf16>, vector<32x4xf32> -> vector<32x4xf32>
    %178 = arith.addf %169, %177 : vector<32x4xf32>
    %c12_136 = arith.constant 12 : index
    %c0_137 = arith.constant 0 : index
    %179 = vector.load %arg11[%c12_136, %c0_137] : memref<48x4xf32, #tpu.memory_space<vmem>>, vector<32x4xf32>
    %c0_138 = arith.constant 0 : index
    %c7_139 = arith.constant 7 : index
    %180 = vector.load %arg1[%c0_138, %c7_139] : memref<32x9xf32, #tpu.memory_space<vmem>>, vector<32x1xf32>
    %181 = vector.broadcast %180 : vector<32x1xf32> to vector<32x4xf32>
    %182 = arith.mulf %179, %181 : vector<32x4xf32>
    %183 = arith.truncf %182 : vector<32x4xf32> to vector<32x4xbf16>
    %c7_140 = arith.constant 7 : index
    %c0_141 = arith.constant 0 : index
    %c0_142 = arith.constant 0 : index
    %184 = vector.load %arg5[%c7_140, %c0_141, %c0_142] : memref<9x4x4xbf16, #tpu.memory_space<vmem>>, vector<1x4x4xbf16>
    %185 = vector.shape_cast %184 : vector<1x4x4xbf16> to vector<4x4xbf16>
    %cst_143 = arith.constant dense<0.000000e+00> : vector<32x4xf32>
    %186 = tpu.matmul %183, %185, %cst_143 {dimension_numbers = #tpu.dot_dimension_numbers<[1], [0], [0], [1], [0, 0, 1, 1], [], []>} : vector<32x4xbf16>, vector<4x4xbf16>, vector<32x4xf32> -> vector<32x4xf32>
    %187 = arith.addf %178, %186 : vector<32x4xf32>
    %c13_144 = arith.constant 13 : index
    %c0_145 = arith.constant 0 : index
    %188 = vector.load %arg11[%c13_144, %c0_145] : memref<48x4xf32, #tpu.memory_space<vmem>>, vector<32x4xf32>
    %c0_146 = arith.constant 0 : index
    %c8_147 = arith.constant 8 : index
    %189 = vector.load %arg1[%c0_146, %c8_147] : memref<32x9xf32, #tpu.memory_space<vmem>>, vector<32x1xf32>
    %190 = vector.broadcast %189 : vector<32x1xf32> to vector<32x4xf32>
    %191 = arith.mulf %188, %190 : vector<32x4xf32>
    %192 = arith.truncf %191 : vector<32x4xf32> to vector<32x4xbf16>
    %c8_148 = arith.constant 8 : index
    %c0_149 = arith.constant 0 : index
    %c0_150 = arith.constant 0 : index
    %193 = vector.load %arg5[%c8_148, %c0_149, %c0_150] : memref<9x4x4xbf16, #tpu.memory_space<vmem>>, vector<1x4x4xbf16>
    %194 = vector.shape_cast %193 : vector<1x4x4xbf16> to vector<4x4xbf16>
    %cst_151 = arith.constant dense<0.000000e+00> : vector<32x4xf32>
    %195 = tpu.matmul %192, %194, %cst_151 {dimension_numbers = #tpu.dot_dimension_numbers<[1], [0], [0], [1], [0, 0, 1, 1], [], []>} : vector<32x4xbf16>, vector<4x4xbf16>, vector<32x4xf32> -> vector<32x4xf32>
    %196 = arith.addf %187, %195 : vector<32x4xf32>
    %cst_152 = arith.constant dense<0.000000e+00> : vector<4xf32>
    %197 = vector.multi_reduction <add>, %196, %cst_152 [0] : vector<32x4xf32> to vector<4xf32>
    %198 = vector.shape_cast %197 : vector<4xf32> to vector<1x4xf32>
    %cst_153 = arith.constant 3.200000e+01 : f32
    %199 = vector.broadcast %cst_153 : f32 to vector<1x4xf32>
    %200 = arith.divf %198, %199 : vector<1x4xf32>
    %201 = arith.mulf %196, %196 : vector<32x4xf32>
    %cst_154 = arith.constant dense<0.000000e+00> : vector<4xf32>
    %202 = vector.multi_reduction <add>, %201, %cst_154 [0] : vector<32x4xf32> to vector<4xf32>
    %203 = vector.shape_cast %202 : vector<4xf32> to vector<1x4xf32>
    %cst_155 = arith.constant 3.200000e+01 : f32
    %204 = vector.broadcast %cst_155 : f32 to vector<1x4xf32>
    %205 = arith.divf %203, %204 : vector<1x4xf32>
    %206 = arith.mulf %200, %200 : vector<1x4xf32>
    %207 = arith.subf %205, %206 : vector<1x4xf32>
    %cst_156 = arith.constant 0.000000e+00 : f32
    %208 = vector.broadcast %cst_156 : f32 to vector<1x4xf32>
    %209 = arith.maximumf %207, %208 : vector<1x4xf32>
    %c0_157 = arith.constant 0 : index
    %c0_158 = arith.constant 0 : index
    %210 = vector.load %arg6[%c0_157, %c0_158] : memref<1x4xf32, #tpu.memory_space<vmem>>, vector<1x4xf32>
    %211 = vector.broadcast %200 : vector<1x4xf32> to vector<32x4xf32>
    %212 = arith.subf %196, %211 : vector<32x4xf32>
    %213 = vector.broadcast %210 : vector<1x4xf32> to vector<32x4xf32>
    %214 = arith.mulf %213, %212 : vector<32x4xf32>
    %cst_159 = arith.constant 9.99999974E-6 : f32
    %215 = vector.broadcast %cst_159 : f32 to vector<1x4xf32>
    %216 = arith.addf %209, %215 : vector<1x4xf32>
    %217 = math.rsqrt %216 : vector<1x4xf32>
    %218 = vector.broadcast %217 : vector<1x4xf32> to vector<32x4xf32>
    %219 = arith.mulf %214, %218 : vector<32x4xf32>
    %c0_160 = arith.constant 0 : index
    %c0_161 = arith.constant 0 : index
    %220 = vector.load %arg7[%c0_160, %c0_161] : memref<1x4xf32, #tpu.memory_space<vmem>>, vector<1x4xf32>
    %221 = vector.broadcast %220 : vector<1x4xf32> to vector<32x4xf32>
    %222 = arith.addf %219, %221 : vector<32x4xf32>
    %223 = arith.addf %2, %222 : vector<32x4xf32>
    %cst_162 = arith.constant 0.000000e+00 : f32
    %224 = vector.broadcast %cst_162 : f32 to vector<32x4xf32>
    %225 = arith.maximumf %223, %224 : vector<32x4xf32>
    %c0_163 = arith.constant 0 : index
    %c0_164 = arith.constant 0 : index
    %226 = vector.load %arg8[%c0_163, %c0_164] : memref<4x10xf32, #tpu.memory_space<vmem>>, vector<4x10xf32>
    %c0_165 = arith.constant 0 : index
    %c0_166 = arith.constant 0 : index
    %227 = vector.load %arg9[%c0_165, %c0_166] : memref<1x10xf32, #tpu.memory_space<vmem>>, vector<1x10xf32>
    %228 = vector.extract_strided_slice %225 {offsets = [0, 0], sizes = [16, 4], strides = [1, 1]} : vector<32x4xf32> to vector<16x4xf32>
    %cst_167 = arith.constant dense<0.000000e+00> : vector<4xf32>
    %229 = vector.multi_reduction <add>, %228, %cst_167 [0] : vector<16x4xf32> to vector<4xf32>
    %230 = vector.shape_cast %229 : vector<4xf32> to vector<1x4xf32>
    %cst_168 = arith.constant 1.600000e+01 : f32
    %231 = vector.broadcast %cst_168 : f32 to vector<1x4xf32>
    %232 = arith.divf %230, %231 : vector<1x4xf32>
    %cst_169 = arith.constant dense<0.000000e+00> : vector<1x10xf32>
    %233 = tpu.matmul %232, %226, %cst_169 {dimension_numbers = #tpu.dot_dimension_numbers<[1], [0], [0], [1], [0, 0, 1, 1], [], []>} : vector<1x4xf32>, vector<4x10xf32>, vector<1x10xf32> -> vector<1x10xf32>
    %234 = arith.addf %233, %227 : vector<1x10xf32>
    %c0_170 = arith.constant 0 : index
    %c0_171 = arith.constant 0 : index
    %235 = vector.load %arg10[%c0_170, %c0_171] : memref<2x10xf32, #tpu.memory_space<vmem>>, vector<1x10xf32>
    tpu.vector_store %arg10[%c0_170, %c0_171], %234 {strides = array<i32>} : memref<2x10xf32, #tpu.memory_space<vmem>>, vector<1x10xf32>,
    %236 = vector.extract_strided_slice %225 {offsets = [16, 0], sizes = [16, 4], strides = [1, 1]} : vector<32x4xf32> to vector<16x4xf32>
    %cst_172 = arith.constant dense<0.000000e+00> : vector<4xf32>
    %237 = vector.multi_reduction <add>, %236, %cst_172 [0] : vector<16x4xf32> to vector<4xf32>
    %238 = vector.shape_cast %237 : vector<4xf32> to vector<1x4xf32>
    %cst_173 = arith.constant 1.600000e+01 : f32
    %239 = vector.broadcast %cst_173 : f32 to vector<1x4xf32>
    %240 = arith.divf %238, %239 : vector<1x4xf32>
    %cst_174 = arith.constant dense<0.000000e+00> : vector<1x10xf32>
    %241 = tpu.matmul %240, %226, %cst_174 {dimension_numbers = #tpu.dot_dimension_numbers<[1], [0], [0], [1], [0, 0, 1, 1], [], []>} : vector<1x4xf32>, vector<4x10xf32>, vector<1x10xf32> -> vector<1x10xf32>
    %242 = arith.addf %241, %227 : vector<1x10xf32>
    %c1_175 = arith.constant 1 : index
    %c0_176 = arith.constant 0 : index
    %243 = vector.load %arg10[%c1_175, %c0_176] : memref<2x10xf32, #tpu.memory_space<vmem>>, vector<1x10xf32>
    tpu.vector_store %arg10[%c1_175, %c0_176], %242 {strides = array<i32>} : memref<2x10xf32, #tpu.memory_space<vmem>>, vector<1x10xf32>,
    return
  }
}

</mosaic_0001>

<bundles_post_ra>
// kernel: resnet_forward.2
= control target key start
LH: loop header
LB: loop body
LE: loop exit
PB: predicated region body
PF: predicated region fallthrough
CT: control target
= control target key end

     0   :  { %v1206_v0 = vmov 0   ;;  %v1207_v17 = vmov 1   ;;  %v1208_v18 = vmov 2   ;;  %v1209_v19 = vmov 3   ;;  %s2121_s0 = inlined_call_operand.vmem [shape: f32[128,9], index: 0, kind: input, shape index: {}]   ;;  %s2122_s1 = inlined_call_operand.vmem [shape: f32[9,4], index: 1, kind: input, shape index: {}]   ;;  %s2123_s2 = inlined_call_operand.vmem [shape: f32[1,4], index: 2, kind: input, shape index: {}]   ;;  %s2124_s3 = inlined_call_operand.vmem [shape: f32[1,4], index: 3, kind: input, shape index: {}]   ;;  %s2125_s4 = inlined_call_operand.vmem [shape: f32[32,4], index: 4, kind: output, shape index: {}]  }
   0x1   :  { %1177 = vset.pattern.permute.xlu1 %v1206_v0  ;;  %1176 = vset.pattern.permute.xlu0 %v1206_v0  ;;  %v1243_v1 = vld [vmem:[%s2121_s0 + $0x10] sm:$0xff]  ;;  %v1248_v2 = vld [vmem:[%s2121_s0] sm:$0xff]  ;;  %v1255_v3 = vld [vmem:[%s2121_s0 + $0x18] sm:$0xff]  ;;  %v1210_v21 = vmov 4   ;;  %v1211_v37 = vmov 5   ;;  %v2126_v54 = vmov 8  }
   0x2   :  { %47 = vperm.xlu1 %1177, %v1243_v1   ;;  %37 = vperm.xlu0 %1176, %v1248_v2   ;;  %v1260_v4 = vld [vmem:[%s2121_s0 + $0x8] sm:$0xff]  ;;  %v1272_v6 = vld [vmem:[%s2121_s0 + $0x20] sm:$0xff]  ;;  %v1279_v7 = vld [vmem:[%s2121_s0 + $0x38] sm:$0xff]  ;;  %v2128_v61 = vmov 6   ;;  %vm951_vm0 = vcmask 31744  }
   0x3   :  { %v1267_v5 = vld [vmem:[%s2121_s0 + $0x28] sm:$0xff]  ;;  %v1284_v8 = vld [vmem:[%s2121_s0 + $0x30] sm:$0xff]  ;;  %v1296_v10 = vld [vmem:[%s2121_s0 + $0x40] sm:$0xff] }
   0x4   :  { %v1291_v9 = vld [vmem:[%s2121_s0 + $0x48] sm:$0xff]  ;;  %v1303_v11 = vld [vmem:[%s2121_s0 + $0x58] sm:$0xff]  ;;  %v1308_v12 = vld [vmem:[%s2121_s0 + $0x50] sm:$0xff] }
   0x5   :  { %2135 = vst [vmem:[#allocation2_spill] sm:$0xff] %v1303_v11  ;;  %v1315_v13 = vld [vmem:[%s2121_s0 + $0x68] sm:$0xff]  ;;  %v1320_v14 = vld [vmem:[%s2121_s0 + $0x60] sm:$0xff]  ;;  %v1327_v15 = vld [vmem:[%s2121_s0 + $0x78] sm:$0xff] }
   0x6   :  { %52 = vperm.xlu1 %1177, %v1255_v3   ;;  %42 = vperm.xlu0 %1176, %v1260_v4   ;;  %2136 = vst [vmem:[#allocation3_spill] sm:$0xff] %v1320_v14  ;;  %v1332_v16 = vld [vmem:[%s2121_s0 + $0x70] sm:$0xff] }
   0xa   :  { %62 = vperm.xlu1 %1177, %v1267_v5   ;;  %57 = vperm.xlu0 %1176, %v1272_v6  }
   0xe   :  { %72 = vperm.xlu1 %1177, %v1279_v7   ;;  %67 = vperm.xlu0 %1176, %v1284_v8  }
  0x12   :  { %82 = vperm.xlu1 %1177, %v1291_v9   ;;  %77 = vperm.xlu0 %1176, %v1296_v10  }
  0x16   :  { %92 = vperm.xlu1 %1177, %v1303_v11   ;;  %87 = vperm.xlu0 %1176, %v1308_v12  }
  0x1a   :  { %102 = vperm.xlu1 %1177, %v1315_v13   ;;  %97 = vperm.xlu0 %1176, %v1320_v14  }
  0x1e   :  { %112 = vperm.xlu1 %1177, %v1327_v15   ;;  %107 = vperm.xlu0 %1176, %v1332_v16  }
  0x22   :  { %1179 = vset.pattern.permute.xlu1 %v1207_v17  ;;  %1178 = vset.pattern.permute.xlu0 %v1207_v17 }
  0x23   :  { %156 = vperm.xlu1 %1179, %v1260_v4   ;;  %152 = vperm.xlu0 %1178, %v1248_v2  }
  0x27   :  { %160 = vperm.xlu1 %1179, %v1243_v1   ;;  %164 = vperm.xlu0 %1178, %v1255_v3  }
  0x2b   :  { %168 = vperm.xlu1 %1179, %v1272_v6   ;;  %172 = vperm.xlu0 %1178, %v1267_v5  }
  0x2f   :  { %176 = vperm.xlu1 %1179, %v1284_v8   ;;  %180 = vperm.xlu0 %1178, %v1279_v7  }
  0x33   :  { %184 = vperm.xlu1 %1179, %v1296_v10   ;;  %188 = vperm.xlu0 %1178, %v1291_v9  }
  0x37   :  { %192 = vperm.xlu1 %1179, %v1308_v12   ;;  %196 = vperm.xlu0 %1178, %v1303_v11  }
  0x3b   :  { %200 = vperm.xlu1 %1179, %v1320_v14   ;;  %204 = vperm.xlu0 %1178, %v1315_v13  }
  0x3f   :  { %208 = vperm.xlu1 %1179, %v1332_v16   ;;  %212 = vperm.xlu0 %1178, %v1327_v15  }
  0x43   :  { %1180 = vset.pattern.permute.xlu1 %v1208_v18  ;;  %1181 = vset.pattern.permute.xlu0 %v1208_v18 }
  0x44   :  { %252 = vperm.xlu1 %1180, %v1248_v2   ;;  %256 = vperm.xlu0 %1181, %v1260_v4  }
  0x48   :  { %260 = vperm.xlu1 %1180, %v1243_v1   ;;  %268 = vperm.xlu0 %1181, %v1272_v6  }
  0x4c   :  { %264 = vperm.xlu1 %1180, %v1255_v3   ;;  %276 = vperm.xlu0 %1181, %v1284_v8  }
  0x50   :  { %272 = vperm.xlu1 %1180, %v1267_v5   ;;  %284 = vperm.xlu0 %1181, %v1296_v10  }
  0x54   :  { %280 = vperm.xlu1 %1180, %v1279_v7   ;;  %292 = vperm.xlu0 %1181, %v1308_v12  }
  0x58   :  { %288 = vperm.xlu1 %1180, %v1291_v9   ;;  %300 = vperm.xlu0 %1181, %v1320_v14  }
  0x5c   :  { %296 = vperm.xlu1 %1180, %v1303_v11   ;;  %308 = vperm.xlu0 %1181, %v1332_v16  }
  0x60   :  { %304 = vperm.xlu1 %1180, %v1315_v13   ;;  %1182 = vset.pattern.permute.xlu0 %v1209_v19 }
  0x61   :  { %352 = vperm.xlu0 %1182, %v1248_v2  }
  0x64   :  { %312 = vperm.xlu1 %1180, %v1327_v15  }
  0x65   :  { %364 = vperm.xlu0 %1182, %v1255_v3  }
  0x68   :  { %1183 = vset.pattern.permute.xlu1 %v1209_v19 }
  0x69   :  { %356 = vperm.xlu1 %1183, %v1260_v4   ;;  %372 = vperm.xlu0 %1182, %v1267_v5  }
  0x6d   :  { %360 = vperm.xlu1 %1183, %v1243_v1   ;;  %380 = vperm.xlu0 %1182, %v1279_v7  }
  0x71   :  { %368 = vperm.xlu1 %1183, %v1272_v6   ;;  %388 = vperm.xlu0 %1182, %v1291_v9  }
  0x75   :  { %376 = vperm.xlu1 %1183, %v1284_v8   ;;  %396 = vperm.xlu0 %1182, %v1303_v11  }
  0x79   :  { %384 = vperm.xlu1 %1183, %v1296_v10   ;;  %404 = vperm.xlu0 %1182, %v1315_v13  }
  0x7d   :  { %392 = vperm.xlu1 %1183, %v1308_v12   ;;  %412 = vperm.xlu0 %1182, %v1327_v15  }
  0x81   :  { %v1382_v20 = vpop.permute.xlu1 %47  ;;  %400 = vperm.xlu1 %1183, %v1320_v14   ;;  %1185 = vset.pattern.permute.xlu0 %v1210_v21  ;;  %v1385_v22 = vpop.permute.xlu0 %37 }
  0x82   :  { %2137 = vst [vmem:[#allocation4_spill] sm:$0xff] %v1382_v20  ;;  %456 = vperm.xlu0 %1185, %v1260_v4  }
  0x85   :  { %v1388_v23 = vpop.permute.xlu1 %52  ;;  %408 = vperm.xlu1 %1183, %v1332_v16   ;;  %v1391_v24 = vpop.permute.xlu0 %42 }
  0x86   :  { %2138 = vst [vmem:[#allocation5_spill] sm:$0xff] %v1391_v24  ;;  %468 = vperm.xlu0 %1185, %v1272_v6  }
  0x89   :  { %v1394_v25 = vpop.permute.xlu1 %62  ;;  %1184 = vset.pattern.permute.xlu1 %v1210_v21  ;;  %v1396_v26 = vpop.permute.xlu0 %57 }
  0x8a   :  { %2139 = vst [vmem:[#allocation6_spill] sm:$0xff] %v1396_v26  ;;  %452 = vperm.xlu1 %1184, %v1248_v2   ;;  %476 = vperm.xlu0 %1185, %v1284_v8   ;;  %v2130_v26 = vmov 7  }
  0x8d   :  { %v1400_v27 = vpop.permute.xlu1 %72  ;;  %v1402_v28 = vpop.permute.xlu0 %67 }
  0x8e   :  { %460 = vperm.xlu1 %1184, %v1243_v1   ;;  %484 = vperm.xlu0 %1185, %v1296_v10  }
  0x91   :  { %v1406_v29 = vpop.permute.xlu1 %82  ;;  %v1408_v30 = vpop.permute.xlu0 %77 }
  0x92   :  { %464 = vperm.xlu1 %1184, %v1255_v3   ;;  %492 = vperm.xlu0 %1185, %v1308_v12  }
  0x95   :  { %v1412_v31 = vpop.permute.xlu1 %92  ;;  %v1414_v32 = vpop.permute.xlu0 %87 }
  0x96   :  { %2140 = vst [vmem:[#allocation7_spill] sm:$0xff] %v1412_v31  ;;  %472 = vperm.xlu1 %1184, %v1267_v5   ;;  %500 = vperm.xlu0 %1185, %v1320_v14  }
  0x99   :  { %v1418_v33 = vpop.permute.xlu1 %102  ;;  %v1420_v34 = vpop.permute.xlu0 %97 }
  0x9a   :  { %2141 = vst [vmem:[#allocation8_spill] sm:$0xff] %v1418_v33  ;;  %480 = vperm.xlu1 %1184, %v1279_v7   ;;  %508 = vperm.xlu0 %1185, %v1332_v16  }
  0x9d   :  { %v1424_v35 = vpop.permute.xlu1 %112  ;;  %v1426_v36 = vpop.permute.xlu0 %107 }
  0x9e   :  { %2142 = vst [vmem:[#allocation9_spill] sm:$0xff] %v1424_v35  ;;  %488 = vperm.xlu1 %1184, %v1291_v9   ;;  %1186 = vset.pattern.permute.xlu0 %v1211_v37 }
  0x9f   :  { %552 = vperm.xlu0 %1186, %v1248_v2  }
  0xa2   :  { %v1430_v38 = vpop.permute.xlu1 %156  ;;  %496 = vperm.xlu1 %1184, %v1303_v11   ;;  %v1433_v39 = vpop.permute.xlu0 %152 }
  0xa3   :  { %2143 = vst [vmem:[#allocation10_spill] sm:$0xff] %v1430_v38  ;;  %564 = vperm.xlu0 %1186, %v1255_v3  }
  0xa6   :  { %v1436_v40 = vpop.permute.xlu1 %160  ;;  %504 = vperm.xlu1 %1184, %v1315_v13   ;;  %v1439_v41 = vpop.permute.xlu0 %164 }
  0xa7   :  { %2144 = vst [vmem:[#allocation11_spill] sm:$0xff] %v1436_v40  ;;  %572 = vperm.xlu0 %1186, %v1267_v5  }
  0xaa   :  { %v1442_v42 = vpop.permute.xlu1 %168  ;;  %512 = vperm.xlu1 %1184, %v1327_v15   ;;  %v1445_v43 = vpop.permute.xlu0 %172 }
  0xab   :  { %2145 = vst [vmem:[#allocation12_spill] sm:$0xff] %v1442_v42  ;;  %580 = vperm.xlu0 %1186, %v1279_v7  }
  0xae   :  { %v1448_v44 = vpop.permute.xlu1 %176  ;;  %1187 = vset.pattern.permute.xlu1 %v1211_v37  ;;  %v1450_v45 = vpop.permute.xlu0 %180 }
  0xaf   :  { %556 = vperm.xlu1 %1187, %v1260_v4   ;;  %588 = vperm.xlu0 %1186, %v1291_v9  }
  0xb2   :  { %v1454_v46 = vpop.permute.xlu1 %184  ;;  %v1456_v47 = vpop.permute.xlu0 %188 }
  0xb3   :  { %560 = vperm.xlu1 %1187, %v1243_v1   ;;  %596 = vperm.xlu0 %1186, %v1303_v11  }
  0xb6   :  { %v1460_v48 = vpop.permute.xlu1 %192  ;;  %v1462_v49 = vpop.permute.xlu0 %196 }
  0xb7   :  { %568 = vperm.xlu1 %1187, %v1272_v6   ;;  %604 = vperm.xlu0 %1186, %v1315_v13  }
  0xba   :  { %v1466_v50 = vpop.permute.xlu1 %200  ;;  %v1468_v51 = vpop.permute.xlu0 %204 }
  0xbb   :  { %2146 = vst [vmem:[#allocation13_spill] sm:$0xff] %v1468_v51  ;;  %576 = vperm.xlu1 %1187, %v1284_v8   ;;  %612 = vperm.xlu0 %1186, %v1327_v15  }
  0xbe   :  { %v1472_v52 = vpop.permute.xlu1 %208  ;;  %v1474_v53 = vpop.permute.xlu0 %212 }
  0xbf   :  { %2147 = vst [vmem:[#allocation14_spill] sm:$0xff] %v1474_v53  ;;  %584 = vperm.xlu1 %1187, %v1296_v10   ;;  %1190 = vset.pattern.permute.xlu0 %v2126_v54 }
  0xc0   :  { %852 = vperm.xlu0 %1190, %v1248_v2  }
  0xc3   :  { %592 = vperm.xlu1 %1187, %v1308_v12   ;;  %v1480_v55 = vpop.permute.xlu1 %252  ;;  %v1482_v56 = vpop.permute.xlu0 %256 }
  0xc4   :  { %2148 = vst [vmem:[#allocation15_spill] sm:$0xff] %v1482_v56  ;;  %860 = vperm.xlu0 %1190, %v1243_v1  }
  0xc7   :  { %600 = vperm.xlu1 %1187, %v1320_v14   ;;  %v1486_v57 = vpop.permute.xlu1 %260  ;;  %v1488_v58 = vpop.permute.xlu0 %268 }
  0xc8   :  { %2149 = vst [vmem:[#allocation16_spill] sm:$0xff] %v1486_v57  ;;  %2150 = vst [vmem:[#allocation17_spill] sm:$0xff] %v1488_v58  ;;  %864 = vperm.xlu0 %1190, %v1255_v3   ;;  %v115_v58 = vlaneseq }
  0xca   :  { %v1530_v20 = vshrl.u32 %v115_v58, 7 }
  0xcb   :  { %608 = vperm.xlu1 %1187, %v1332_v16   ;;  %v1492_v59 = vpop.permute.xlu1 %264  ;;  %v277_v60 = vpop.permute.xlu0 %276 }
  0xcc   :  { %868 = vperm.xlu0 %1190, %v1272_v6   ;;  %v117_v38 = vsub.s32 0, %v1530_v20  ;;  %v217_v24 = vsub.s32 1, %v1530_v20  ;;  %v317_v58 = vsub.s32 2, %v1530_v20  ;;  %v417_v33 = vsub.s32 3, %v1530_v20 }
  0xcf   :  { %1188 = vset.pattern.permute.xlu1 %v2128_v61  ;;  %v1496_v62 = vpop.permute.xlu1 %272  ;;  %v285_v63 = vpop.permute.xlu0 %284 }
  0xd0   :  { %652 = vperm.xlu1 %1188, %v1248_v2   ;;  %872 = vperm.xlu0 %1190, %v1267_v5  }
  0xd3   :  { %v1500_v0 = vpop.permute.xlu1 %280  ;;  %v1502_v17 = vpop.permute.xlu0 %292 }
  0xd4   :  { %660 = vperm.xlu1 %1188, %v1243_v1   ;;  %876 = vperm.xlu0 %1190, %v1284_v8  }
  0xd7   :  { %v1506_v18 = vpop.permute.xlu1 %288  ;;  %v1508_v19 = vpop.permute.xlu0 %300 }
  0xd8   :  { %664 = vperm.xlu1 %1188, %v1255_v3   ;;  %880 = vperm.xlu0 %1190, %v1279_v7  }
  0xdb   :  { %v1512_v21 = vpop.permute.xlu1 %296  ;;  %v1514_v37 = vpop.permute.xlu0 %308 }
  0xdc   :  { %2151 = vst [vmem:[#allocation18_spill] sm:$0xff] %v1512_v21  ;;  %672 = vperm.xlu1 %1188, %v1267_v5   ;;  %884 = vperm.xlu0 %1190, %v1296_v10  }
  0xdf   :  { %v1518_v54 = vpop.permute.xlu1 %304 }
  0xe0   :  { %2152 = vst [vmem:[#allocation19_spill] sm:$0xff] %v1518_v54  ;;  %680 = vperm.xlu1 %1188, %v1279_v7   ;;  %888 = vperm.xlu0 %1190, %v1291_v9   ;;  %v1522_v61 = vpop.permute.xlu0 %352 }
  0xe3   :  { %v1524_v42 = vpop.permute.xlu1 %312 }
  0xe4   :  { %2153 = vst [vmem:[#allocation20_spill] sm:$0xff] %v1524_v42  ;;  %688 = vperm.xlu1 %1188, %v1291_v9   ;;  %1193 = vset.pattern.permute.xlu0 %v2130_v26  ;;  %v1528_v57 = vpop.permute.xlu0 %364  ;;  %v1544_v26 = vld [vmem:[%s2122_s1] sm:$0xff] }
  0xe5   :  { %752 = vperm.xlu0 %1193, %v1248_v2   ;;  %v2155_v2 = vmov 7   ;;  %v1553_v35 = vrot.slane %v1544_v26, %v117_v38  ;;  %v1556_v53 = vrot.slane %v1544_v26, %v217_v24  ;;  %v1581_v21 = vrot.slane %v1544_v26, %v417_v33 }
  0xe7   :  { %v225_v54 = vmul.f32 %v1556_v53, %v1448_v44 }
  0xe8   :  { %696 = vperm.xlu1 %1188, %v1303_v11   ;;  %v1534_v40 = vpop.permute.xlu1 %356  ;;  %v1536_v56 = vpop.permute.xlu0 %372 }
  0xe9   :  { %2154 = vst [vmem:[#allocation21_spill] sm:$0xff] %v1534_v40  ;;  %796 = vperm.xlu0 %1193, %v1303_v11   ;;  %v125_v11 = vmul.f32 %v1553_v35, %v1402_v28  ;;  %v127_v28 = vmul.f32 %v1553_v35, %v1408_v30  ;;  %v229_v30 = vmul.f32 %v1556_v53, %v1460_v48 }
  0xeb   :  { %v241_v44 = vadd.f32 %v225_v54, %v125_v11 }
  0xec   :  { %1189 = vset.pattern.permute.xlu1 %v2155_v2  ;;  %v1548_v42 = vpop.permute.xlu1 %360  ;;  %v1550_v40 = vpop.permute.xlu0 %380 }
  0xed   :  { %2156 = vst [vmem:[#allocation22_spill] sm:$0xff] %v1548_v42  ;;  %756 = vperm.xlu1 %1189, %v1260_v4   ;;  %800 = vperm.xlu0 %1193, %v1320_v14   ;;  %v1565_v42 = vrot.slane %v1544_v26, %v317_v58  ;;  %v2159_v14 = vmov 6   ;;  %v227_v58 = vmul.f32 %v1556_v53, %v1454_v46 }
  0xef   :  { %v325_v24 = vmul.f32 %v1565_v42, %v277_v60  ;;  %v243_v11 = vadd.f32 %v227_v58, %v127_v28 }
  0xf0   :  { %v1568_v38 = vpop.permute.xlu1 %368  ;;  %v1570_v51 = vpop.permute.xlu0 %388 }
  0xf1   :  { %2157 = vst [vmem:[#allocation23_spill] sm:$0xff] %v1568_v38  ;;  %2158 = vst [vmem:[#allocation24_spill] sm:$0xff] %v1570_v51  ;;  %760 = vperm.xlu1 %1189, %v1243_v1   ;;  %1197 = vset.pattern.permute.xlu0 %v2159_v14  ;;  %v341_v60 = vadd.f32 %v325_v24, %v241_v44  ;;  %v327_v1 = vmul.f32 %v1565_v42, %v285_v63  ;;  %v2160_v51 = vmov 8  }
  0xf2   :  { %656 = vperm.xlu0 %1197, %v1260_v4   ;;  %v129_v24 = vmul.f32 %v1553_v35, %v1414_v32  ;;  %v131_v32 = vmul.f32 %v1553_v35, %v1420_v34  ;;  %v133_v34 = vmul.f32 %v1553_v35, %v1426_v36  ;;  %v319_v36 = vmul.f32 %v1565_v42, %v1480_v55 }
  0xf3   :  { %v343_v63 = vadd.f32 %v327_v1, %v243_v11 }
  0xf4   :  { %v377_v38 = vpop.permute.xlu1 %376  ;;  %v1583_v31 = vpop.permute.xlu0 %396 }
  0xf5   :  { %v425_v14 = vmul.f32 %v1581_v21, %v377_v38  ;;  %1191 = vset.pattern.permute.xlu1 %v2160_v51  ;;  %v329_v38 = vmul.f32 %v1565_v42, %v1502_v17 }
  0xf6   :  { %856 = vperm.xlu1 %1191, %v1260_v4   ;;  %668 = vperm.xlu0 %1197, %v1272_v6   ;;  %v245_v4 = vadd.f32 %v229_v30, %v129_v24 }
  0xf7   :  { %v441_v33 = vadd.f32 %v425_v14, %v341_v60  ;;  %v231_v14 = vmul.f32 %v1556_v53, %v1466_v50  ;;  %v331_v60 = vmul.f32 %v1565_v42, %v1508_v19  ;;  %v233_v50 = vmul.f32 %v1556_v53, %v1472_v52 }
  0xf8   :  { %v385_v46 = vpop.permute.xlu1 %384  ;;  %v1592_v54 = vpop.permute.xlu0 %404  ;;  %v345_v17 = vadd.f32 %v329_v38, %v245_v4  ;;  %v333_v19 = vmul.f32 %v1565_v42, %v1514_v37  ;;  %v119_v38 = vmul.f32 %v1553_v35, %v1385_v22  ;;  %v219_v52 = vmul.f32 %v1556_v53, %v1433_v39 }
  0xf9   :  { %v427_v44 = vmul.f32 %v1581_v21, %v385_v46  ;;  %v247_v11 = vadd.f32 %v231_v14, %v131_v32  ;;  %v517_v37 = vsub.s32 4, %v1530_v20  ;;  %v419_v39 = vmul.f32 %v1581_v21, %v1522_v61 }
  0xfa   :  { %1192 = vset.pattern.permute.xlu1 %v2155_v2  ;;  %676 = vperm.xlu0 %1197, %v1284_v8   ;;  %v235_v32 = vadd.f32 %v219_v52, %v119_v38 }
  0xfb   :  { %v443_v48 = vadd.f32 %v427_v44, %v343_v63  ;;  %764 = vperm.xlu1 %1192, %v1255_v3   ;;  %v347_v46 = vadd.f32 %v331_v60, %v247_v11  ;;  %v1645_v55 = vrot.slane %v1544_v26, %v517_v37  ;;  %v222_v11 = vmul.f32 %v1556_v53, %v1439_v41 }
  0xfc   :  { %v393_v28 = vpop.permute.xlu1 %392  ;;  %v1604_v58 = vpop.permute.xlu0 %412  ;;  %v224_v41 = vmul.f32 %v1556_v53, %v1445_v43  ;;  %v324_v43 = vmul.f32 %v1565_v42, %v1496_v62 }
  0xfd   :  { %v429_v1 = vmul.f32 %v1581_v21, %v393_v28 }
  0xfe   :  { %684 = vperm.xlu0 %1197, %v1296_v10  }
  0xff   :  { %v1614_v30 = vadd.f32 %v429_v1, %v345_v17  ;;  %768 = vperm.xlu1 %1192, %v1272_v6   ;;  %v249_v6 = vadd.f32 %v233_v50, %v133_v34  ;;  %v322_v34 = vmul.f32 %v1565_v42, %v1492_v59 }
 0x100   :  { %v401_v3 = vpop.permute.xlu1 %400 }
 0x101   :  { %v431_v24 = vmul.f32 %v1581_v21, %v401_v3  ;;  %v1622_v63 = vpop.permute.xlu0 %456  ;;  %v349_v14 = vadd.f32 %v333_v19, %v249_v6 }
 0x102   :  { %692 = vperm.xlu0 %1197, %v1308_v12  }
 0x103   :  { %v1629_v44 = vadd.f32 %v431_v24, %v347_v46  ;;  %772 = vperm.xlu1 %1192, %v1267_v5   ;;  %v335_v5 = vadd.f32 %v319_v36, %v235_v32  ;;  %v126_v32 = vmul.f32 %v1553_v35, %v1400_v27 }
 0x104   :  { %v409_v4 = vpop.permute.xlu1 %408 }
 0x105   :  { %v433_v28 = vmul.f32 %v1581_v21, %v409_v4  ;;  %v1636_v22 = vpop.permute.xlu0 %468  ;;  %v435_v50 = vadd.f32 %v419_v39, %v335_v5  ;;  %v228_v5 = vmul.f32 %v1556_v53, %v1456_v47  ;;  %v328_v47 = vmul.f32 %v1565_v42, %v1506_v18  ;;  %v2162_v18 = vld [vmem:[#allocation7_spill] sm:$0xff] }
 0x106   :  { %708 = vperm.xlu0 %1197, %v1332_v16  }
 0x107   :  { %v1641_v17 = vadd.f32 %v433_v28, %v349_v14  ;;  %776 = vperm.xlu1 %1192, %v1284_v8   ;;  %v122_v8 = vmul.f32 %v1553_v35, %v1388_v23  ;;  %v124_v23 = vmul.f32 %v1553_v35, %v1394_v25  ;;  %v424_v25 = vmul.f32 %v1581_v21, %v1536_v56 }
 0x109   :  { %v453_v60 = vpop.permute.xlu1 %452  ;;  %v477_v1 = vpop.permute.xlu0 %476  ;;  %v238_v52 = vadd.f32 %v222_v11, %v122_v8  ;;  %v240_v36 = vadd.f32 %v224_v41, %v124_v23 }
 0x10a   :  { %v519_v3 = vmul.f32 %v1645_v55, %v453_v60  ;;  %v525_v61 = vmul.f32 %v1645_v55, %v477_v1  ;;  %712 = vperm.xlu0 %1197, %v1327_v15  }
 0x10b   :  { %780 = vperm.xlu1 %1192, %v1279_v7   ;;  %v422_v7 = vmul.f32 %v1581_v21, %v1528_v57  ;;  %v338_v59 = vadd.f32 %v322_v34, %v238_v52  ;;  %v226_v57 = vmul.f32 %v1556_v53, %v1450_v45  ;;  %v340_v62 = vadd.f32 %v324_v43, %v240_v36  ;;  %v2161_v52 = vld [vmem:[#allocation24_spill] sm:$0xff] }
 0x10c   :  { %v1657_v46 = vadd.f32 %v519_v3, %v435_v50  ;;  %v1659_v19 = vadd.f32 %v525_v61, %v441_v33  ;;  %v326_v45 = vmul.f32 %v1565_v42, %v1500_v0  ;;  %v128_v0 = vmul.f32 %v1553_v35, %v1406_v29 }
 0x10d   :  { %v1663_v24 = vpop.permute.xlu1 %460  ;;  %v485_v38 = vpop.permute.xlu0 %484  ;;  %v438_v14 = vadd.f32 %v422_v7, %v338_v59  ;;  %v242_v56 = vadd.f32 %v226_v57, %v126_v32  ;;  %v440_v11 = vadd.f32 %v424_v25, %v340_v62  ;;  %v230_v34 = vmul.f32 %v1556_v53, %v1462_v49  ;;  %v2164_v49 = vld [vmem:[#allocation18_spill] sm:$0xff]  ;;  %v2166_v25 = vld [vmem:[#allocation13_spill] sm:$0xff] }
 0x10e   :  { %v527_v6 = vmul.f32 %v1645_v55, %v485_v38  ;;  %1202 = vset.pattern.permute.xlu0 %v2160_v51  ;;  %v428_v7 = vmul.f32 %v1581_v21, %v2161_v52  ;;  %v130_v59 = vmul.f32 %v1553_v35, %v2162_v18  ;;  %v2163_v43 = vmov 6   ;;  %v2170_v52 = vld [vmem:[#allocation9_spill] sm:$0xff] }
 0x10f   :  { %784 = vperm.xlu1 %1192, %v1296_v10   ;;  %904 = vperm.xlu0 %1202, %v1315_v13   ;;  %v342_v3 = vadd.f32 %v326_v45, %v242_v56  ;;  %v330_v57 = vmul.f32 %v1565_v42, %v2164_v49  ;;  %v430_v45 = vmul.f32 %v1581_v21, %v1583_v31  ;;  %v2172_v18 = vld [vmem:[#allocation5_spill] sm:$0xff] }
 0x110   :  { %v1675_v33 = vadd.f32 %v527_v6, %v443_v48  ;;  %v246_v32 = vadd.f32 %v230_v34, %v130_v59  ;;  %v432_v34 = vmul.f32 %v1581_v21, %v1592_v54  ;;  %v120_v59 = vmul.f32 %v1553_v35, %v2172_v18 }
 0x111   :  { %v465_v37 = vpop.permute.xlu1 %464  ;;  %v493_v4 = vpop.permute.xlu0 %492 }
 0x112   :  { %v522_v10 = vmul.f32 %v1645_v55, %v465_v37  ;;  %v529_v28 = vmul.f32 %v1645_v55, %v493_v4 }
 0x113   :  { %788 = vperm.xlu1 %1192, %v1291_v9   ;;  %912 = vperm.xlu0 %1202, %v1327_v15   ;;  %v426_v9 = vmul.f32 %v1581_v21, %v1550_v40  ;;  %v244_v40 = vadd.f32 %v228_v5, %v128_v0 }
 0x114   :  { %v538_v48 = vadd.f32 %v522_v10, %v438_v14  ;;  %v1690_v39 = vadd.f32 %v529_v28, %v1614_v30  ;;  %v617_v30 = vsub.s32 5, %v1530_v20  ;;  %v2165_v14 = vld [vmem:[#allocation3_spill] sm:$0xff]  ;;  %v232_v10 = vmul.f32 %v1556_v53, %v2166_v25 }
 0x115   :  { %v473_v60 = vpop.permute.xlu1 %472  ;;  %v501_v1 = vpop.permute.xlu0 %500  ;;  %v442_v29 = vadd.f32 %v426_v9, %v342_v3  ;;  %v344_v36 = vadd.f32 %v328_v47, %v244_v40  ;;  %v2168_v9 = vld [vmem:[#allocation19_spill] sm:$0xff]  ;;  %v2169_v3 = vld [vmem:[#allocation14_spill] sm:$0xff] }
 0x116   :  { %v524_v27 = vmul.f32 %v1645_v55, %v473_v60  ;;  %v531_v50 = vmul.f32 %v1645_v55, %v501_v1  ;;  %v2167_v60 = vld [vmem:[#allocation8_spill] sm:$0xff]  ;;  %v234_v47 = vmul.f32 %v1556_v53, %v2169_v3 }
 0x117   :  { %792 = vperm.xlu1 %1192, %v1308_v12   ;;  %v444_v62 = vadd.f32 %v428_v7, %v344_v36  ;;  %v132_v1 = vmul.f32 %v1553_v35, %v2167_v60  ;;  %v134_v7 = vmul.f32 %v1553_v35, %v2170_v52  ;;  %v2173_v36 = vld [vmem:[#allocation10_spill] sm:$0xff]  ;;  %v2178_v3 = vld [vmem:[#allocation16_spill] sm:$0xff] }
 0x118   :  { %v1704_v61 = vadd.f32 %v524_v27, %v440_v11  ;;  %v1707_v8 = vadd.f32 %v531_v50, %v1629_v44  ;;  %v1719_v44 = vrot.slane %v1544_v26, %v617_v30  ;;  %v346_v11 = vadd.f32 %v330_v57, %v246_v32  ;;  %v2179_v52 = vld [vmem:[#allocation2_spill] sm:$0xff] }
 0x119   :  { %v481_v41 = vpop.permute.xlu1 %480  ;;  %v509_v38 = vpop.permute.xlu0 %508  ;;  %v332_v27 = vmul.f32 %v1565_v42, %v2168_v9  ;;  %v248_v0 = vadd.f32 %v232_v10, %v132_v1  ;;  %v220_v54 = vmul.f32 %v1556_v53, %v2173_v36  ;;  %v250_v25 = vadd.f32 %v234_v47, %v134_v7  ;;  %v2180_v7 = vld [vmem:[#allocation6_spill] sm:$0xff] }
 0x11a   :  { %v526_v6 = vmul.f32 %v1645_v55, %v481_v41  ;;  %v533_v23 = vmul.f32 %v1645_v55, %v509_v38  ;;  %v446_v40 = vadd.f32 %v430_v45, %v346_v11  ;;  %v2174_v45 = vld [vmem:[#allocation15_spill] sm:$0xff]  ;;  %v2176_v11 = vld [vmem:[#allocation21_spill] sm:$0xff]  ;;  %v321_v47 = vmul.f32 %v1565_v42, %v2178_v3 }
 0x11b   :  { %1194 = vset.pattern.permute.xlu1 %v2163_v43  ;;  %v420_v9 = vmul.f32 %v1581_v21, %v2176_v11 }
 0x11c   :  { %v1723_v37 = vadd.f32 %v526_v6, %v442_v29  ;;  %v1726_v4 = vadd.f32 %v533_v23, %v1641_v17  ;;  %700 = vperm.xlu1 %1194, %v2165_v14   ;;  %v2171_v6 = vld [vmem:[#allocation20_spill] sm:$0xff] }
 0x11d   :  { %v489_v28 = vpop.permute.xlu1 %488 }
 0x11e   :  { %v528_v56 = vmul.f32 %v1645_v55, %v489_v28  ;;  %v553_v5 = vpop.permute.xlu0 %552  ;;  %v434_v28 = vmul.f32 %v1581_v21, %v1604_v58 }
 0x11f   :  { %v619_v17 = vmul.f32 %v1719_v44, %v553_v5 }
 0x120   :  { %v1739_v50 = vadd.f32 %v528_v56, %v444_v62  ;;  %1195 = vset.pattern.permute.xlu1 %v2160_v51  ;;  %v320_v56 = vmul.f32 %v1565_v42, %v2174_v45 }
 0x121   :  { %v1743_v30 = vadd.f32 %v619_v17, %v1657_v46  ;;  %892 = vperm.xlu1 %1195, %v1308_v12   ;;  %v497_v31 = vpop.permute.xlu1 %496  ;;  %v348_v46 = vadd.f32 %v332_v27, %v248_v0  ;;  %v334_v12 = vmul.f32 %v1565_v42, %v2171_v6  ;;  %v236_v17 = vadd.f32 %v220_v54, %v120_v59  ;;  %v2177_v0 = vld [vmem:[#allocation4_spill] sm:$0xff]  ;;  %v2182_v54 = vld [vmem:[#allocation22_spill] sm:$0xff] }
 0x122   :  { %v530_v41 = vmul.f32 %v1645_v55, %v497_v31  ;;  %v565_v38 = vpop.permute.xlu0 %564  ;;  %v121_v31 = vmul.f32 %v1553_v35, %v2177_v0 }
 0x123   :  { %v622_v29 = vmul.f32 %v1719_v44, %v565_v38  ;;  %v448_v10 = vadd.f32 %v432_v34, %v348_v46  ;;  %v336_v38 = vadd.f32 %v320_v56, %v236_v17  ;;  %v123_v46 = vmul.f32 %v1553_v35, %v2180_v7 }
 0x124   :  { %v1756_v23 = vadd.f32 %v530_v41, %v446_v40  ;;  %v521_v35 = vmul.f32 %v1645_v55, %v1663_v24 }
 0x125   :  { %v1762_v49 = vadd.f32 %v622_v29, %v538_v48  ;;  %1196 = vset.pattern.permute.xlu1 %v2163_v43  ;;  %v505_v57 = vpop.permute.xlu1 %504  ;;  %v2175_v48 = vld [vmem:[#allocation11_spill] sm:$0xff]  ;;  %v350_v43 = vadd.f32 %v334_v12, %v250_v25  ;;  %v520_v29 = vmul.f32 %v1645_v55, %v1622_v63  ;;  %v2181_v12 = vld [vmem:[#allocation12_spill] sm:$0xff]  ;;  %v436_v36 = vadd.f32 %v420_v9, %v336_v38 }
 0x126   :  { %v532_v32 = vmul.f32 %v1645_v55, %v505_v57  ;;  %704 = vperm.xlu1 %1196, %v1315_v13   ;;  %v573_v62 = vpop.permute.xlu0 %572  ;;  %v221_v60 = vmul.f32 %v1556_v53, %v2175_v48  ;;  %v223_v18 = vmul.f32 %v1556_v53, %v2181_v12  ;;  %v421_v57 = vmul.f32 %v1581_v21, %v2182_v54  ;;  %v2184_v48 = vld [vmem:[#allocation23_spill] sm:$0xff] }
 0x127   :  { %v624_v5 = vmul.f32 %v1719_v44, %v573_v62  ;;  %v450_v40 = vadd.f32 %v434_v28, %v350_v43  ;;  %v536_v45 = vadd.f32 %v520_v29, %v436_v36  ;;  %v523_v9 = vmul.f32 %v1645_v55, %v1636_v22 }
 0x128   :  { %v548_v1 = vadd.f32 %v532_v32, %v448_v10  ;;  %v237_v6 = vadd.f32 %v221_v60, %v121_v31  ;;  %v2183_v10 = vld [vmem:[#allocation17_spill] sm:$0xff]  ;;  %v423_v60 = vmul.f32 %v1581_v21, %v2184_v48  ;;  %v717_v54 = vsub.s32 6, %v1530_v20 }
 0x129   :  { %v1777_v58 = vadd.f32 %v624_v5, %v1704_v61  ;;  %v513_v27 = vpop.permute.xlu1 %512  ;;  %v323_v28 = vmul.f32 %v1565_v42, %v2183_v10  ;;  %v239_v5 = vadd.f32 %v223_v18, %v123_v46 }
 0x12a   :  { %v534_v34 = vmul.f32 %v1645_v55, %v513_v27  ;;  %1198 = vset.pattern.permute.xlu1 %v2160_v51  ;;  %v581_v41 = vpop.permute.xlu0 %580  ;;  %v337_v63 = vadd.f32 %v321_v47, %v237_v6 }
 0x12b   :  { %v626_v61 = vmul.f32 %v1719_v44, %v581_v41  ;;  %896 = vperm.xlu1 %1198, %v2179_v52   ;;  %v339_v17 = vadd.f32 %v323_v28, %v239_v5 }
 0x12c   :  { %v550_v59 = vadd.f32 %v534_v34, %v450_v40 }
 0x12d   :  { %v1796_v25 = vadd.f32 %v626_v61, %v1723_v37  ;;  %v437_v37 = vadd.f32 %v421_v57, %v337_v63  ;;  %v439_v31 = vadd.f32 %v423_v60, %v339_v17 }
 0x12e   :  { %v557_v32 = vpop.permute.xlu1 %556  ;;  %v589_v62 = vpop.permute.xlu0 %588 }
 0x12f   :  { %v620_v53 = vmul.f32 %v1719_v44, %v557_v32  ;;  %v628_v56 = vmul.f32 %v1719_v44, %v589_v62  ;;  %1199 = vset.pattern.permute.xlu1 %v2155_v2  ;;  %v537_v27 = vadd.f32 %v521_v35, %v437_v37  ;;  %v539_v40 = vadd.f32 %v523_v9, %v439_v31 }
 0x130   :  { %804 = vperm.xlu1 %1199, %v1315_v13  }
 0x131   :  { %v1808_v42 = vadd.f32 %v620_v53, %v536_v45  ;;  %v1811_v43 = vadd.f32 %v628_v56, %v1739_v50 }
 0x132   :  { %v561_v24 = vpop.permute.xlu1 %560  ;;  %v597_v11 = vpop.permute.xlu0 %596 }
 0x133   :  { %v621_v0 = vmul.f32 %v1719_v44, %v561_v24  ;;  %v630_v13 = vmul.f32 %v1719_v44, %v597_v11 }
 0x134   :  { %1200 = vset.pattern.permute.xlu1 %v2160_v51 }
 0x135   :  { %v637_v21 = vadd.f32 %v621_v0, %v537_v27  ;;  %v1819_v3 = vadd.f32 %v630_v13, %v1756_v23  ;;  %900 = vperm.xlu1 %1200, %v2165_v14  }
 0x136   :  { %v569_v50 = vpop.permute.xlu1 %568  ;;  %v605_v47 = vpop.permute.xlu0 %604 }
 0x137   :  { %v623_v34 = vmul.f32 %v1719_v44, %v569_v50  ;;  %v632_v22 = vmul.f32 %v1719_v44, %v605_v47 }
 0x139   :  { %v1824_v55 = vadd.f32 %v623_v34, %v539_v40  ;;  %v1826_v41 = vadd.f32 %v632_v22, %v548_v1  ;;  %1201 = vset.pattern.permute.xlu1 %v2155_v2 }
 0x13a   :  { %808 = vperm.xlu1 %1201, %v1332_v16   ;;  %v577_v38 = vpop.permute.xlu1 %576  ;;  %v613_v23 = vpop.permute.xlu0 %612 }
 0x13b   :  { %v625_v29 = vmul.f32 %v1719_v44, %v577_v38  ;;  %v634_v14 = vmul.f32 %v1719_v44, %v613_v23 }
 0x13d   :  { %v1833_v61 = vadd.f32 %v625_v29, %v1659_v19  ;;  %v1835_v52 = vadd.f32 %v634_v14, %v550_v59 }
 0x13e   :  { %812 = vperm.xlu1 %1201, %v1327_v15   ;;  %v585_v7 = vpop.permute.xlu1 %584 }
 0x13f   :  { %v627_v1 = vmul.f32 %v1719_v44, %v585_v7  ;;  %v853_v46 = vpop.permute.xlu0 %852 }
 0x141   :  { %v1840_v2 = vadd.f32 %v627_v1, %v1675_v33 }
 0x142   :  { %1203 = vset.pattern.permute.xlu1 %v2160_v51  ;;  %v593_v6 = vpop.permute.xlu1 %592 }
 0x143   :  { %v629_v12 = vmul.f32 %v1719_v44, %v593_v6  ;;  %908 = vperm.xlu1 %1203, %v1332_v16   ;;  %v861_v19 = vpop.permute.xlu0 %860  ;;  %v1859_v16 = vrot.slane %v1544_v26, %v717_v54 }
 0x145   :  { %v1846_v18 = vadd.f32 %v629_v12, %v1690_v39 }
 0x146   :  { %v601_v59 = vpop.permute.xlu1 %600 }
 0x147   :  { %v631_v15 = vmul.f32 %v1719_v44, %v601_v59  ;;  %v1849_v36 = vpop.permute.xlu0 %864 }
 0x149   :  { %v1853_v33 = vadd.f32 %v631_v15, %v1707_v8 }
 0x14a   :  { %v609_v51 = vpop.permute.xlu1 %608 }
 0x14b   :  { %v633_v57 = vmul.f32 %v1719_v44, %v609_v51  ;;  %v1856_v63 = vpop.permute.xlu0 %868 }
 0x14d   :  { %v1862_v39 = vadd.f32 %v633_v57, %v1726_v4 }
 0x14f   :  { %v653_v10 = vpop.permute.xlu1 %652  ;;  %v1864_v28 = vpop.permute.xlu0 %872 }
 0x150   :  { %v719_v32 = vmul.f32 %v1859_v16, %v653_v10 }
 0x152   :  { %v735_v62 = vadd.f32 %v719_v32, %v1743_v30 }
 0x153   :  { %v661_v8 = vpop.permute.xlu1 %660  ;;  %v1868_v45 = vpop.permute.xlu0 %876 }
 0x154   :  { %v721_v44 = vmul.f32 %v1859_v16, %v661_v8 }
 0x156   :  { %v737_v35 = vadd.f32 %v721_v44, %v637_v21 }
 0x157   :  { %v665_v53 = vpop.permute.xlu1 %664  ;;  %v1871_v56 = vpop.permute.xlu0 %880 }
 0x158   :  { %v722_v5 = vmul.f32 %v1859_v16, %v665_v53 }
 0x15a   :  { %v738_v4 = vadd.f32 %v722_v5, %v1762_v49  ;;  %v817_v49 = vsub.s32 7, %v1530_v20  ;;  %v1907_v20 = vld [vmem:[%s2122_s1 + $0x8] ss:$0 sm:$0xff] }
 0x15b   :  { %v673_v37 = vpop.permute.xlu1 %672  ;;  %v1875_v48 = vpop.permute.xlu0 %884 }
 0x15c   :  { %v724_v60 = vmul.f32 %v1859_v16, %v673_v37 }
 0x15e   :  { %v1879_v30 = vadd.f32 %v724_v60, %v1777_v58  ;;  %v1893_v58 = vrot.slane %v1544_v26, %v817_v49  ;;  %v919_v26 = vmul.f32 %v1907_v20, %v853_v46 }
 0x15f   :  { %v681_v17 = vpop.permute.xlu1 %680  ;;  %v1881_v24 = vpop.permute.xlu0 %888 }
 0x160   :  { %v726_v11 = vmul.f32 %v1859_v16, %v681_v17  ;;  %v922_v17 = vmul.f32 %v1907_v20, %v1849_v36 }
 0x162   :  { %v1885_v9 = vadd.f32 %v726_v11, %v1796_v25 }
 0x163   :  { %v689_v27 = vpop.permute.xlu1 %688 }
 0x164   :  { %v728_v0 = vmul.f32 %v1859_v16, %v689_v27  ;;  %v753_v13 = vpop.permute.xlu0 %752 }
 0x165   :  { %v819_v40 = vmul.f32 %v1893_v58, %v753_v13 }
 0x166   :  { %v1890_v31 = vadd.f32 %v728_v0, %v1811_v43 }
 0x167   :  { %v697_v21 = vpop.permute.xlu1 %696  ;;  %v835_v43 = vadd.f32 %v819_v40, %v735_v62 }
 0x168   :  { %v730_v50 = vmul.f32 %v1859_v16, %v697_v21  ;;  %v1896_v47 = vpop.permute.xlu0 %796 }
 0x169   :  { %v1913_v1 = vadd.f32 %v919_v26, %v835_v43  ;;  %v923_v43 = vmul.f32 %v1907_v20, %v1856_v63  ;;  %v924_v63 = vmul.f32 %v1907_v20, %v1864_v28 }
 0x16a   :  { %v1899_v25 = vadd.f32 %v730_v50, %v1819_v3  ;;  %v921_v3 = vmul.f32 %v1907_v20, %v861_v19 }
 0x16b   :  { %v991_v51 = vmul.f32 %v1913_v1, %v1913_v1  ;;  %v952_v32 = vsel %vm951_vm0, %v1913_v1, 0.0 }
 0x16c   :  { %v757_v34 = vpop.permute.xlu1 %756  ;;  %v1902_v22 = vpop.permute.xlu0 %800 }
 0x16d   :  { %v820_v6 = vmul.f32 %v1893_v58, %v757_v34  ;;  %v1007_v37 = vsel %vm951_vm0, %v991_v51, 0.0 }
 0x170   :  { %v761_v38 = vpop.permute.xlu1 %760 }
 0x171   :  { %v821_v23 = vmul.f32 %v1893_v58, %v761_v38  ;;  %v657_v29 = vpop.permute.xlu0 %656 }
 0x172   :  { %v720_v14 = vmul.f32 %v1859_v16, %v657_v29 }
 0x173   :  { %v837_v7 = vadd.f32 %v821_v23, %v737_v35 }
 0x174   :  { %v736_v12 = vadd.f32 %v720_v14, %v1808_v42 }
 0x175   :  { %v857_v59 = vpop.permute.xlu1 %856  ;;  %v1917_v15 = vadd.f32 %v921_v3, %v837_v7  ;;  %v669_v57 = vpop.permute.xlu0 %668 }
 0x176   :  { %v836_v46 = vadd.f32 %v820_v6, %v736_v12  ;;  %v920_v54 = vmul.f32 %v1907_v20, %v857_v59  ;;  %v723_v35 = vmul.f32 %v1859_v16, %v669_v57 }
 0x177   :  { %v993_v10 = vmul.f32 %v1917_v15, %v1917_v15  ;;  %v955_v5 = vsel %vm951_vm0, %v1917_v15, 0.0 }
 0x178   :  { %v1922_v19 = vadd.f32 %v920_v54, %v836_v46  ;;  %v739_v50 = vadd.f32 %v723_v35, %v1824_v55 }
 0x179   :  { %v1010_v49 = vsel %vm951_vm0, %v993_v10, 0.0  ;;  %v677_v26 = vpop.permute.xlu0 %676 }
 0x17a   :  { %v953_v42 = vsel %vm951_vm0, %v1922_v19, 0.0  ;;  %v992_v62 = vmul.f32 %v1922_v19, %v1922_v19  ;;  %v765_v8 = vpop.permute.xlu1 %764  ;;  %v725_v3 = vmul.f32 %v1859_v16, %v677_v26 }
 0x17b   :  { %v954_v44 = vadd.f32 %v953_v42, %v952_v32  ;;  %v822_v53 = vmul.f32 %v1893_v58, %v765_v8  ;;  %v925_v8 = vmul.f32 %v1907_v20, %v1868_v45  ;;  %v926_v45 = vmul.f32 %v1907_v20, %v1871_v56 }
 0x17c   :  { %v1008_v60 = vsel %vm951_vm0, %v992_v62, 0.0  ;;  %v741_v57 = vadd.f32 %v725_v3, %v1833_v61  ;;  %v927_v56 = vmul.f32 %v1907_v20, %v1875_v48 }
 0x17d   :  { %v956_v11 = vadd.f32 %v955_v5, %v954_v44  ;;  %v1009_v27 = vadd.f32 %v1008_v60, %v1007_v37  ;;  %v838_v0 = vadd.f32 %v822_v53, %v738_v4  ;;  %v685_v62 = vpop.permute.xlu0 %684 }
 0x17e   :  { %v769_v13 = vpop.permute.xlu1 %768  ;;  %v727_v5 = vmul.f32 %v1859_v16, %v685_v62 }
 0x17f   :  { %v1011_v21 = vadd.f32 %v1010_v49, %v1009_v27  ;;  %v1942_v40 = vadd.f32 %v922_v17, %v838_v0  ;;  %v823_v34 = vmul.f32 %v1893_v58, %v769_v13 }
 0x181   :  { %v957_v36 = vsel %vm951_vm0, %v1942_v40, 0.0  ;;  %v994_v4 = vmul.f32 %v1942_v40, %v1942_v40  ;;  %v839_v38 = vadd.f32 %v823_v34, %v739_v50  ;;  %v743_v50 = vadd.f32 %v727_v5, %v1840_v2 }
 0x182   :  { %v958_v23 = vadd.f32 %v957_v36, %v956_v11  ;;  %v773_v29 = vpop.permute.xlu1 %772 }
 0x183   :  { %v1012_v55 = vsel %vm951_vm0, %v994_v4, 0.0  ;;  %v1953_v14 = vadd.f32 %v923_v43, %v839_v38  ;;  %v824_v7 = vmul.f32 %v1893_v58, %v773_v29 }
 0x184   :  { %v1013_v6 = vadd.f32 %v1012_v55, %v1011_v21 }
 0x185   :  { %v959_v12 = vsel %vm951_vm0, %v1953_v14, 0.0  ;;  %v995_v59 = vmul.f32 %v1953_v14, %v1953_v14  ;;  %v840_v46 = vadd.f32 %v824_v7, %v1879_v30 }
 0x186   :  { %v960_v54 = vadd.f32 %v959_v12, %v958_v23  ;;  %v777_v51 = vpop.permute.xlu1 %776 }
 0x187   :  { %v1014_v10 = vsel %vm951_vm0, %v995_v59, 0.0  ;;  %v1965_v32 = vadd.f32 %v924_v63, %v840_v46  ;;  %v825_v42 = vmul.f32 %v1893_v58, %v777_v51 }
 0x188   :  { %v1015_v28 = vadd.f32 %v1014_v10, %v1013_v6  ;;  %v928_v6 = vmul.f32 %v1907_v20, %v1881_v24 }
 0x189   :  { %v961_v44 = vsel %vm951_vm0, %v1965_v32, 0.0  ;;  %v996_v30 = vmul.f32 %v1965_v32, %v1965_v32  ;;  %v841_v35 = vadd.f32 %v825_v42, %v741_v57  ;;  %v693_v57 = vpop.permute.xlu0 %692 }
 0x18a   :  { %v962_v53 = vadd.f32 %v961_v44, %v960_v54  ;;  %v781_v61 = vpop.permute.xlu1 %780 }
 0x18b   :  { %v1016_v37 = vsel %vm951_vm0, %v996_v30, 0.0  ;;  %v1976_v60 = vadd.f32 %v925_v8, %v841_v35  ;;  %v826_v17 = vmul.f32 %v1893_v58, %v781_v61 }
 0x18c   :  { %v1017_v11 = vadd.f32 %v1016_v37, %v1015_v28  ;;  %v729_v28 = vmul.f32 %v1859_v16, %v693_v57 }
 0x18d   :  { %v963_v27 = vsel %vm951_vm0, %v1976_v60, 0.0  ;;  %v997_v0 = vmul.f32 %v1976_v60, %v1976_v60  ;;  %v842_v49 = vadd.f32 %v826_v17, %v1885_v9  ;;  %v709_v17 = vpop.permute.xlu0 %708 }
 0x18e   :  { %v964_v13 = vadd.f32 %v963_v27, %v962_v53  ;;  %v785_v21 = vpop.permute.xlu1 %784  ;;  %v745_v35 = vadd.f32 %v729_v28, %v1846_v18 }
 0x18f   :  { %v1018_v34 = vsel %vm951_vm0, %v997_v0, 0.0  ;;  %v1988_v26 = vadd.f32 %v926_v45, %v842_v49  ;;  %v827_v43 = vmul.f32 %v1893_v58, %v785_v21  ;;  %v830_v49 = vmul.f32 %v1893_v58, %v1896_v47 }
 0x190   :  { %v1019_v36 = vadd.f32 %v1018_v34, %v1017_v11 }
 0x191   :  { %v965_v4 = vsel %vm951_vm0, %v1988_v26, 0.0  ;;  %v998_v9 = vmul.f32 %v1988_v26, %v1988_v26  ;;  %v843_v38 = vadd.f32 %v827_v43, %v743_v50  ;;  %v713_v21 = vpop.permute.xlu0 %712  ;;  %v846_v34 = vadd.f32 %v830_v49, %v1899_v25 }
 0x192   :  { %v966_v23 = vadd.f32 %v965_v4, %v964_v13  ;;  %v789_v29 = vpop.permute.xlu1 %788 }
 0x193   :  { %v1020_v2 = vsel %vm951_vm0, %v998_v9, 0.0  ;;  %v1998_v3 = vadd.f32 %v927_v56, %v843_v38  ;;  %v828_v55 = vmul.f32 %v1893_v58, %v789_v29 }
 0x194   :  { %v1021_v7 = vadd.f32 %v1020_v2, %v1019_v36 }
 0x195   :  { %v967_v48 = vsel %vm951_vm0, %v1998_v3, 0.0  ;;  %v999_v63 = vmul.f32 %v1998_v3, %v1998_v3  ;;  %v844_v12 = vadd.f32 %v828_v55, %v1890_v31  ;;  %v905_v9 = vpop.permute.xlu0 %904 }
 0x196   :  { %v968_v59 = vadd.f32 %v967_v48, %v966_v23  ;;  %v793_v46 = vpop.permute.xlu1 %792 }
 0x197   :  { %v1022_v54 = vsel %vm951_vm0, %v999_v63, 0.0  ;;  %v2009_v51 = vadd.f32 %v928_v6, %v844_v12  ;;  %v829_v30 = vmul.f32 %v1893_v58, %v793_v46  ;;  %v932_v6 = vmul.f32 %v1907_v20, %v905_v9 }
 0x198   :  { %v1023_v10 = vadd.f32 %v1022_v54, %v1021_v7  ;;  %v831_v12 = vmul.f32 %v1893_v58, %v1902_v22  ;;  %v734_v22 = vmul.f32 %v1859_v16, %v713_v21 }
 0x199   :  { %v969_v42 = vsel %vm951_vm0, %v2009_v51, 0.0  ;;  %v1000_v24 = vmul.f32 %v2009_v51, %v2009_v51  ;;  %v845_v61 = vadd.f32 %v829_v30, %v745_v35  ;;  %v733_v35 = vmul.f32 %v1859_v16, %v709_v17 }
 0x19a   :  { %v970_v62 = vadd.f32 %v969_v42, %v968_v59 }
 0x19b   :  { %v1024_v8 = vsel %vm951_vm0, %v1000_v24, 0.0  ;;  %v701_v31 = vpop.permute.xlu1 %700 }
 0x19c   :  { %v1025_v44 = vadd.f32 %v1024_v8, %v1023_v10  ;;  %v731_v56 = vmul.f32 %v1859_v16, %v701_v31 }
 0x19e   :  { %v747_v55 = vadd.f32 %v731_v56, %v1853_v33 }
 0x1a0   :  { %v893_v53 = vpop.permute.xlu1 %892  ;;  %v847_v54 = vadd.f32 %v831_v12, %v747_v55 }
 0x1a1   :  { %v929_v5 = vmul.f32 %v1907_v20, %v893_v53 }
 0x1a3   :  { %v2020_v37 = vadd.f32 %v929_v5, %v845_v61  ;;  %v750_v5 = vadd.f32 %v734_v22, %v1835_v52 }
 0x1a5   :  { %v971_v11 = vsel %vm951_vm0, %v2020_v37, 0.0  ;;  %v1001_v45 = vmul.f32 %v2020_v37, %v2020_v37  ;;  %v705_v27 = vpop.permute.xlu1 %704 }
 0x1a6   :  { %v972_v0 = vadd.f32 %v971_v11, %v970_v62  ;;  %v732_v36 = vmul.f32 %v1859_v16, %v705_v27 }
 0x1a7   :  { %v1026_v18 = vsel %vm951_vm0, %v1001_v45, 0.0 }
 0x1a8   :  { %v1027_v13 = vadd.f32 %v1026_v18, %v1025_v44  ;;  %v748_v29 = vadd.f32 %v732_v36, %v1826_v41  ;;  %v913_v44 = vpop.permute.xlu0 %912  ;;  %v749_v18 = vadd.f32 %v733_v35, %v1862_v39 }
 0x1aa   :  { %v897_v50 = vpop.permute.xlu1 %896 }
 0x1ab   :  { %v930_v43 = vmul.f32 %v1907_v20, %v897_v50 }
 0x1ad   :  { %v2033_v4 = vadd.f32 %v930_v43, %v846_v34 }
 0x1af   :  { %v973_v38 = vsel %vm951_vm0, %v2033_v4, 0.0  ;;  %v1002_v47 = vmul.f32 %v2033_v4, %v2033_v4  ;;  %v805_v23 = vpop.permute.xlu1 %804 }
 0x1b0   :  { %v974_v2 = vadd.f32 %v973_v38, %v972_v0  ;;  %v832_v25 = vmul.f32 %v1893_v58, %v805_v23  ;;  %v934_v0 = vmul.f32 %v1907_v20, %v913_v44 }
 0x1b1   :  { %v1028_v7 = vsel %vm951_vm0, %v1002_v47, 0.0 }
 0x1b2   :  { %v1029_v48 = vadd.f32 %v1028_v7, %v1027_v13  ;;  %v848_v63 = vadd.f32 %v832_v25, %v748_v29 }
 0x1b4   :  { %v901_v59 = vpop.permute.xlu1 %900  ;;  %v2046_v46 = vadd.f32 %v932_v6, %v848_v63 }
 0x1b5   :  { %v931_v41 = vmul.f32 %v1907_v20, %v901_v59 }
 0x1b6   :  { %v1004_v33 = vmul.f32 %v2046_v46, %v2046_v46  ;;  %v977_v28 = vsel %vm951_vm0, %v2046_v46, 0.0 }
 0x1b7   :  { %v2049_v57 = vadd.f32 %v931_v41, %v847_v54 }
 0x1b8   :  { %v1032_v53 = vsel %vm951_vm0, %v1004_v33, 0.0 }
 0x1b9   :  { %v975_v10 = vsel %vm951_vm0, %v2049_v57, 0.0  ;;  %v1003_v42 = vmul.f32 %v2049_v57, %v2049_v57  ;;  %v809_v24 = vpop.permute.xlu1 %808 }
 0x1ba   :  { %v976_v62 = vadd.f32 %v975_v10, %v974_v2  ;;  %v833_v27 = vmul.f32 %v1893_v58, %v809_v24 }
 0x1bb   :  { %v1030_v8 = vsel %vm951_vm0, %v1003_v42, 0.0 }
 0x1bc   :  { %v1031_v31 = vadd.f32 %v1030_v8, %v1029_v48  ;;  %v978_v30 = vadd.f32 %v977_v28, %v976_v62  ;;  %v849_v21 = vadd.f32 %v833_v27, %v749_v18 }
 0x1bd   :  { %v813_v61 = vpop.permute.xlu1 %812 }
 0x1be   :  { %v834_v11 = vmul.f32 %v1893_v58, %v813_v61  ;;  %v1033_v45 = vadd.f32 %v1032_v53, %v1031_v31 }
 0x1c0   :  { %v850_v49 = vadd.f32 %v834_v11, %v750_v5 }
 0x1c2   :  { %v909_v13 = vpop.permute.xlu1 %908  ;;  %v2068_v50 = vadd.f32 %v934_v0, %v850_v49 }
 0x1c3   :  { %v933_v16 = vmul.f32 %v1907_v20, %v909_v13 }
 0x1c4   :  { %v1006_v52 = vmul.f32 %v2068_v50, %v2068_v50  ;;  %v981_v39 = vsel %vm951_vm0, %v2068_v50, 0.0 }
 0x1c5   :  { %v2071_v17 = vadd.f32 %v933_v16, %v849_v21 }
 0x1c6   :  { %v1036_v20 = vsel %vm951_vm0, %v1006_v52, 0.0 }
 0x1c7   :  { %v979_v34 = vsel %vm951_vm0, %v2071_v17, 0.0  ;;  %v1005_v58 = vmul.f32 %v2071_v17, %v2071_v17 }
 0x1c8   :  { %v980_v43 = vadd.f32 %v979_v34, %v978_v30 }
 0x1c9   :  { %v1034_v36 = vsel %vm951_vm0, %v1005_v58, 0.0  ;;  %v1166_v58 = vld [vmem:[%s2124_s3] ss:$0 sm:$0xff] }
 0x1ca   :  { %v982_v56 = vadd.f32 %v981_v39, %v980_v43  ;;  %v1035_v9 = vadd.f32 %v1034_v36, %v1033_v45 }
 0x1cc   :  { %v983_v38 = vrot.slane %v982_v56, 4  ;;  %v1037_v47 = vadd.f32 %v1036_v20, %v1035_v9 }
 0x1ce   :  { %v984_v23 = vadd.f32 %v983_v38, %v982_v56  ;;  %v1038_v29 = vrot.slane %v1037_v47, 4 }
 0x1d0   :  { %v985_v2 = vrot.slane %v984_v23, 2  ;;  %v1039_v25 = vadd.f32 %v1038_v29, %v1037_v47 }
 0x1d2   :  { %v986_v55 = vadd.f32 %v985_v2, %v984_v23  ;;  %v1040_v7 = vrot.slane %v1039_v25, 2 }
 0x1d4   :  { %v987_v6 = vrot.slane %v986_v55, 1  ;;  %v1041_v48 = vadd.f32 %v1040_v7, %v1039_v25 }
 0x1d6   :  { %v988_v63 = vadd.f32 %v987_v6, %v986_v55  ;;  %v1042_v12 = vrot.slane %v1041_v48, 1 }
 0x1d8   :  { %v990_v59 = vmul.f32 0.0078125, %v988_v63  ;;  %v1043_v54 = vadd.f32 %v1042_v12, %v1041_v48 }
 0x1da   :  { %v1044_v41 = vmul.f32 0.0078125, %v1043_v54  ;;  %v1045_v33 = vmul.f32 %v990_v59, %v990_v59  ;;  %v1049_v10 = vsub.f32 %v1913_v1, %v990_v59  ;;  %v1050_v42 = vsub.f32 %v1922_v19, %v990_v59 }
 0x1db   :  { %v1051_v24 = vsub.f32 %v1917_v15, %v990_v59  ;;  %v1052_v22 = vsub.f32 %v1942_v40, %v990_v59  ;;  %v1053_v62 = vsub.f32 %v1953_v14, %v990_v59  ;;  %v1054_v28 = vsub.f32 %v1965_v32, %v990_v59 }
 0x1dc   :  { %v1046_v8 = vsub.f32 %v1044_v41, %v1045_v33  ;;  %v1055_v31 = vsub.f32 %v1976_v60, %v990_v59  ;;  %v1056_v44 = vsub.f32 %v1988_v26, %v990_v59  ;;  %v1057_v30 = vsub.f32 %v1998_v3, %v990_v59  ;;  %v1165_v26 = vld [vmem:[%s2123_s2] ss:$0 sm:$0xff] }
 0x1dd   :  { %v1058_v35 = vsub.f32 %v2009_v51, %v990_v59  ;;  %v1059_v1 = vsub.f32 %v2020_v37, %v990_v59  ;;  %v1060_v19 = vsub.f32 %v2033_v4, %v990_v59  ;;  %v1061_v15 = vsub.f32 %v2049_v57, %v990_v59 }
 0x1de   :  { %v1062_v40 = vsub.f32 %v2046_v46, %v990_v59  ;;  %v1063_v14 = vsub.f32 %v2071_v17, %v990_v59  ;;  %v1064_v32 = vsub.f32 %v2068_v50, %v990_v59  ;;  %v1047_v53 = vmax.f32 %v1046_v8, 0.0 }
 0x1df   :  { %v1071_v3 = vmul.f32 %v1165_v26, %v1049_v10  ;;  %v1072_v51 = vmul.f32 %v1165_v26, %v1050_v42  ;;  %v1073_v37 = vmul.f32 %v1165_v26, %v1051_v24  ;;  %v1074_v61 = vmul.f32 %v1165_v26, %v1052_v22 }
 0x1e0   :  { %v1087_v60 = vadd.f32 1e-05, %v1047_v53  ;;  %v1075_v4 = vmul.f32 %v1165_v26, %v1053_v62  ;;  %v1076_v5 = vmul.f32 %v1165_v26, %v1054_v28  ;;  %v1077_v57 = vmul.f32 %v1165_v26, %v1055_v31 }
 0x1e1   :  { %v1078_v11 = vmul.f32 %v1165_v26, %v1056_v44  ;;  %v1079_v46 = vmul.f32 %v1165_v26, %v1057_v30  ;;  %v1080_v45 = vmul.f32 %v1165_v26, %v1058_v35  ;;  %v1081_v27 = vmul.f32 %v1165_v26, %v1059_v1 }
 0x1e2   :  { %1204 = vrsqrt.f32 %v1087_v60  ;;  %v1082_v0 = vmul.f32 %v1165_v26, %v1060_v19  ;;  %v1083_v18 = vmul.f32 %v1165_v26, %v1061_v15  ;;  %v1084_v13 = vmul.f32 %v1165_v26, %v1062_v40 }
 0x1e3   :  { %v1085_v21 = vmul.f32 %v1165_v26, %v1063_v14  ;;  %v1086_v50 = vmul.f32 %v1165_v26, %v1064_v32 }
 0x1ec   :  { %v1205_v49 = vpop.eup %1204 }
 0x1ed   :  { %v1089_v16 = vmul.f32 %v1205_v49, %v1071_v3  ;;  %v1090_v17 = vmul.f32 %v1205_v49, %v1072_v51  ;;  %v1091_v52 = vmul.f32 %v1205_v49, %v1073_v37  ;;  %v1092_v34 = vmul.f32 %v1205_v49, %v1074_v61 }
 0x1ee   :  { %v1093_v43 = vmul.f32 %v1205_v49, %v1075_v4  ;;  %v1094_v39 = vmul.f32 %v1205_v49, %v1076_v5  ;;  %v1095_v36 = vmul.f32 %v1205_v49, %v1077_v57  ;;  %v1096_v56 = vmul.f32 %v1205_v49, %v1078_v11 }
 0x1ef   :  { %v1097_v9 = vmul.f32 %v1205_v49, %v1079_v46  ;;  %v1098_v20 = vmul.f32 %v1205_v49, %v1080_v45  ;;  %v1099_v38 = vmul.f32 %v1205_v49, %v1081_v27  ;;  %v1100_v47 = vmul.f32 %v1205_v49, %v1082_v0 }
 0x1f0   :  { %v1101_v23 = vmul.f32 %v1205_v49, %v1083_v18  ;;  %v1102_v29 = vmul.f32 %v1205_v49, %v1084_v13  ;;  %v1103_v2 = vmul.f32 %v1205_v49, %v1085_v21  ;;  %v1104_v25 = vmul.f32 %v1205_v49, %v1086_v50 }
 0x1f1   :  { %v1112_v55 = vadd.f32 %v1166_v58, %v1089_v16  ;;  %v1113_v7 = vadd.f32 %v1166_v58, %v1090_v17  ;;  %v1114_v6 = vadd.f32 %v1166_v58, %v1091_v52  ;;  %v1115_v48 = vadd.f32 %v1166_v58, %v1092_v34 }
 0x1f2   :  { %v1116_v63 = vadd.f32 %v1166_v58, %v1093_v43  ;;  %v1117_v12 = vadd.f32 %v1166_v58, %v1094_v39  ;;  %v1118_v59 = vadd.f32 %v1166_v58, %v1095_v36  ;;  %v1119_v54 = vadd.f32 %v1166_v58, %v1096_v56 }
 0x1f3   :  { %v1120_v41 = vadd.f32 %v1166_v58, %v1097_v9  ;;  %v1121_v33 = vadd.f32 %v1166_v58, %v1098_v20  ;;  %v1122_v10 = vadd.f32 %v1166_v58, %v1099_v38  ;;  %v1123_v42 = vadd.f32 %v1166_v58, %v1100_v47 }
 0x1f4   :  { %v1124_v24 = vadd.f32 %v1166_v58, %v1101_v23  ;;  %v1125_v22 = vadd.f32 %v1166_v58, %v1102_v29  ;;  %v1126_v62 = vadd.f32 %v1166_v58, %v1103_v2  ;;  %v1127_v28 = vadd.f32 %v1166_v58, %v1104_v25 }
 0x1f5   :  { %v1128_v8 = vmax.f32 %v1112_v55, 0.0  ;;  %v1129_v31 = vmax.f32 %v1113_v7, 0.0  ;;  %v1130_v44 = vmax.f32 %v1114_v6, 0.0  ;;  %v1131_v30 = vmax.f32 %v1115_v48, 0.0 }
 0x1f6   :  { %v1132_v35 = vmax.f32 %v1116_v63, 0.0  ;;  %v1133_v1 = vmax.f32 %v1117_v12, 0.0  ;;  %v1134_v19 = vmax.f32 %v1118_v59, 0.0  ;;  %v1135_v15 = vmax.f32 %v1119_v54, 0.0 }
 0x1f7   :  { %v1136_v40 = vmax.f32 %v1120_v41, 0.0  ;;  %v1137_v14 = vmax.f32 %v1121_v33, 0.0  ;;  %v1138_v32 = vmax.f32 %v1122_v10, 0.0  ;;  %v1139_v53 = vmax.f32 %v1123_v42, 0.0 }
 0x1f8   :  { %v1140_v60 = vmax.f32 %v1124_v24, 0.0  ;;  %v1141_v26 = vmax.f32 %v1125_v22, 0.0  ;;  %v1142_v3 = vmax.f32 %v1126_v62, 0.0  ;;  %v1143_v51 = vmax.f32 %v1127_v28, 0.0 }
 0x1f9   :  { %v1144_v37 = vmax.f32 %v1128_v8, %v1132_v35  ;;  %v1145_v61 = vmax.f32 %v1129_v31, %v1133_v1  ;;  %v1146_v4 = vmax.f32 %v1130_v44, %v1134_v19  ;;  %v1147_v5 = vmax.f32 %v1131_v30, %v1135_v15 }
 0x1fa   :  { %v1148_v57 = vmax.f32 %v1136_v40, %v1140_v60  ;;  %v1149_v11 = vmax.f32 %v1137_v14, %v1141_v26  ;;  %v1150_v46 = vmax.f32 %v1138_v32, %v1142_v3  ;;  %v1151_v45 = vmax.f32 %v1139_v53, %v1143_v51 }
 0x1fc   :  { %v1152_v27 = vmax.f32 %v1144_v37, %v1148_v57  ;;  %v1153_v0 = vmax.f32 %v1145_v61, %v1149_v11  ;;  %v1154_v49 = vmax.f32 %v1146_v4, %v1150_v46  ;;  %v1155_v18 = vmax.f32 %v1147_v5, %v1151_v45 }
 0x1fe   :  { %1156 = vst.msk [vmem:[%s2125_s4] sm:$0xff] %vm951_vm0, %v1152_v27  ;;  %1157 = vst.msk [vmem:[%s2125_s4 + $0x8] sm:$0xff] %vm951_vm0, %v1153_v0 }
 0x1ff   :  { %1158 = vst.msk [vmem:[%s2125_s4 + $0x10] sm:$0xff] %vm951_vm0, %v1154_v49  ;;  %1159 = vst.msk [vmem:[%s2125_s4 + $0x18] sm:$0xff] %vm951_vm0, %v1155_v18 }

// kernel: resnet_forward.3
= control target key start
LH: loop header
LB: loop body
LE: loop exit
PB: predicated region body
PF: predicated region fallthrough
CT: control target
= control target key end

     0   :  { %v2406_v2 = vmov 1   ;;  %vm37_vm0 = vcmask 31744   ;;  %v2407_v8 = vmov 0.0   ;;  %s3002_s0 = inlined_call_operand.vmem [shape: f32[32,4], index: 0, kind: input, shape index: {}]   ;;  %s3003_s1 = inlined_call_operand.vmem [shape: f32[32,9], index: 1, kind: input, shape index: {}]   ;;  %s3004_s2 = inlined_call_operand.vmem [shape: bf16[9,4,4], index: 2, kind: input, shape index: {}]   ;;  %s3005_s3 = inlined_call_operand.vmem [shape: f32[1,4], index: 3, kind: input, shape index: {}]   ;;  %s3006_s4 = inlined_call_operand.vmem [shape: f32[1,4], index: 4, kind: input, shape index: {}]   ;;  %s3007_s5 = inlined_call_operand.vmem [shape: bf16[9,4,4], index: 5, kind: input, shape index: {}]   ;;  %s3008_s6 = inlined_call_operand.vmem [shape: f32[1,4], index: 6, kind: input, shape index: {}]   ;;  %s3009_s7 = inlined_call_operand.vmem [shape: f32[1,4], index: 7, kind: input, shape index: {}]   ;;  %s3010_s8 = inlined_call_operand.vmem [shape: f32[4,10], index: 8, kind: input, shape index: {}]   ;;  %s3011_s9 = inlined_call_operand.vmem [shape: f32[1,10], index: 9, kind: input, shape index: {}]   ;;  %s3012_s10 = inlined_call_operand.hbm [shape: f32[2,10], index: 10, kind: output, shape index: {}]  }
   0x1   :  { %v2476_v0 = vld [vmem:[%s3003_s1 + $0x10] sm:$0xff]  ;;  %v2481_v1 = vld [vmem:[%s3003_s1] sm:$0xff]  ;;  %2343 = vset.pattern.permute.xlu1 %v2406_v2  ;;  %2342 = vset.pattern.permute.xlu0 %v2406_v2  ;;  %v2488_v3 = vld [vmem:[%s3002_s0 + $0x8] sm:$0xff]  ;;  %40 = vst.msk [vmem:[#allocation2 + $0x10] sm:$0xff] %vm37_vm0, %v2407_v8 }
   0x2   :  { %100 = vperm.xlu1 %2343, %v2476_v0   ;;  %92 = vperm.xlu0 %2342, %v2481_v1   ;;  %v2495_v4 = vld [vmem:[%s3003_s1 + $0x18] sm:$0xff]  ;;  %v2500_v5 = vld [vmem:[%s3002_s0 + $0x10] sm:$0xff]  ;;  %v2505_v6 = vld [vmem:[%s3002_s0] sm:$0xff]  ;;  %41 = vst.msk [vmem:[#allocation2 + $0x18] sm:$0xff] %vm37_vm0, %v2407_v8 }
   0x3   :  { %v2510_v7 = vld [vmem:[%s3003_s1 + $0x8] sm:$0xff]  ;;  %38 = vst.msk [vmem:[#allocation2] sm:$0xff] %vm37_vm0, %v2407_v8  ;;  %39 = vst.msk [vmem:[#allocation2 + $0x8] sm:$0xff] %vm37_vm0, %v2407_v8  ;;  %v2527_v9 = vld [vmem:[%s3002_s0 + $0x18] sm:$0xff] }
   0x4   :  { %42 = vst.msk [vmem:[#allocation2 + $0x20] sm:$0xff] %vm37_vm0, %v2407_v8  ;;  %43 = vst.msk [vmem:[#allocation2 + $0x28] sm:$0xff] %vm37_vm0, %v2407_v8 }
   0x5   :  { %15 = vsyncpa [#allocation4], 0  ;;  %49 = vst.msk [vmem:[#allocation2 + $0x10] sm:$0xff] %vm37_vm0, %v2488_v3  ;;  %v2012_v10 = vld [vmem:[%s3004_s2 + $0x2] sm:$0x3]  ;;  %vm121_vm1 = vcmask 1041408  }
   0x6   :  { %50 = vst.msk [vmem:[#allocation2 + $0x18] sm:$0xff] %vm37_vm0, %v2500_v5  ;;  %48 = vst.msk [vmem:[#allocation2 + $0x8] sm:$0xff] %vm37_vm0, %v2505_v6  ;;  %104 = vperm.xlu1 %2343, %v2495_v4   ;;  %96 = vperm.xlu0 %2342, %v2510_v7   ;;  %v123_v11 = vsel %vm121_vm1, %v2012_v10, 0  ;;  %v2547_v12 = vld [vmem:[%s3004_s2] sm:$0x3]  ;;  %v2408_v13 = vmov 0  }
   0x7   :  { %51 = vst.msk [vmem:[#allocation2 + $0x20] sm:$0xff] %vm37_vm0, %v2527_v9  ;;  %2312 = vmatprep.subr.msk.bf16.mxu0 %vm121_vm1, %v2012_v10  ;;  %v2409_v14 = vmov 2   ;;  %v2410_v15 = vmov 3   ;;  %v2411_v16 = vmov 4   ;;  %v2412_v17 = vmov 5   ;;  %s2417_s25 = smov [#allocation3]  }
   0x8   :  { %2131 = vmatpush3.bf16.msra.mxu0 %v123_v11  ;;  %v2413_v18 = vmov 6   ;;  %v2414_v19 = vmov 7   ;;  %v2415_v20 = vmov 8   ;;  %v181_v37 = vsel %vm121_vm1, %v2547_v12, 0  ;;  %v2017_v40 = vld [vmem:[%s3004_s2 + $0x4] sm:$0x3] }
   0x9   :  { %2313 = vmatprep.subr.msk.bf16.mxu0 %vm121_vm1, %v2547_v12  ;;  %v267_v57 = vsel %vm121_vm1, %v2017_v40, 0  ;;  %v2020_v59 = vld [vmem:[%s3004_s2 + $0x6] sm:$0x3]  ;;  %vm1838_vm2 = vcmask 1043456   ;;  %vm2416_vm3 = vmmov 0   ;;  %s2004_s26 = sshll.u32 %s2417_s25, 4  ;;  %s2005_s26 = int_to_ptr.vmem [resolvable:$true] %s2004_s26 }
   0xa   :  { %2345 = vset.pattern.permute.xlu1 %v2408_v13  ;;  %2344 = vset.pattern.permute.xlu0 %v2408_v13  ;;  %vm1912_vm4 = vcmask 73728   ;;  %s2382_s1 = scalar_lea.vmem %s2005_s26, 32  ;;  %p2387_p1 = scmp.lt.s32.totalorder %s2005_s26, %s2005_s26 }
   0xb   :  { %67 = vperm.xlu1 %2345, %v2510_v7   ;;  %62 = vperm.xlu0 %2344, %v2481_v1   ;;  %p2383_p0 = scmp.ne.s32.totalorder %s2005_s26, %s2382_s1  ;;  %p2388_p2 = scmp.lt.s32.totalorder %s2382_s1, %s2382_s1 }
   0xd   :  { %v2633_v23 = vld [vmem:[#allocation2 + $0x14] sm:$0xff]  ;;  %v87_v24 = vld [vmem:[#allocation2 + $0x4] sm:$0xff]  ;;  %v2638_v26 = vld [vmem:[#allocation2 + $0xc] sm:$0xff]  ;;  %p2389_p3 = por %p2388_p2, %p2387_p1 }
   0xe   :  { %v2636_v25 = vld [vmem:[#allocation2 + $0x1c] sm:$0xff]  ;;  %v2644_v34 = vld [vmem:[#allocation2 + $0xb] sm:$0xff]  ;;  %v2656_v45 = vld [vmem:[#allocation2 + $0x13] sm:$0xff] }
   0xf   :  { %72 = vperm.xlu1 %2345, %v2476_v0   ;;  %77 = vperm.xlu0 %2344, %v2495_v4   ;;  %v52_v35 = vld [vmem:[#allocation2 + $0x3] sm:$0xff]  ;;  %v2658_v47 = vld [vmem:[#allocation2 + $0x1b] sm:$0xff]  ;;  %v2665_v51 = vld [vmem:[#allocation2 + $0xd] sm:$0xff]  ;;  %p2390_p4 = pnand %p2389_p3, %p2383_p0 }
  0x10   :  { %v232_v50 = vld [vmem:[#allocation2 + $0x5] sm:$0xff]  ;;  %v2678_v61 = vld [vmem:[#allocation2 + $0x1d] sm:$0xff]  ;;  %v323_v12 = vld [vmem:[#allocation2 + $0xf] sm:$0xff] }
  0x11   :  { %v322_v10 = vld [vmem:[#allocation2 + $0x7] sm:$0xff] }
  0x13   :  { %2346 = vset.pattern.permute.xlu1 %v2409_v14  ;;  %2347 = vset.pattern.permute.xlu0 %v2409_v14 }
  0x14   :  { %237 = vperm.xlu1 %2346, %v2481_v1   ;;  %241 = vperm.xlu0 %2347, %v2510_v7  }
  0x18   :  { %245 = vperm.xlu1 %2346, %v2476_v0   ;;  %2348 = vset.pattern.permute.xlu0 %v2410_v15 }
  0x19   :  { %327 = vperm.xlu0 %2348, %v2481_v1  }
  0x1c   :  { %249 = vperm.xlu1 %2346, %v2495_v4  }
  0x1d   :  { %339 = vperm.xlu0 %2348, %v2495_v4  }
  0x20   :  { %2349 = vset.pattern.permute.xlu1 %v2410_v15 }
  0x21   :  { %331 = vperm.xlu1 %2349, %v2510_v7   ;;  %2351 = vset.pattern.permute.xlu0 %v2411_v16 }
  0x22   :  { %421 = vperm.xlu0 %2351, %v2510_v7  }
  0x25   :  { %335 = vperm.xlu1 %2349, %v2476_v0  }
  0x26   :  { %2352 = vset.pattern.permute.xlu0 %v2412_v17 }
  0x27   :  { %507 = vperm.xlu0 %2352, %v2481_v1  }
  0x29   :  { %2350 = vset.pattern.permute.xlu1 %v2411_v16 }
  0x2a   :  { %417 = vperm.xlu1 %2350, %v2481_v1  }
  0x2b   :  { %519 = vperm.xlu0 %2352, %v2495_v4  }
  0x2e   :  { %425 = vperm.xlu1 %2350, %v2476_v0  }
  0x2f   :  { %2355 = vset.pattern.permute.xlu0 %v2413_v18 }
  0x30   :  { %601 = vperm.xlu0 %2355, %v2510_v7  }
  0x32   :  { %429 = vperm.xlu1 %2350, %v2495_v4  }
  0x34   :  { %2356 = vset.pattern.permute.xlu0 %v2414_v19 }
  0x35   :  { %687 = vperm.xlu0 %2356, %v2481_v1  }
  0x36   :  { %2353 = vset.pattern.permute.xlu1 %v2412_v17 }
  0x37   :  { %511 = vperm.xlu1 %2353, %v2510_v7  }
  0x39   :  { %699 = vperm.xlu0 %2356, %v2495_v4  }
  0x3b   :  { %515 = vperm.xlu1 %2353, %v2476_v0  }
  0x3d   :  { %2359 = vset.pattern.permute.xlu0 %v2415_v20 }
  0x3e   :  { %781 = vperm.xlu0 %2359, %v2510_v7  }
  0x3f   :  { %2354 = vset.pattern.permute.xlu1 %v2413_v18 }
  0x40   :  { %597 = vperm.xlu1 %2354, %v2481_v1  }
  0x42   :  { %2360 = vset.pattern.permute.xlu0 %v2406_v2 }
  0x43   :  { %978 = vperm.xlu0 %2360, %v2481_v1  }
  0x44   :  { %605 = vperm.xlu1 %2354, %v2476_v0  }
  0x47   :  { %990 = vperm.xlu0 %2360, %v2495_v4  }
  0x48   :  { %609 = vperm.xlu1 %2354, %v2495_v4  }
  0x4b   :  { %2363 = vset.pattern.permute.xlu0 %v2408_v13 }
  0x4c   :  { %2357 = vset.pattern.permute.xlu1 %v2414_v19  ;;  %953 = vperm.xlu0 %2363, %v2510_v7  }
  0x4d   :  { %691 = vperm.xlu1 %2357, %v2510_v7  }
  0x50   :  { %2364 = vset.pattern.permute.xlu0 %v2409_v14 }
  0x51   :  { %695 = vperm.xlu1 %2357, %v2476_v0   ;;  %1122 = vperm.xlu0 %2364, %v2481_v1  }
  0x55   :  { %2358 = vset.pattern.permute.xlu1 %v2415_v20  ;;  %1134 = vperm.xlu0 %2364, %v2495_v4  }
  0x56   :  { %777 = vperm.xlu1 %2358, %v2481_v1  }
  0x59   :  { %2367 = vset.pattern.permute.xlu0 %v2410_v15 }
  0x5a   :  { %785 = vperm.xlu1 %2358, %v2476_v0   ;;  %1216 = vperm.xlu0 %2367, %v2510_v7  }
  0x5e   :  { %789 = vperm.xlu1 %2358, %v2495_v4   ;;  %2368 = vset.pattern.permute.xlu0 %v2411_v16 }
  0x5f   :  { %1302 = vperm.xlu0 %2368, %v2481_v1  }
  0x62   :  { %2361 = vset.pattern.permute.xlu1 %v2406_v2  ;;  %v2680_v2 = vld [vmem:[#allocation2 + $0x15] sm:$0xff] }
  0x63   :  { %982 = vperm.xlu1 %2361, %v2510_v7   ;;  %1314 = vperm.xlu0 %2368, %v2495_v4  }
  0x67   :  { %986 = vperm.xlu1 %2361, %v2476_v0   ;;  %2371 = vset.pattern.permute.xlu0 %v2412_v17 }
  0x68   :  { %1396 = vperm.xlu0 %2371, %v2510_v7  }
  0x6b   :  { %2362 = vset.pattern.permute.xlu1 %v2408_v13 }
  0x6c   :  { %948 = vperm.xlu1 %2362, %v2481_v1   ;;  %2372 = vset.pattern.permute.xlu0 %v2413_v18 }
  0x6d   :  { %1482 = vperm.xlu0 %2372, %v2481_v1  }
  0x70   :  { %958 = vperm.xlu1 %2362, %v2476_v0  }
  0x71   :  { %1494 = vperm.xlu0 %2372, %v2495_v4  }
  0x74   :  { %963 = vperm.xlu1 %2362, %v2495_v4  }
  0x75   :  { %2375 = vset.pattern.permute.xlu0 %v2414_v19 }
  0x76   :  { %1576 = vperm.xlu0 %2375, %v2510_v7  }
  0x78   :  { %2365 = vset.pattern.permute.xlu1 %v2409_v14 }
  0x79   :  { %1126 = vperm.xlu1 %2365, %v2510_v7  }
  0x7a   :  { %2376 = vset.pattern.permute.xlu0 %v2415_v20 }
  0x7b   :  { %1662 = vperm.xlu0 %2376, %v2481_v1  }
  0x7d   :  { %1130 = vperm.xlu1 %2365, %v2476_v0  }
  0x7f   :  { %1674 = vperm.xlu0 %2376, %v2495_v4  }
  0x81   :  { %v101_v21 = vpop.permute.xlu1 %100  ;;  %v93_v22 = vpop.permute.xlu0 %92  ;;  %2366 = vset.pattern.permute.xlu1 %v2410_v15 }
  0x82   :  { %1212 = vperm.xlu1 %2366, %v2481_v1   ;;  %v109_v29 = vmul.f32 %v101_v21, %v2633_v23  ;;  %v107_v30 = vmul.f32 %v93_v22, %v87_v24  ;;  %v357_v21 = vsel %vm121_vm1, %v2020_v59, 0  ;;  %v2023_v24 = vld [vmem:[%s3004_s2 + $0x8] sm:$0x3] }
  0x85   :  { %v105_v27 = vpop.permute.xlu1 %104  ;;  %v97_v28 = vpop.permute.xlu0 %96 }
  0x86   :  { %v110_v31 = vmul.f32 %v105_v27, %v2636_v25  ;;  %v108_v32 = vmul.f32 %v97_v28, %v2638_v26  ;;  %1220 = vperm.xlu1 %2366, %v2476_v0  }
  0x88   :  { %v112_v33 = vpack.c.bf16 %v110_v31, %v109_v29  ;;  %v111_v36 = vpack.c.bf16 %v108_v32, %v107_v30  ;;  %v413_v30 = vld [vmem:[#allocation2 + $0x10] sm:$0xff]  ;;  %v325_v32 = vld [vmem:[#allocation2 + $0x1f] sm:$0xff] }
  0x89   :  { %v324_v31 = vld [vmem:[#allocation2 + $0x17] sm:$0xff] }
  0x8a   :  { %v68_v38 = vpop.permute.xlu1 %67  ;;  %v63_v39 = vpop.permute.xlu0 %62  ;;  %2132 = vmatprep.mubr.msk.bf16.mxu0 %vm37_vm0, %v111_v36  ;;  %1224 = vperm.xlu1 %2366, %v2495_v4  }
  0x8b   :  { %v81_v41 = vmul.f32 %v68_v38, %v2644_v34  ;;  %v80_v42 = vmul.f32 %v63_v39, %v52_v35  ;;  %2133 = vmatmul.mubr.msk.bf16.vlgmr.msra.gmra.mrb[0].mxu0 %vm37_vm0, %v112_v33  ;;  %v412_v33 = vld [vmem:[#allocation2 + $0x8] sm:$0xff] }
  0x8c   :  { %2137 = vmatpush3.bf16.msra.mxu0 %v181_v37 }
  0x8d   :  { %v84_v43 = vpack.c.bf16 %v81_v41, %v80_v42  ;;  %2314 = vmatprep.subr.msk.bf16.mxu0 %vm121_vm1, %v2017_v40 }
  0x8e   :  { %v73_v44 = vpop.permute.xlu1 %72  ;;  %v78_v46 = vpop.permute.xlu0 %77  ;;  %2369 = vset.pattern.permute.xlu1 %v2411_v16 }
  0x8f   :  { %2138 = vmatprep.mubr.msk.bf16.mxu0 %vm37_vm0, %v84_v43  ;;  %1306 = vperm.xlu1 %2369, %v2510_v7   ;;  %v82_v48 = vmul.f32 %v73_v44, %v2656_v45  ;;  %v83_v49 = vmul.f32 %v78_v46, %v2658_v47  ;;  %v447_v43 = vsel %vm121_vm1, %v2023_v24, 0  ;;  %v2026_v44 = vld [vmem:[%s3004_s2 + $0xa] sm:$0x3]  ;;  %v415_v46 = vld [vmem:[#allocation2 + $0x20] sm:$0xff] }
  0x91   :  { %v85_v56 = vpack.c.bf16 %v83_v49, %v82_v48  ;;  %v502_v48 = vld [vmem:[#allocation2 + $0x9] sm:$0xff] }
  0x93   :  { %v238_v52 = vpop.permute.xlu1 %237  ;;  %v242_v53 = vpop.permute.xlu0 %241  ;;  %1310 = vperm.xlu1 %2369, %v2476_v0  }
  0x94   :  { %v252_v54 = vmul.f32 %v238_v52, %v232_v50  ;;  %v253_v55 = vmul.f32 %v242_v53, %v2665_v51  ;;  %v414_v50 = vld [vmem:[#allocation2 + $0x18] sm:$0xff] }
  0x95   :  { %v503_v52 = vld [vmem:[#allocation2 + $0x11] sm:$0xff] }
  0x96   :  { %v256_v58 = vpack.c.bf16 %v253_v55, %v252_v54 }
  0x97   :  { %v246_v60 = vpop.permute.xlu1 %245  ;;  %2139 = vmatmul.mubr.msk.bf16.vlgmr.msra.gmra.mrb[0].mxu0 %vm37_vm0, %v85_v56  ;;  %2370 = vset.pattern.permute.xlu1 %v2412_v17 }
  0x98   :  { %2143 = vmatpush3.bf16.msra.mxu0 %v267_v57  ;;  %2144 = vmatprep.mubr.msk.bf16.mxu0 %vm37_vm0, %v256_v58  ;;  %v328_v63 = vpop.permute.xlu0 %327  ;;  %v254_v13 = vmul.f32 %v246_v60, %v2680_v2 }
  0x99   :  { %2315 = vmatprep.subr.msk.bf16.mxu0 %vm121_vm1, %v2020_v59  ;;  %1392 = vperm.xlu1 %2370, %v2481_v1   ;;  %v342_v14 = vmul.f32 %v328_v63, %v322_v10  ;;  %v537_v59 = vsel %vm121_vm1, %v2026_v44, 0  ;;  %v504_v10 = vld [vmem:[#allocation2 + $0x19] sm:$0xff] }
  0x9b   :  { %v250_v62 = vpop.permute.xlu1 %249 }
  0x9c   :  { %v255_v11 = vmul.f32 %v250_v62, %v2678_v61  ;;  %v340_v22 = vpop.permute.xlu0 %339  ;;  %v2029_v62 = vld [vmem:[%s3004_s2 + $0xc] sm:$0x3] }
  0x9d   :  { %1400 = vperm.xlu1 %2370, %v2476_v0   ;;  %v345_v37 = vmul.f32 %v340_v22, %v325_v32  ;;  %v627_v22 = vsel %vm121_vm1, %v2029_v62, 0 }
  0x9e   :  { %v257_v16 = vpack.c.bf16 %v255_v11, %v254_v13  ;;  %v505_v11 = vld [vmem:[#allocation2 + $0x21] sm:$0xff] }
  0xa0   :  { %v332_v15 = vpop.permute.xlu1 %331 }
  0xa1   :  { %v343_v17 = vmul.f32 %v332_v15, %v323_v12  ;;  %1404 = vperm.xlu1 %2370, %v2495_v4   ;;  %v422_v29 = vpop.permute.xlu0 %421 }
  0xa2   :  { %v433_v35 = vmul.f32 %v422_v29, %v413_v30 }
  0xa3   :  { %v346_v27 = vpack.c.bf16 %v343_v17, %v342_v14  ;;  %2145 = vmatmul.mubr.msk.bf16.vlgmr.msra.gmra.mrb[0].mxu0 %vm37_vm0, %v257_v16 }
  0xa4   :  { %2149 = vmatpush3.bf16.msra.mxu0 %v357_v21  ;;  %v336_v28 = vpop.permute.xlu1 %335 }
  0xa5   :  { %2150 = vmatprep.mubr.msk.bf16.mxu0 %vm37_vm0, %v346_v27  ;;  %2316 = vmatprep.subr.msk.bf16.mxu0 %vm121_vm1, %v2023_v24  ;;  %v344_v36 = vmul.f32 %v336_v28, %v324_v31 }
  0xa6   :  { %2373 = vset.pattern.permute.xlu1 %v2413_v18  ;;  %v508_v49 = vpop.permute.xlu0 %507 }
  0xa7   :  { %1486 = vperm.xlu1 %2373, %v2510_v7   ;;  %v347_v41 = vpack.c.bf16 %v345_v37, %v344_v36  ;;  %v522_v54 = vmul.f32 %v508_v49, %v502_v48  ;;  %v2035_v36 = vld [vmem:[%s3004_s2 + $0x10] sm:$0x3] }
  0xa9   :  { %v418_v38 = vpop.permute.xlu1 %417 }
  0xaa   :  { %v432_v39 = vmul.f32 %v418_v38, %v412_v33  ;;  %v520_v60 = vpop.permute.xlu0 %519 }
  0xab   :  { %1490 = vperm.xlu1 %2373, %v2476_v0   ;;  %v525_v15 = vmul.f32 %v520_v60, %v505_v11 }
  0xac   :  { %v436_v40 = vpack.c.bf16 %v433_v35, %v432_v39 }
  0xad   :  { %v426_v42 = vpop.permute.xlu1 %425 }
  0xae   :  { %v434_v56 = vmul.f32 %v426_v42, %v414_v50  ;;  %v2753_v50 = vld [vmem:[%s3007_s5] sm:$0x3] }
  0xaf   :  { %2151 = vmatmul.mubr.msk.bf16.vlgmr.msra.gmra.mrb[0].mxu0 %vm37_vm0, %v347_v41  ;;  %2374 = vset.pattern.permute.xlu1 %v2414_v19  ;;  %v602_v63 = vpop.permute.xlu0 %601 }
  0xb0   :  { %2155 = vmatpush3.bf16.msra.mxu0 %v447_v43  ;;  %2156 = vmatprep.mubr.msk.bf16.mxu0 %vm37_vm0, %v436_v40  ;;  %v613_v13 = vmul.f32 %v602_v63, %v2656_v45 }
  0xb1   :  { %2317 = vmatprep.subr.msk.bf16.mxu0 %vm121_vm1, %v2026_v44  ;;  %1572 = vperm.xlu1 %2374, %v2481_v1   ;;  %v430_v18 = vpop.permute.xlu1 %429  ;;  %v807_v44 = vsel %vm121_vm1, %v2035_v36, 0 }
  0xb2   :  { %v435_v53 = vmul.f32 %v430_v18, %v415_v46  ;;  %v775_v46 = vld [vmem:[#allocation2 + $0x25] sm:$0xff] }
  0xb4   :  { %v437_v57 = vpack.c.bf16 %v435_v53, %v434_v56  ;;  %v688_v45 = vpop.permute.xlu0 %687 }
  0xb5   :  { %1580 = vperm.xlu1 %2374, %v2476_v0   ;;  %v702_v24 = vmul.f32 %v688_v45, %v2638_v26 }
  0xb6   :  { %v512_v55 = vpop.permute.xlu1 %511 }
  0xb7   :  { %v523_v19 = vmul.f32 %v512_v55, %v503_v52 }
  0xb8   :  { %v700_v35 = vpop.permute.xlu0 %699 }
  0xb9   :  { %v526_v58 = vpack.c.bf16 %v523_v19, %v522_v54  ;;  %1584 = vperm.xlu1 %2374, %v2495_v4  }
  0xba   :  { %v516_v1 = vpop.permute.xlu1 %515 }
  0xbb   :  { %2157 = vmatmul.mubr.msk.bf16.vlgmr.msra.gmra.mrb[0].mxu0 %vm37_vm0, %v437_v57  ;;  %v524_v14 = vmul.f32 %v516_v1, %v504_v10 }
  0xbc   :  { %2161 = vmatpush3.bf16.msra.mxu0 %v537_v59  ;;  %2162 = vmatprep.mubr.msk.bf16.mxu0 %vm37_vm0, %v526_v58 }
  0xbd   :  { %2318 = vmatprep.subr.msk.bf16.mxu0 %vm121_vm1, %v2029_v62  ;;  %2377 = vset.pattern.permute.xlu1 %v2415_v20  ;;  %v527_v21 = vpack.c.bf16 %v525_v15, %v524_v14  ;;  %v2032_v20 = vld [vmem:[%s3004_s2 + $0xe] sm:$0x3]  ;;  %v782_v26 = vpop.permute.xlu0 %781 }
  0xbe   :  { %1666 = vperm.xlu1 %2377, %v2510_v7   ;;  %v717_v33 = vsel %vm121_vm1, %v2032_v20, 0  ;;  %v793_v38 = vmul.f32 %v782_v26, %v2680_v2 }
  0xbf   :  { %v598_v4 = vpop.permute.xlu1 %597 }
  0xc0   :  { %v612_v12 = vmul.f32 %v598_v4, %v2644_v34  ;;  %v595_v34 = vld [vmem:[#allocation2 + $0x23] sm:$0xff] }
  0xc2   :  { %1670 = vperm.xlu1 %2377, %v2476_v0   ;;  %v616_v17 = vpack.c.bf16 %v613_v13, %v612_v12  ;;  %v2773_v58 = vpop.permute.xlu0 %978 }
  0xc3   :  { %v606_v16 = vpop.permute.xlu1 %605 }
  0xc4   :  { %v614_v27 = vmul.f32 %v606_v16, %v2658_v47  ;;  %v685_v47 = vld [vmem:[#allocation2 + $0x24] sm:$0xff] }
  0xc5   :  { %v705_v40 = vmul.f32 %v700_v35, %v685_v47 }
  0xc7   :  { %2163 = vmatmul.mubr.msk.bf16.vlgmr.msra.gmra.mrb[0].mxu0 %vm37_vm0, %v527_v21  ;;  %v610_v7 = vpop.permute.xlu1 %609  ;;  %v2785_v21 = vpop.permute.xlu0 %990 }
  0xc8   :  { %2167 = vmatpush3.bf16.msra.mxu0 %v627_v22  ;;  %2168 = vmatprep.mubr.msk.bf16.mxu0 %vm37_vm0, %v616_v17  ;;  %v615_v28 = vmul.f32 %v610_v7, %v595_v34 }
  0xc9   :  { %2319 = vmatprep.subr.msk.bf16.mxu0 %vm121_vm1, %v2032_v20 }
  0xca   :  { %v617_v32 = vpack.c.bf16 %v615_v28, %v614_v27 }
  0xcc   :  { %v692_v0 = vpop.permute.xlu1 %691 }
  0xcd   :  { %v703_v29 = vmul.f32 %v692_v0, %v2633_v23 }
  0xcf   :  { %v706_v30 = vpack.c.bf16 %v703_v29, %v702_v24 }
  0xd0   :  { %v696_v31 = vpop.permute.xlu1 %695 }
  0xd1   :  { %v704_v39 = vmul.f32 %v696_v31, %v2636_v25  ;;  %v2040_v25 = vld [vmem:[%s3007_s5 + $0x2] sm:$0x3] }
  0xd2   :  { %2321 = vmatprep.subr.msk.bf16.mxu1 %vm121_vm1, %v2040_v25  ;;  %v1008_v49 = vsel %vm121_vm1, %v2040_v25, 0 }
  0xd3   :  { %2169 = vmatmul.mubr.msk.bf16.vlgmr.msra.gmra.mrb[0].mxu0 %vm37_vm0, %v617_v32  ;;  %v707_v43 = vpack.c.bf16 %v705_v40, %v704_v39  ;;  %2185 = vmatpush3.bf16.msra.mxu1 %v1008_v49 }
  0xd4   :  { %2173 = vmatpush3.bf16.msra.mxu0 %v717_v33  ;;  %2174 = vmatprep.mubr.msk.bf16.mxu0 %vm37_vm0, %v706_v30  ;;  %v2792_v30 = vpop.permute.xlu0 %953 }
  0xd5   :  { %2320 = vmatprep.subr.msk.bf16.mxu0 %vm121_vm1, %v2035_v36  ;;  %v778_v23 = vpop.permute.xlu1 %777  ;;  %2322 = vmatprep.subr.msk.bf16.mxu1 %vm121_vm1, %v2753_v50 }
  0xd6   :  { %v792_v37 = vmul.f32 %v778_v23, %v2665_v51 }
  0xd8   :  { %v796_v42 = vpack.c.bf16 %v793_v38, %v792_v37  ;;  %v2796_v23 = vpop.permute.xlu0 %1122 }
  0xd9   :  { %v786_v41 = vpop.permute.xlu1 %785 }
  0xda   :  { %v794_v51 = vmul.f32 %v786_v41, %v2678_v61 }
  0xdd   :  { %v790_v18 = vpop.permute.xlu1 %789 }
  0xde   :  { %v795_v2 = vmul.f32 %v790_v18, %v775_v46 }
  0xdf   :  { %2175 = vmatmul.mubr.msk.bf16.vlgmr.msra.gmra.mrb[0].mxu0 %vm37_vm0, %v707_v43 }
  0xe0   :  { %2179 = vmatpush3.bf16.msra.mxu0 %v807_v44  ;;  %2180 = vmatprep.mubr.msk.bf16.mxu0 %vm37_vm0, %v796_v42  ;;  %v797_v48 = vpack.c.bf16 %v795_v2, %v794_v51  ;;  %v2800_v44 = vpop.permute.xlu0 %1134 }
  0xe1   :  { %2238 = vmatprep.subr.mxu0 %v2407_v8 }
  0xe2   :  { %v2757_v61 = vpop.permute.xlu1 %982 }
  0xe6   :  { %v2759_v52 = vpop.permute.xlu1 %986 }
  0xeb   :  { %2181 = vmatmul.mubr.msk.bf16.vlgmr.msra.gmra.mrb[0].mxu0 %vm37_vm0, %v797_v48  ;;  %v2761_v53 = vpop.permute.xlu1 %948 }
  0xec   :  { %2240 = vmatprep.mubr.msk.f32.mxu0 %vm2416_vm3, %v2407_v8 }
  0xef   :  { %v2763_v54 = vpop.permute.xlu1 %958 }
  0xf3   :  { %v2765_v55 = vpop.permute.xlu1 %963 }
  0xf8   :  { %v2767_v56 = vpop.permute.xlu1 %1126 }
  0xfc   :  { %v2769_v19 = vpop.permute.xlu1 %1130 }
 0x101   :  { %v2779_v12 = vpop.permute.xlu1 %1212 }
 0x105   :  { %v2790_v29 = vpop.permute.xlu1 %1220 }
 0x109   :  { %v2794_v47 = vpop.permute.xlu1 %1224 }
 0x10e   :  { %v2798_v43 = vpop.permute.xlu1 %1306 }
 0x1be   :  { %v2771_v57 = vpop.f32.mrb[0].mxu0 }
 0x1bf   :  { %v843_v59 = vpop.f32.mrb[1].mxu0  ;;  %v879_v63 = vmul.f32 %v2771_v57, %v2771_v57  ;;  %v865_v14 = vsel %vm37_vm0, %v2771_v57, 0.0 }
 0x1c0   :  { %v877_v60 = vmul.f32 %v843_v59, %v843_v59  ;;  %v2183_v1 = vpop.f32.mrb[2].mxu0  ;;  %v862_v10 = vsel %vm37_vm0, %v843_v59, 0.0 }
 0x1c1   :  { %v846_v62 = vpop.f32.mrb[3].mxu0  ;;  %v880_v16 = vmul.f32 %v2183_v1, %v2183_v1  ;;  %v884_v7 = vsel %vm37_vm0, %v879_v63, 0.0  ;;  %v867_v34 = vsel %vm37_vm0, %v2183_v1, 0.0  ;;  %v2803_v63 = vpop.permute.xlu1 %1310 }
 0x1c2   :  { %v863_v11 = vsel %vm37_vm0, %v846_v62, 0.0  ;;  %v878_v4 = vmul.f32 %v846_v62, %v846_v62  ;;  %v881_v15 = vsel %vm37_vm0, %v877_v60, 0.0 }
 0x1c3   :  { %v864_v13 = vadd.f32 %v863_v11, %v862_v10  ;;  %v886_v24 = vsel %vm37_vm0, %v880_v16, 0.0  ;;  %v2805_v10 = vpop.permute.xlu0 %1216 }
 0x1c4   :  { %v882_v17 = vsel %vm37_vm0, %v878_v4, 0.0 }
 0x1c5   :  { %v866_v22 = vadd.f32 %v865_v14, %v864_v13  ;;  %v883_v20 = vadd.f32 %v882_v17, %v881_v15  ;;  %v2807_v4 = vpop.permute.xlu1 %1392 }
 0x1c7   :  { %v868_v45 = vadd.f32 %v867_v34, %v866_v22  ;;  %v885_v0 = vadd.f32 %v884_v7, %v883_v20  ;;  %v2809_v13 = vpop.permute.xlu0 %1302  ;;  %v2039_v22 = vld [vmem:[%s3006_s4] ss:$0 sm:$0xff] }
 0x1c9   :  { %v869_v27 = vrot.slane %v868_v45, 4  ;;  %v887_v28 = vadd.f32 %v886_v24, %v885_v0 }
 0x1cb   :  { %v870_v31 = vadd.f32 %v869_v27, %v868_v45  ;;  %v888_v32 = vrot.slane %v887_v28, 4  ;;  %v2816_v16 = vpop.permute.xlu0 %1314 }
 0x1cd   :  { %v871_v33 = vrot.slane %v870_v31, 2  ;;  %v889_v35 = vadd.f32 %v888_v32, %v887_v28 }
 0x1cf   :  { %v872_v36 = vadd.f32 %v871_v33, %v870_v31  ;;  %v890_v26 = vrot.slane %v889_v35, 2 }
 0x1d1   :  { %v873_v37 = vrot.slane %v872_v36, 1  ;;  %v891_v38 = vadd.f32 %v890_v26, %v889_v35  ;;  %v2823_v26 = vpop.permute.xlu0 %1396 }
 0x1d3   :  { %v874_v39 = vadd.f32 %v873_v37, %v872_v36  ;;  %v892_v40 = vrot.slane %v891_v38, 1 }
 0x1d5   :  { %v876_v41 = vmul.f32 0.03125, %v874_v39  ;;  %v893_v42 = vadd.f32 %v892_v40, %v891_v38  ;;  %v2831_v38 = vpop.permute.xlu0 %1482 }
 0x1d7   :  { %v894_v18 = vmul.f32 0.03125, %v893_v42  ;;  %v895_v46 = vmul.f32 %v876_v41, %v876_v41  ;;  %v899_v51 = vsub.f32 %v843_v59, %v876_v41  ;;  %v900_v2 = vsub.f32 %v846_v62, %v876_v41  ;;  %v2038_v59 = vld [vmem:[%s3005_s3] ss:$0 sm:$0xff]  ;;  %v2814_v62 = vpop.permute.xlu1 %1400 }
 0x1d8   :  { %v901_v48 = vsub.f32 %v2771_v57, %v876_v41  ;;  %v902_v25 = vsub.f32 %v2183_v1, %v876_v41 }
 0x1d9   :  { %v896_v49 = vsub.f32 %v894_v18, %v895_v46  ;;  %v909_v57 = vmul.f32 %v2038_v59, %v899_v51  ;;  %v910_v1 = vmul.f32 %v2038_v59, %v900_v2  ;;  %v2835_v40 = vpop.permute.xlu0 %1494 }
 0x1da   :  { %v911_v14 = vmul.f32 %v2038_v59, %v901_v48  ;;  %v912_v15 = vmul.f32 %v2038_v59, %v902_v25 }
 0x1db   :  { %v897_v60 = vmax.f32 %v896_v49, 0.0  ;;  %v2821_v31 = vpop.permute.xlu1 %1404 }
 0x1dd   :  { %v913_v11 = vadd.f32 1e-05, %v897_v60  ;;  %v1577_v48 = vpop.permute.xlu0 %1576 }
 0x1df   :  { %2378 = vrsqrt.f32 %v913_v11  ;;  %v2829_v37 = vpop.permute.xlu1 %1486 }
 0x1e3   :  { %v2833_v39 = vpop.permute.xlu1 %1490 }
 0x1e7   :  { %v1573_v51 = vpop.permute.xlu1 %1572 }
 0x1e9   :  { %v2379_v17 = vpop.eup %2378 }
 0x1ea   :  { %v915_v20 = vmul.f32 %v2379_v17, %v909_v57  ;;  %v916_v7 = vmul.f32 %v2379_v17, %v910_v1  ;;  %v917_v34 = vmul.f32 %v2379_v17, %v911_v14  ;;  %v918_v45 = vmul.f32 %v2379_v17, %v912_v15 }
 0x1ec   :  { %v926_v0 = vadd.f32 %v2039_v22, %v915_v20  ;;  %v927_v24 = vadd.f32 %v2039_v22, %v916_v7  ;;  %v928_v27 = vadd.f32 %v2039_v22, %v917_v34  ;;  %v929_v28 = vadd.f32 %v2039_v22, %v918_v45 }
 0x1ee   :  { %v930_v32 = vmax.f32 %v926_v0, 0.0  ;;  %v931_v33 = vmax.f32 %v927_v24, 0.0  ;;  %v932_v35 = vmax.f32 %v928_v27, 0.0  ;;  %v933_v36 = vmax.f32 %v929_v28, 0.0 }
 0x1f0   :  { %934 = vst.msk [vmem:[#allocation2 + $0x8] sm:$0xff] %vm37_vm0, %v930_v32  ;;  %935 = vst.msk [vmem:[#allocation2 + $0x10] sm:$0xff] %vm37_vm0, %v931_v33  ;;  %v2048_v32 = vld [vmem:[%s3007_s5 + $0x6] sm:$0x3] }
 0x1f1   :  { %936 = vst.msk [vmem:[#allocation2 + $0x18] sm:$0xff] %vm37_vm0, %v932_v35  ;;  %937 = vst.msk [vmem:[#allocation2 + $0x20] sm:$0xff] %vm37_vm0, %v933_v36 }
 0x1f7   :  { %v1567_v18 = vld [vmem:[#allocation2 + $0xc] sm:$0xff]  ;;  %v973_v46 = vld [vmem:[#allocation2 + $0x4] sm:$0xff] }
 0x1f8   :  { %v975_v41 = vld [vmem:[#allocation2 + $0x14] sm:$0xff]  ;;  %v2837_v42 = vld [vmem:[#allocation2 + $0x1c] sm:$0xff]  ;;  %v2839_v2 = vmul.f32 %v1573_v51, %v1567_v18  ;;  %v2844_v11 = vld [vmem:[#allocation2 + $0xb] sm:$0xff]  ;;  %v993_v57 = vmul.f32 %v2773_v58, %v973_v46  ;;  %v1242_v46 = vsel %vm121_vm1, %v2048_v32, 0 }
 0x1f9   :  { %v995_v25 = vmul.f32 %v2759_v52, %v975_v41  ;;  %v996_v49 = vmul.f32 %v2785_v21, %v2837_v42  ;;  %v938_v60 = vld [vmem:[#allocation2 + $0x3] sm:$0xff]  ;;  %v2846_v59 = vmul.f32 %v1577_v48, %v975_v41  ;;  %v967_v15 = vmul.f32 %v2792_v30, %v2844_v11 }
 0x1fa   :  { %v966_v14 = vmul.f32 %v2761_v53, %v938_v60  ;;  %v994_v52 = vmul.f32 %v1567_v18, %v2757_v61  ;;  %v1066_v21 = vsel %vm121_vm1, %v2753_v50, 0  ;;  %v2045_v58 = vld [vmem:[%s3007_s5 + $0x4] sm:$0x3]  ;;  %v2864_v61 = vld [vmem:[#allocation2 + $0x13] sm:$0xff]  ;;  %v2866_v53 = vld [vmem:[#allocation2 + $0x1b] sm:$0xff] }
 0x1fb   :  { %v1591_v1 = vpack.c.bf16 %v2846_v59, %v2839_v2  ;;  %v998_v17 = vpack.c.bf16 %v996_v49, %v995_v25  ;;  %v1117_v30 = vld [vmem:[#allocation2 + $0x5] sm:$0xff]  ;;  %v2868_v50 = vld [vmem:[#allocation2 + $0xd] sm:$0xff]  ;;  %v968_v7 = vmul.f32 %v2864_v61, %v2763_v54  ;;  %v969_v34 = vmul.f32 %v2866_v53, %v2765_v55  ;;  %v2884_v54 = vld [vmem:[#allocation2 + $0x15] sm:$0xff] }
 0x1fc   :  { %v997_v22 = vpack.c.bf16 %v994_v52, %v993_v57  ;;  %v970_v20 = vpack.c.bf16 %v967_v15, %v966_v14  ;;  %v1137_v45 = vmul.f32 %v2796_v23, %v1117_v30  ;;  %v1138_v0 = vmul.f32 %v2767_v56, %v2868_v50  ;;  %v2886_v55 = vld [vmem:[#allocation2 + $0x1d] sm:$0xff]  ;;  %v1207_v56 = vld [vmem:[#allocation2 + $0x7] sm:$0xff]  ;;  %v1208_v23 = vld [vmem:[#allocation2 + $0xf] sm:$0xff] }
 0x1fd   :  { %v971_v24 = vpack.c.bf16 %v969_v34, %v968_v7  ;;  %v1152_v27 = vsel %vm121_vm1, %v2045_v58, 0  ;;  %v1139_v33 = vmul.f32 %v2769_v19, %v2884_v54  ;;  %v1140_v35 = vmul.f32 %v2800_v44, %v2886_v55  ;;  %v2051_v48 = vld [vmem:[%s3007_s5 + $0x8] sm:$0x3]  ;;  %v1209_v19 = vld [vmem:[#allocation2 + $0x17] sm:$0xff]  ;;  %v1210_v44 = vld [vmem:[#allocation2 + $0x1f] sm:$0xff] }
 0x1fe   :  { %2186 = vmatprep.mubr.msk.bf16.mxu1 %vm37_vm0, %v997_v22  ;;  %v1141_v28 = vpack.c.bf16 %v1138_v0, %v1137_v45  ;;  %v1227_v36 = vmul.f32 %v2779_v12, %v1207_v56  ;;  %v1228_v41 = vmul.f32 %v2805_v10, %v1208_v23  ;;  %v1298_v12 = vld [vmem:[#allocation2 + $0x10] sm:$0xff]  ;;  %v1297_v25 = vld [vmem:[#allocation2 + $0x8] sm:$0xff]  ;;  %v1229_v10 = vmul.f32 %v2790_v29, %v1209_v19  ;;  %v1299_v29 = vld [vmem:[#allocation2 + $0x18] sm:$0xff] }
 0x1ff   :  { %2187 = vmatmul.mubr.msk.bf16.vlgmr.msra.gmra.mrb[0].mxu1 %vm37_vm0, %v998_v17  ;;  %v1142_v18 = vpack.c.bf16 %v1140_v35, %v1139_v33  ;;  %v1230_v49 = vmul.f32 %v2794_v47, %v1210_v44  ;;  %v1318_v60 = vmul.f32 %v2798_v43, %v1298_v12  ;;  %v1317_v57 = vmul.f32 %v2809_v13, %v1297_v25  ;;  %v2054_v17 = vld [vmem:[%s3007_s5 + $0xa] sm:$0x3]  ;;  %v1300_v47 = vld [vmem:[#allocation2 + $0x20] sm:$0xff]  ;;  %v1388_v22 = vld [vmem:[#allocation2 + $0x11] sm:$0xff] }
 0x200   :  { %2191 = vmatpush3.bf16.msra.mxu1 %v1066_v21  ;;  %2192 = vmatprep.mubr.msk.bf16.mxu1 %vm37_vm0, %v970_v20  ;;  %v1231_v51 = vpack.c.bf16 %v1228_v41, %v1227_v36  ;;  %v1332_v15 = vsel %vm121_vm1, %v2051_v48, 0  ;;  %v1387_v43 = vld [vmem:[#allocation2 + $0x9] sm:$0xff]  ;;  %v1319_v13 = vmul.f32 %v2803_v63, %v1299_v29  ;;  %v1320_v21 = vmul.f32 %v2816_v16, %v1300_v47  ;;  %v1389_v63 = vld [vmem:[#allocation2 + $0x19] sm:$0xff]  ;;  %v1390_v16 = vld [vmem:[#allocation2 + $0x21] sm:$0xff]  ;;  %v1663_v36 = vpop.permute.xlu0 %1662 }
 0x201   :  { %2323 = vmatprep.subr.msk.bf16.mxu1 %vm121_vm1, %v2045_v58  ;;  %v1232_v14 = vpack.c.bf16 %v1230_v49, %v1229_v10  ;;  %v1321_v52 = vpack.c.bf16 %v1318_v60, %v1317_v57  ;;  %v1407_v20 = vmul.f32 %v2807_v4, %v1387_v43  ;;  %v1408_v58 = vmul.f32 %v2823_v26, %v1388_v22  ;;  %v2057_v45 = vld [vmem:[%s3007_s5 + $0xc] sm:$0x3]  ;;  %v2060_v56 = vld [vmem:[%s3007_s5 + $0xe] sm:$0x3]  ;;  %v2063_v23 = vld [vmem:[%s3007_s5 + $0x10] sm:$0x3] }
 0x202   :  { %v1322_v30 = vpack.c.bf16 %v1320_v21, %v1319_v13  ;;  %v1422_v7 = vsel %vm121_vm1, %v2054_v17, 0  ;;  %v1409_v4 = vmul.f32 %v2814_v62, %v1389_v63  ;;  %v1410_v26 = vmul.f32 %v2821_v31, %v1390_v16  ;;  %v1480_v62 = vld [vmem:[#allocation2 + $0x23] sm:$0xff] }
 0x203   :  { %v1411_v34 = vpack.c.bf16 %v1408_v58, %v1407_v20  ;;  %v1498_v0 = vmul.f32 %v2829_v37, %v2864_v61  ;;  %v1499_v31 = vmul.f32 %v2833_v39, %v2866_v53  ;;  %v1581_v37 = vpop.permute.xlu1 %1580  ;;  %v1602_v61 = vsel %vm121_vm1, %v2060_v56, 0  ;;  %v1570_v39 = vld [vmem:[#allocation2 + $0x24] sm:$0xff] }
 0x204   :  { %v1660_v59 = vld [vmem:[#allocation2 + $0x25] sm:$0xff] }
 0x207   :  { %v1585_v33 = vpop.permute.xlu1 %1584 }
 0x208   :  { %v1590_v53 = vmul.f32 %v1585_v33, %v1570_v39 }
 0x20b   :  { %2193 = vmatmul.mubr.msk.bf16.vlgmr.msra.gmra.mrb[0].mxu1 %vm37_vm0, %v971_v24  ;;  %v1497_v24 = vmul.f32 %v2831_v38, %v2844_v11  ;;  %v1500_v38 = vmul.f32 %v2835_v40, %v1480_v62  ;;  %v1589_v40 = vmul.f32 %v1581_v37, %v2837_v42  ;;  %v1667_v35 = vpop.permute.xlu1 %1666  ;;  %v1675_v42 = vpop.permute.xlu0 %1674 }
 0x20c   :  { %2197 = vmatpush3.bf16.msra.mxu1 %v1152_v27  ;;  %2198 = vmatprep.mubr.msk.bf16.mxu1 %vm37_vm0, %v1141_v28  ;;  %v1412_v27 = vpack.c.bf16 %v1410_v26, %v1409_v4  ;;  %v1512_v28 = vsel %vm121_vm1, %v2057_v45, 0  ;;  %v1678_v41 = vmul.f32 %v1667_v35, %v2884_v54  ;;  %v1680_v19 = vmul.f32 %v1675_v42, %v1660_v59 }
 0x20d   :  { %2324 = vmatprep.subr.msk.bf16.mxu1 %vm121_vm1, %v2048_v32  ;;  %v1501_v32 = vpack.c.bf16 %v1498_v0, %v1497_v24  ;;  %v1502_v11 = vpack.c.bf16 %v1500_v38, %v1499_v31 }
 0x20f   :  { %v1671_v2 = vpop.permute.xlu1 %1670 }
 0x217   :  { %2199 = vmatmul.mubr.msk.bf16.vlgmr.msra.gmra.mrb[0].mxu1 %vm37_vm0, %v1142_v18  ;;  %v1677_v18 = vmul.f32 %v1663_v36, %v2868_v50  ;;  %v1822_v50 = vld [vmem:[%s3010_s8] sm:$0xf] }
 0x218   :  { %2203 = vmatpush3.bf16.msra.mxu1 %v1242_v46  ;;  %2204 = vmatprep.mubr.msk.bf16.mxu1 %vm37_vm0, %v1231_v51  ;;  %v1592_v46 = vpack.c.bf16 %v1590_v53, %v1589_v40  ;;  %v1692_v51 = vsel %vm121_vm1, %v2063_v23, 0  ;;  %v2066_v40 = vld [vmem:[%s3008_s6] ss:$0 sm:$0xff] }
 0x219   :  { %2325 = vmatprep.subr.msk.bf16.mxu1 %vm121_vm1, %v2051_v48  ;;  %v1681_v48 = vpack.c.bf16 %v1678_v41, %v1677_v18  ;;  %2239 = vmatpush3.msk.msra.mxu0 %vm1838_vm2, %v1822_v50 }
 0x223   :  { %2205 = vmatmul.mubr.msk.bf16.vlgmr.msra.gmra.mrb[0].mxu1 %vm37_vm0, %v1232_v14 }
 0x224   :  { %2209 = vmatpush3.bf16.msra.mxu1 %v1332_v15  ;;  %2210 = vmatprep.mubr.msk.bf16.mxu1 %vm37_vm0, %v1321_v52 }
 0x225   :  { %2326 = vmatprep.subr.msk.bf16.mxu1 %vm121_vm1, %v2054_v17 }
 0x22f   :  { %2211 = vmatmul.mubr.msk.bf16.vlgmr.msra.gmra.mrb[0].mxu1 %vm37_vm0, %v1322_v30 }
 0x230   :  { %2215 = vmatpush3.bf16.msra.mxu1 %v1422_v7  ;;  %2216 = vmatprep.mubr.msk.bf16.mxu1 %vm37_vm0, %v1411_v34 }
 0x231   :  { %2327 = vmatprep.subr.msk.bf16.mxu1 %vm121_vm1, %v2057_v45 }
 0x23b   :  { %2217 = vmatmul.mubr.msk.bf16.vlgmr.msra.gmra.mrb[0].mxu1 %vm37_vm0, %v1412_v27 }
 0x23c   :  { %2221 = vmatpush3.bf16.msra.mxu1 %v1512_v28  ;;  %2222 = vmatprep.mubr.msk.bf16.mxu1 %vm37_vm0, %v1501_v32 }
 0x23d   :  { %2328 = vmatprep.subr.msk.bf16.mxu1 %vm121_vm1, %v2060_v56 }
 0x247   :  { %2223 = vmatmul.mubr.msk.bf16.vlgmr.msra.gmra.mrb[0].mxu1 %vm37_vm0, %v1502_v11 }
 0x248   :  { %2227 = vmatpush3.bf16.msra.mxu1 %v1602_v61  ;;  %2228 = vmatprep.mubr.msk.bf16.mxu1 %vm37_vm0, %v1591_v1  ;;  %v1679_v1 = vmul.f32 %v1671_v2, %v2886_v55 }
 0x249   :  { %2329 = vmatprep.subr.msk.bf16.mxu1 %vm121_vm1, %v2063_v23 }
 0x24a   :  { %v1682_v54 = vpack.c.bf16 %v1680_v19, %v1679_v1 }
 0x253   :  { %2229 = vmatmul.mubr.msk.bf16.vlgmr.msra.gmra.mrb[0].mxu1 %vm37_vm0, %v1592_v46  ;;  %v2067_v46 = vld [vmem:[%s3009_s7] ss:$0 sm:$0xff] }
 0x254   :  { %2233 = vmatpush3.bf16.msra.mxu1 %v1692_v51  ;;  %2234 = vmatprep.mubr.msk.bf16.mxu1 %vm37_vm0, %v1681_v48 }
 0x255   :  { %2243 = vmatprep.subr.mxu1 %v2407_v8 }
 0x25f   :  { %2235 = vmatmul.mubr.msk.bf16.vlgmr.msra.gmra.mrb[0].mxu1 %vm37_vm0, %v1682_v54 }
 0x260   :  { %2244 = vmatpush3.msk.msra.mxu1 %vm1838_vm2, %v1822_v50  ;;  %2245 = vmatprep.mubr.msk.f32.mxu1 %vm2416_vm3, %v2407_v8 }
 0x332   :  { %v2236_v44 = vpop.f32.mrb[0].mxu1 }
 0x333   :  { %v1728_v12 = vpop.f32.mrb[1].mxu1  ;;  %v1763_v49 = vmul.f32 %v2236_v44, %v2236_v44  ;;  %v1750_v52 = vsel %vm37_vm0, %v2236_v44, 0.0 }
 0x334   :  { %v1761_v25 = vmul.f32 %v1728_v12, %v1728_v12  ;;  %v2237_v55 = vpop.f32.mrb[2].mxu1  ;;  %v1747_v60 = vsel %vm37_vm0, %v1728_v12, 0.0 }
 0x335   :  { %v1731_v10 = vpop.f32.mrb[3].mxu1  ;;  %v1764_v29 = vmul.f32 %v2237_v55, %v2237_v55  ;;  %v1768_v22 = vsel %vm37_vm0, %v1763_v49, 0.0  ;;  %v1752_v13 = vsel %vm37_vm0, %v2237_v55, 0.0 }
 0x336   :  { %v1748_v57 = vsel %vm37_vm0, %v1731_v10, 0.0  ;;  %v1762_v14 = vmul.f32 %v1731_v10, %v1731_v10  ;;  %v1765_v17 = vsel %vm37_vm0, %v1761_v25, 0.0 }
 0x337   :  { %v1749_v15 = vadd.f32 %v1748_v57, %v1747_v60  ;;  %v1770_v58 = vsel %vm37_vm0, %v1764_v29, 0.0 }
 0x338   :  { %v1766_v47 = vsel %vm37_vm0, %v1762_v14, 0.0 }
 0x339   :  { %v1751_v8 = vadd.f32 %v1750_v52, %v1749_v15  ;;  %v1767_v43 = vadd.f32 %v1766_v47, %v1765_v17 }
 0x33b   :  { %v1753_v21 = vadd.f32 %v1752_v13, %v1751_v8  ;;  %v1769_v20 = vadd.f32 %v1768_v22, %v1767_v43 }
 0x33d   :  { %v1754_v30 = vrot.slane %v1753_v21, 4  ;;  %v1771_v7 = vadd.f32 %v1770_v58, %v1769_v20 }
 0x33f   :  { %v1755_v34 = vadd.f32 %v1754_v30, %v1753_v21  ;;  %v1772_v45 = vrot.slane %v1771_v7, 4 }
 0x341   :  { %v1756_v63 = vrot.slane %v1755_v34, 2  ;;  %v1773_v16 = vadd.f32 %v1772_v45, %v1771_v7 }
 0x343   :  { %v1757_v4 = vadd.f32 %v1756_v63, %v1755_v34  ;;  %v1774_v26 = vrot.slane %v1773_v16, 2  ;;  %v1823_v34 = vld [vmem:[%s3011_s9] sm:$0x1] }
 0x345   :  { %v1758_v0 = vrot.slane %v1757_v4, 1  ;;  %v1775_v24 = vadd.f32 %v1774_v26, %v1773_v16 }
 0x347   :  { %v1759_v27 = vadd.f32 %v1758_v0, %v1757_v4  ;;  %v1776_v28 = vrot.slane %v1775_v24, 1 }
 0x349   :  { %v1760_v32 = vmul.f32 0.03125, %v1759_v27  ;;  %v1777_v56 = vadd.f32 %v1776_v28, %v1775_v24 }
 0x34b   :  { %v1778_v62 = vmul.f32 0.03125, %v1777_v56  ;;  %v1779_v31 = vmul.f32 %v1760_v32, %v1760_v32  ;;  %v1783_v37 = vsub.f32 %v1728_v12, %v1760_v32  ;;  %v1784_v38 = vsub.f32 %v1731_v10, %v1760_v32 }
 0x34c   :  { %v1785_v11 = vsub.f32 %v2236_v44, %v1760_v32  ;;  %v1786_v61 = vsub.f32 %v2237_v55, %v1760_v32 }
 0x34d   :  { %v1780_v23 = vsub.f32 %v1778_v62, %v1779_v31  ;;  %v1793_v53 = vmul.f32 %v2066_v40, %v1783_v37  ;;  %v1794_v35 = vmul.f32 %v2066_v40, %v1784_v38 }
 0x34e   :  { %v1795_v36 = vmul.f32 %v2066_v40, %v1785_v11  ;;  %v1796_v41 = vmul.f32 %v2066_v40, %v1786_v61 }
 0x34f   :  { %v1781_v33 = vmax.f32 %v1780_v23, 0.0 }
 0x351   :  { %v1797_v39 = vadd.f32 1e-05, %v1781_v33 }
 0x353   :  { %2380 = vrsqrt.f32 %v1797_v39 }
 0x35d   :  { %v2381_v18 = vpop.eup %2380 }
 0x35e   :  { %v1799_v51 = vmul.f32 %v2381_v18, %v1793_v53  ;;  %v1800_v48 = vmul.f32 %v2381_v18, %v1794_v35  ;;  %v1801_v2 = vmul.f32 %v2381_v18, %v1795_v36  ;;  %v1802_v42 = vmul.f32 %v2381_v18, %v1796_v41 }
 0x360   :  { %v1810_v59 = vadd.f32 %v2067_v46, %v1799_v51  ;;  %v1811_v1 = vadd.f32 %v2067_v46, %v1800_v48  ;;  %v1812_v19 = vadd.f32 %v2067_v46, %v1801_v2  ;;  %v1813_v54 = vadd.f32 %v2067_v46, %v1802_v42 }
 0x362   :  { %v1814_v50 = vadd.f32 %v1810_v59, %v2505_v6  ;;  %v1815_v44 = vadd.f32 %v1811_v1, %v2488_v3  ;;  %v1816_v12 = vadd.f32 %v1812_v19, %v2500_v5  ;;  %v1817_v25 = vadd.f32 %v1813_v54, %v2527_v9 }
 0x364   :  { %v1818_v55 = vmax.f32 %v1814_v50, 0.0  ;;  %v1819_v10 = vmax.f32 %v1815_v44, 0.0  ;;  %v1820_v49 = vmax.f32 %v1816_v12, 0.0  ;;  %v1821_v60 = vmax.f32 %v1817_v25, 0.0 }
 0x366   :  { %v1824_v57 = vsel %vm37_vm0, %v1818_v55, 0.0  ;;  %v1825_v14 = vsel %vm37_vm0, %v1819_v10, 0.0  ;;  %v1914_v15 = vsel %vm37_vm0, %v1820_v49, 0.0  ;;  %v1915_v52 = vsel %vm37_vm0, %v1821_v60, 0.0 }
 0x367   :  { %v1826_v17 = vadd.f32 %v1825_v14, %v1824_v57  ;;  %v1916_v6 = vadd.f32 %v1915_v52, %v1914_v15 }
 0x369   :  { %v1827_v29 = vrot.slane %v1826_v17, 4  ;;  %v1917_v3 = vrot.slane %v1916_v6, 4 }
 0x36b   :  { %v1828_v47 = vadd.f32 %v1827_v29, %v1826_v17  ;;  %v1918_v5 = vadd.f32 %v1917_v3, %v1916_v6 }
 0x36d   :  { %v1829_v8 = vrot.slane %v1828_v47, 2  ;;  %v1919_v9 = vrot.slane %v1918_v5, 2 }
 0x36f   :  { %v1830_v43 = vadd.f32 %v1829_v8, %v1828_v47  ;;  %v1920_v22 = vadd.f32 %v1919_v9, %v1918_v5 }
 0x371   :  { %v1831_v13 = vrot.slane %v1830_v43, 1  ;;  %v1921_v21 = vrot.slane %v1920_v22, 1 }
 0x373   :  { %v1832_v20 = vadd.f32 %v1831_v13, %v1830_v43  ;;  %v1922_v58 = vadd.f32 %v1921_v21, %v1920_v22 }
 0x375   :  { %v1834_v30 = vmul.f32 0.0625, %v1832_v20  ;;  %v1923_v7 = vmul.f32 0.0625, %v1922_v58 }
 0x377   :  { %2241 = vmatmul.mubr.msk.f32.vlgmr.msra.gmra.mrb[4].mxu0 %vm37_vm0, %v1834_v30  ;;  %2246 = vmatmul.mubr.msk.f32.vlgmr.msra.gmra.mrb[4].mxu1 %vm37_vm0, %v1923_v7 }
 0x44a   :  { %v1908_v45 = vpop.f32.mrb[4].mxu0  ;;  %v1993_v63 = vpop.f32.mrb[4].mxu1 }
 0x44b   :  { %v1909_v16 = vadd.f32 %v1908_v45, %v1823_v34  ;;  %v1994_v4 = vadd.f32 %v1993_v63, %v1823_v34  ;;  %v2242_v26 = vpop.f32.mrb[5].mxu0  ;;  %v2247_v0 = vpop.f32.mrb[5].mxu1 }
 0x44d   :  { %1913 = vst.msk [vmem:[#allocation3] sm:$0x1] %vm1912_vm4, %v1909_v16  ;;  %1997 = vst.msk [vmem:[#allocation3 + $0x1] sm:$0x1] %vm1912_vm4, %v1994_v4 }
 0x44e   :  { %2393 = shalt.err (!%p2390_p4)
}
 0x44f   :  { %s2394_s28 = scalar_lea.hbm %s3012_s10, 32 }
 0x450   :  { %p2395_p5 = scmp.ne.s32.totalorder %s3012_s10, %s2394_s28  ;;  %p2398_p6 = scmp.lt.u32.totalorder %s2394_s28, %s3012_s10 }
 0x452   :  { %p2400_p7 = pnand %p2398_p6, %p2395_p5 }
 0x454   :  { %2403 = shalt.err (!%p2400_p7)
}
 0x455   :  { %2007 = dma.vmem_to_hbm [thread:$0]  %s2005_s26, 32, %s3012_s10, [#allocation4]  }
 0x456   :  { %2404 = dma.done.wait [#allocation4], 32  }
 0x457   :  { %2405 = vsyncadd [#allocation4], 4294967264 }
 0x458   :  { %2011 = vsyncpa [#allocation4], 1 }

</bundles_post_ra>
